<compile_context>
chip_gen: v7x
topology: tpu7x:2x2x1
jax: 0.10.0
libtpu: 0.0.40
codegen_flags: <defaults>
</compile_context>

<pallas_src>
import functools

import numpy as np

import jax
import jax.numpy as jnp
from jax.experimental import pallas as pl
from jax.experimental.pallas import tpu as pltpu


def _encoder_kernel(num_heads,
                    x_ref, pos_ref, we_ref, be_ref,
                    wqkv_ref, bqkv_ref, wo_ref, bo_ref,
                    ln1g_ref, ln1b_ref,
                    wf1_ref, bf1_ref, wf2_ref, bf2_ref,
                    ln2g_ref, ln2b_ref,
                    lnfg_ref, lnfb_ref,
                    out_ref, xf_ref):
    """One grid step == one transformer layer for one batch tile.

    Block shapes seen by the kernel:
      x_ref   : (bt, Lv, F) f32     pos_ref : (bt|1, Lv, E) f32
      we_ref  : (F, E)      bf16    be_ref  : (1, E)  f32
      wqkv_ref: (1, E, 3E)  bf16    bqkv_ref: (1, 1, 3E) f32
      wo_ref  : (1, E, E)   bf16    bo_ref  : (1, 1, E)  f32
      wf1_ref : (1, E, 4E)  bf16    bf1_ref : (1, 1, 4E) f32
      wf2_ref : (1, 4E, E)  bf16    bf2_ref : (1, 1, E)  f32
      ln*_ref : (1, 1, E)   f32     lnf*_ref: (1, E) f32
      out_ref : (bt, Lv, E) f32     xf_ref  : (bt*Lv, E) f32 scratch (layer carry)
    """
    d = pl.program_id(1)
    n_layers = pl.num_programs(1)

    bt, Lv, F = x_ref.shape
    E = we_ref.shape[1]
    H = num_heads
    hd = E // H
    M = bt * Lv
    scale = float(hd) ** -0.5
    eps = 1e-5
    cd = jnp.bfloat16          # MXU operand dtype; elementwise math stays fp32

    def layer_norm(t, g, b):
        mu = jnp.mean(t, axis=-1, keepdims=True)
        var = jnp.mean((t - mu) * (t - mu), axis=-1, keepdims=True)
        return (t - mu) * jax.lax.rsqrt(var + eps) * g + b

    # ---- prologue (first layer of each batch tile): embed + positional add ----
    @pl.when(d == 0)
    def _():
        xe = jnp.dot(x_ref[...].reshape(M, F).astype(cd), we_ref[...],
                     preferred_element_type=jnp.float32) + be_ref[...]
        pos = jnp.broadcast_to(pos_ref[...], (bt, Lv, E)).reshape(M, E)
        xf_ref[...] = xe + pos

    xf = xf_ref[...]                                            # (M, E) fp32

    # ---- self-attention block (post-norm; dropout = identity at inference) ----
    qkv = jnp.dot(xf.astype(cd), wqkv_ref[0],
                  preferred_element_type=jnp.float32) + bqkv_ref[0]   # (M, 3E)
    wo = wo_ref[0]                                              # (E, E) bf16
    attn = jnp.zeros((M, E), jnp.float32)
    for h in range(H):                      # static unroll; hd=128 -> lane-aligned slices
        q = qkv[:, h * hd:(h + 1) * hd].reshape(bt, Lv, hd)
        k = qkv[:, E + h * hd:E + (h + 1) * hd].reshape(bt, Lv, hd)
        v = qkv[:, 2 * E + h * hd:2 * E + (h + 1) * hd].reshape(bt, Lv, hd)
        s = jnp.einsum('bqd,bkd->bqk', q.astype(cd), k.astype(cd),
                       preferred_element_type=jnp.float32) * scale
        s = s - jnp.max(s, axis=-1, keepdims=True)
        p = jnp.exp(s)
        p = p * pl.reciprocal(jnp.sum(p, axis=-1, keepdims=True), approx=True)
        oh = jnp.einsum('bqk,bkd->bqd', p.astype(cd), v.astype(cd),
                        preferred_element_type=jnp.float32)    # (bt, Lv, hd)
        # per-head output-projection accumulation -> no head concat / relayout
        attn = attn + jnp.dot(oh.reshape(M, hd).astype(cd),
                              wo[h * hd:(h + 1) * hd, :],
                              preferred_element_type=jnp.float32)
    attn = attn + bo_ref[0]
    xf = layer_norm(xf + attn, ln1g_ref[0], ln1b_ref[0])

    # ---- feed-forward block (relu, no dropout at inference) ----
    ff = jnp.dot(xf.astype(cd), wf1_ref[0],
                 preferred_element_type=jnp.float32) + bf1_ref[0]
    ff = jnp.maximum(ff, 0.0)
    ff = jnp.dot(ff.astype(cd), wf2_ref[0],
                 preferred_element_type=jnp.float32) + bf2_ref[0]
    xf = layer_norm(xf + ff, ln2g_ref[0], ln2b_ref[0])

    xf_ref[...] = xf

    # ---- epilogue (last layer): module-level LayerNorm + lane-dense store ----
    @pl.when(d == n_layers - 1)
    def _():
        y = layer_norm(xf, lnfg_ref[...], lnfb_ref[...])
        out_ref[...] = y.reshape(bt, Lv, E).astype(out_ref.dtype)


def tabular_transformer_encoder_forward(x, params, num_heads, masks=None):
    """Pallas-backed forward of TabularTransformerEncoder (inference mode).

    NOTE: when `masks` is given, the number of visible tokens defines the output
    shape and must be host-static; the mask is consumed as a concrete host array.
    """
    B, L, F = x.shape
    E = params["we"].shape[1]
    depth = params["wqkv"].shape[0]
    max_length = params["pos_embed"].shape[0]
    assert L <= max_length, "Input length exceeds max length"
    assert E % num_heads == 0, "embed_dim must be divisible by num_heads"
    # perf assumption: head_dim (= E // num_heads) a multiple of 128 keeps all head
    # slices and stores lane-aligned; other sizes remain correct but slower.

    pos = params["pos_embed"][:L]                                   # (L, E) fp32

    if masks is not None:
        # The gather x[masks].view(B,-1,E) in the spec happens AFTER embed+pos, but
        # the embed is per-token, so gathering tokens + their pos rows first is
        # mathematically identical and keeps dynamic shapes out of the kernel.
        masks_np = np.asarray(masks, dtype=bool)          # host-side: nv must be static
        counts = masks_np.sum(axis=1)
        nv = int(counts[0])
        assert (counts == nv).all(), (
            "All batches must have the same number of visible patches")
        # stable sort keeps visible tokens in their original order (== x[masks])
        idx_np = np.argsort(~masks_np, axis=1, kind="stable")[:, :nv]
        idx = jnp.asarray(idx_np)                                   # (B, nv)
        x_in = jnp.take_along_axis(x, idx[:, :, None], axis=1)      # (B, nv, F)
        pos_in = jnp.take(pos, idx, axis=0)                         # (B, nv, E)
        Lv = nv
    else:
        x_in = x
        pos_in = pos[None]              # (1, L, E): broadcast in-kernel, no BxLxE HBM copy
        Lv = L

    # Split B across at most two batch tiles so both v7x TensorCores get work
    # ("parallel" axis); single-TC chips simply iterate the tiles.
    n_b_tiles = 2 if (B >= 2 and B % 2 == 0) else 1
    bt = B // n_b_tiles

    kernel = functools.partial(_encoder_kernel, num_heads)

    if masks is not None:
        pos_spec = pl.BlockSpec((bt, Lv, E), lambda b, d: (b, 0, 0))
    else:
        pos_spec = pl.BlockSpec((1, Lv, E), lambda b, d: (0, 0, 0))

    def layer_spec(arr):
        s1, s2 = arr.shape[1], arr.shape[2]
        return pl.BlockSpec((1, s1, s2), lambda b, d: (d, 0, 0))

    def global_spec(arr):
        r, c = arr.shape
        return pl.BlockSpec((r, c), lambda b, d: (0, 0))

    inputs = [
        x_in, pos_in, params["we"], params["be"],
        params["wqkv"], params["bqkv"], params["wo"], params["bo"],
        params["ln1_g"], params["ln1_b"],
        params["wf1"], params["bf1"], params["wf2"], params["bf2"],
        params["ln2_g"], params["ln2_b"],
        params["lnf_g"], params["lnf_b"],
    ]
    in_specs = [
        pl.BlockSpec((bt, Lv, F), lambda b, d: (b, 0, 0)),          # x
        pos_spec,                                                   # pos
        global_spec(params["we"]), global_spec(params["be"]),
        layer_spec(params["wqkv"]), layer_spec(params["bqkv"]),
        layer_spec(params["wo"]), layer_spec(params["bo"]),
        layer_spec(params["ln1_g"]), layer_spec(params["ln1_b"]),
        layer_spec(params["wf1"]), layer_spec(params["bf1"]),
        layer_spec(params["wf2"]), layer_spec(params["bf2"]),
        layer_spec(params["ln2_g"]), layer_spec(params["ln2_b"]),
        global_spec(params["lnf_g"]), global_spec(params["lnf_b"]),
    ]

    out = pl.pallas_call(
        kernel,
        out_shape=jax.ShapeDtypeStruct((B, Lv, E), jnp.float32),
        grid_spec=pltpu.PrefetchScalarGridSpec(
            num_scalar_prefetch=0,
            grid=(n_b_tiles, depth),               # depth innermost: layer pipelining
            in_specs=in_specs,
            out_specs=pl.BlockSpec((bt, Lv, E), lambda b, d: (b, 0, 0)),
            scratch_shapes=[pltpu.VMEM((bt * Lv, E), jnp.float32)],  # layer carry
        ),
        compiler_params=pltpu.CompilerParams(
            dimension_semantics=("parallel", "arbitrary")),
    )(*inputs)
    return out


def init_params(key, num_features, max_length, embed_dim, num_heads, depth):
    """Deterministic synthetic parameters.  Matmul weights stored bf16 (MXU operands,
    half the HBM->VMEM bytes); biases / LayerNorm / pos_embed stay fp32."""
    E = embed_dim
    Fh = 4 * embed_dim
    ks = jax.random.split(key, 12)

    def lin(k, fan_in, fan_out, batch=()):
        bound = 1.0 / (fan_in ** 0.5)
        kw, kb = jax.random.split(k)
        w = jax.random.uniform(kw, batch + (fan_in, fan_out), jnp.float32, -bound, bound)
        b = jax.random.uniform(kb, batch + (1, fan_out), jnp.float32, -bound, bound)
        return w.astype(jnp.bfloat16), b

    we, be = lin(ks[0], num_features, E)
    wqkv, bqkv = lin(ks[1], E, 3 * E, (depth,))
    wo, bo = lin(ks[2], E, E, (depth,))
    wf1, bf1 = lin(ks[3], E, Fh, (depth,))
    wf2, bf2 = lin(ks[4], Fh, E, (depth,))

    # LayerNorm params perturbed from (1, 0) so the affine part is exercised.
    ln1_g = 1.0 + 0.1 * jax.random.normal(ks[5], (depth, 1, E), jnp.float32)
    ln1_b = 0.1 * jax.random.normal(ks[6], (depth, 1, E), jnp.float32)
    ln2_g = 1.0 + 0.1 * jax.random.normal(ks[7], (depth, 1, E), jnp.float32)
    ln2_b = 0.1 * jax.random.normal(ks[8], (depth, 1, E), jnp.float32)
    lnf_g = 1.0 + 0.1 * jax.random.normal(ks[9], (1, E), jnp.float32)
    lnf_b = 0.1 * jax.random.normal(ks[10], (1, E), jnp.float32)

    # PyTorch initializes pos_embed to zeros; use small random values here so the
    # positional-add path is actually validated numerically.
    pos_embed = 0.02 * jax.random.normal(ks[11], (max_length, E), jnp.float32)

    return dict(we=we, be=be, wqkv=wqkv, bqkv=bqkv, wo=wo, bo=bo,
                wf1=wf1, bf1=bf1, wf2=wf2, bf2=bf2,
                ln1_g=ln1_g, ln1_b=ln1_b, ln2_g=ln2_g, ln2_b=ln2_b,
                lnf_g=lnf_g, lnf_b=lnf_b, pos_embed=pos_embed)


def ref_forward(x, masks, p, num_heads):
    """Pure-JAX fp32 reference following the PyTorch forward order exactly
    (uses the same bf16-rounded weight values, upcast to fp32)."""
    B, L, _ = x.shape
    E = p["we"].shape[1]
    depth = p["wqkv"].shape[0]
    hd = E // num_heads
    f32 = lambda a: jnp.asarray(a, jnp.float32)

    def ln(t, g, b):
        mu = t.mean(-1, keepdims=True)
        var = ((t - mu) ** 2).mean(-1, keepdims=True)
        return (t - mu) / jnp.sqrt(var + 1e-5) * g + b

    h = x @ f32(p["we"]) + p["be"] + p["pos_embed"][None, :L, :]
    if masks is not None:
        # mirror x[masks].view(B, -1, E) (boolean gather after embed+pos)
        h = jnp.asarray(np.asarray(h)[np.asarray(masks, bool)]).reshape(B, -1, E)

    for l in range(depth):
        qkv = h @ f32(p["wqkv"][l]) + p["bqkv"][l]
        q, k, v = qkv[..., :E], qkv[..., E:2 * E], qkv[..., 2 * E:]
        outs = []
        for hh in range(num_heads):
            sl = slice(hh * hd, (hh + 1) * hd)
            s = jnp.einsum('bqd,bkd->bqk', q[..., sl], k[..., sl]) / (hd ** 0.5)
            pa = jax.nn.softmax(s, axis=-1)
            outs.append(jnp.einsum('bqk,bkd->bqd', pa, v[..., sl]))
        attn = jnp.concatenate(outs, -1) @ f32(p["wo"][l]) + p["bo"][l]
        h = ln(h + attn, p["ln1_g"][l], p["ln1_b"][l])
        ff = (jnp.maximum(h @ f32(p["wf1"][l]) + p["bf1"][l], 0.0)
              @ f32(p["wf2"][l]) + p["bf2"][l])
        h = ln(h + ff, p["ln2_g"][l], p["ln2_b"][l])
    return ln(h, p["lnf_g"], p["lnf_b"])


if __name__ == "__main__":
    # Small config: num_features=16, max_length=16, embed_dim=256, heads=2, depth=2.
    num_features = 16
    max_length = 16
    embed_dim = 256
    num_heads = 2
    depth = 2
    B, L = 2, 16                       # 8 visible tokens per batch after masking

    key = jax.random.PRNGKey(0)
    kx, kp = jax.random.split(key)
    x = jax.random.normal(kx, (B, L, num_features), jnp.float32)
    masks = (jnp.zeros((B, L), jnp.bool_)
             .at[0, 0:8].set(True)
             .at[1, 4:12].set(True))

    params = init_params(kp, num_features, max_length, embed_dim, num_heads, depth)

    # Tolerance: kernel uses bf16 MXU operands + approx EUP reciprocal; reference is
    # fp32 with identical (bf16-rounded) weights.
    ATOL = RTOL = 3e-2

    # --- masked path ---
    out_m = jax.block_until_ready(
        tabular_transformer_encoder_forward(x, params, num_heads, masks=masks))
    assert out_m.shape == (B, 8, embed_dim), out_m.shape
    ref_m = ref_forward(x, masks, params, num_heads)
    err_m = float(jnp.max(jnp.abs(out_m - ref_m)))
    assert jnp.allclose(out_m, ref_m, atol=ATOL, rtol=RTOL), f"masked max err {err_m}"

    # --- unmasked path ---
    out_u = jax.block_until_ready(
        tabular_transformer_encoder_forward(x, params, num_heads, masks=None))
    assert out_u.shape == (B, L, embed_dim), out_u.shape
    ref_u = ref_forward(x, None, params, num_heads)
    err_u = float(jnp.max(jnp.abs(out_u - ref_u)))
    assert jnp.allclose(out_u, ref_u, atol=ATOL, rtol=RTOL), f"unmasked max err {err_u}"

    # TODO(synk): dropout (p=0.1) in attention/FFN is inference-mode identity here.
    print("KERNEL_OK")
</pallas_src>

<mosaic_0001>
module attributes {stable_mosaic.version = 11 : i64} {
  func.func @_encoder_kernel(%arg0: i32, %arg1: i32, %arg2: memref<1x8x16xf32, #tpu.memory_space<vmem>>, %arg3: memref<1x8x256xf32, #tpu.memory_space<vmem>>, %arg4: memref<16x256xbf16, #tpu.memory_space<vmem>>, %arg5: memref<1x256xf32, #tpu.memory_space<vmem>>, %arg6: memref<1x256x768xbf16, #tpu.memory_space<vmem>>, %arg7: memref<1x1x768xf32, #tpu.memory_space<vmem>>, %arg8: memref<1x256x256xbf16, #tpu.memory_space<vmem>>, %arg9: memref<1x1x256xf32, #tpu.memory_space<vmem>>, %arg10: memref<1x1x256xf32, #tpu.memory_space<vmem>>, %arg11: memref<1x1x256xf32, #tpu.memory_space<vmem>>, %arg12: memref<1x256x1024xbf16, #tpu.memory_space<vmem>>, %arg13: memref<1x1x1024xf32, #tpu.memory_space<vmem>>, %arg14: memref<1x1024x256xbf16, #tpu.memory_space<vmem>>, %arg15: memref<1x1x256xf32, #tpu.memory_space<vmem>>, %arg16: memref<1x1x256xf32, #tpu.memory_space<vmem>>, %arg17: memref<1x1x256xf32, #tpu.memory_space<vmem>>, %arg18: memref<1x256xf32, #tpu.memory_space<vmem>>, %arg19: memref<1x256xf32, #tpu.memory_space<vmem>>, %arg20: memref<1x8x256xf32, #tpu.memory_space<vmem>>, %arg21: memref<8x256xf32, #tpu.memory_space<vmem>>) attributes {dimension_semantics = [#tpu.dimension_semantics<parallel>, #tpu.dimension_semantics<arbitrary>], iteration_bounds = array<i64: 2, 2>, scalar_prefetch = 0 : i64, scratch_operands = 1 : i64, tpu.core_type = #tpu.core_type<tc>, window_params = [{transform_indices = @transform_0, window_bounds = array<i64: 1, 8, 16>}, {transform_indices = @transform_1, window_bounds = array<i64: 1, 8, 256>}, {pipeline_mode = #tpu.pipeline_mode<synchronous>, transform_indices = @transform_2, window_bounds = array<i64: 16, 256>}, {pipeline_mode = #tpu.pipeline_mode<synchronous>, transform_indices = @transform_3, window_bounds = array<i64: 1, 256>}, {transform_indices = @transform_4, window_bounds = array<i64: 1, 256, 768>}, {transform_indices = @transform_5, window_bounds = array<i64: 1, 1, 768>}, {transform_indices = @transform_6, window_bounds = array<i64: 1, 256, 256>}, {transform_indices = @transform_7, window_bounds = array<i64: 1, 1, 256>}, {transform_indices = @transform_8, window_bounds = array<i64: 1, 1, 256>}, {transform_indices = @transform_9, window_bounds = array<i64: 1, 1, 256>}, {transform_indices = @transform_10, window_bounds = array<i64: 1, 256, 1024>}, {transform_indices = @transform_11, window_bounds = array<i64: 1, 1, 1024>}, {transform_indices = @transform_12, window_bounds = array<i64: 1, 1024, 256>}, {transform_indices = @transform_13, window_bounds = array<i64: 1, 1, 256>}, {transform_indices = @transform_14, window_bounds = array<i64: 1, 1, 256>}, {transform_indices = @transform_15, window_bounds = array<i64: 1, 1, 256>}, {pipeline_mode = #tpu.pipeline_mode<synchronous>, transform_indices = @transform_16, window_bounds = array<i64: 1, 256>}, {pipeline_mode = #tpu.pipeline_mode<synchronous>, transform_indices = @transform_17, window_bounds = array<i64: 1, 256>}, {transform_indices = @transform_18, window_bounds = array<i64: 1, 8, 256>}]} {
    %c0_i32 = arith.constant 0 : i32
    %0 = arith.cmpi eq, %arg1, %c0_i32 : i32
    %1 = arith.extui %0 : i1 to i32
    %c0_i32_0 = arith.constant 0 : i32
    %2 = arith.cmpi ne, %1, %c0_i32_0 : i32
    scf.if %2 {
      %c0_67 = arith.constant 0 : index
      %c0_68 = arith.constant 0 : index
      %c0_69 = arith.constant 0 : index
      %157 = vector.load %arg2[%c0_67, %c0_68, %c0_69] : memref<1x8x16xf32, #tpu.memory_space<vmem>>, vector<1x8x16xf32>
      %158 = vector.shape_cast %157 : vector<1x8x16xf32> to vector<8x16xf32>
      %159 = arith.truncf %158 : vector<8x16xf32> to vector<8x16xbf16>
      %c0_70 = arith.constant 0 : index
      %c0_71 = arith.constant 0 : index
      %160 = vector.load %arg4[%c0_70, %c0_71] : memref<16x256xbf16, #tpu.memory_space<vmem>>, vector<16x256xbf16>
      %cst_72 = arith.constant dense<0.000000e+00> : vector<8x256xf32>
      %161 = tpu.matmul %159, %160, %cst_72 {dimension_numbers = #tpu.dot_dimension_numbers<[1], [0], [0], [1], [0, 0, 1, 1], [], []>} : vector<8x16xbf16>, vector<16x256xbf16>, vector<8x256xf32> -> vector<8x256xf32>
      %c0_73 = arith.constant 0 : index
      %c0_74 = arith.constant 0 : index
      %162 = vector.load %arg5[%c0_73, %c0_74] : memref<1x256xf32, #tpu.memory_space<vmem>>, vector<1x256xf32>
      %163 = vector.broadcast %162 : vector<1x256xf32> to vector<8x256xf32>
      %164 = arith.addf %161, %163 : vector<8x256xf32>
      %c0_75 = arith.constant 0 : index
      %c0_76 = arith.constant 0 : index
      %c0_77 = arith.constant 0 : index
      %165 = vector.load %arg3[%c0_75, %c0_76, %c0_77] : memref<1x8x256xf32, #tpu.memory_space<vmem>>, vector<1x8x256xf32>
      %166 = vector.shape_cast %165 : vector<1x8x256xf32> to vector<8x256xf32>
      %167 = arith.addf %164, %166 : vector<8x256xf32>
      %c0_78 = arith.constant 0 : index
      %c0_79 = arith.constant 0 : index
      %168 = vector.load %arg21[%c0_78, %c0_79] : memref<8x256xf32, #tpu.memory_space<vmem>>, vector<8x256xf32>
      tpu.vector_store %arg21[%c0_78, %c0_79], %167 {strides = array<i32>} : memref<8x256xf32, #tpu.memory_space<vmem>>, vector<8x256xf32>,
    } else {
    }
    %c0 = arith.constant 0 : index
    %c0_1 = arith.constant 0 : index
    %3 = vector.load %arg21[%c0, %c0_1] : memref<8x256xf32, #tpu.memory_space<vmem>>, vector<8x256xf32>
    %4 = arith.truncf %3 : vector<8x256xf32> to vector<8x256xbf16>
    %c0_2 = arith.constant 0 : index
    %c0_3 = arith.constant 0 : index
    %c0_4 = arith.constant 0 : index
    %5 = vector.load %arg6[%c0_2, %c0_3, %c0_4] : memref<1x256x768xbf16, #tpu.memory_space<vmem>>, vector<1x256x768xbf16>
    %6 = vector.shape_cast %5 : vector<1x256x768xbf16> to vector<256x768xbf16>
    %cst = arith.constant dense<0.000000e+00> : vector<8x768xf32>
    %7 = tpu.matmul %4, %6, %cst {dimension_numbers = #tpu.dot_dimension_numbers<[1], [0], [0], [1], [0, 0, 1, 1], [], []>} : vector<8x256xbf16>, vector<256x768xbf16>, vector<8x768xf32> -> vector<8x768xf32>
    %c0_5 = arith.constant 0 : index
    %c0_6 = arith.constant 0 : index
    %c0_7 = arith.constant 0 : index
    %8 = vector.load %arg7[%c0_5, %c0_6, %c0_7] : memref<1x1x768xf32, #tpu.memory_space<vmem>>, vector<1x1x768xf32>
    %9 = vector.shape_cast %8 : vector<1x1x768xf32> to vector<1x768xf32>
    %10 = vector.broadcast %9 : vector<1x768xf32> to vector<8x768xf32>
    %11 = arith.addf %7, %10 : vector<8x768xf32>
    %c0_8 = arith.constant 0 : index
    %c0_9 = arith.constant 0 : index
    %c0_10 = arith.constant 0 : index
    %12 = vector.load %arg8[%c0_8, %c0_9, %c0_10] : memref<1x256x256xbf16, #tpu.memory_space<vmem>>, vector<1x256x256xbf16>
    %13 = vector.shape_cast %12 : vector<1x256x256xbf16> to vector<256x256xbf16>
    %cst_11 = arith.constant 0.000000e+00 : f32
    %14 = vector.broadcast %cst_11 : f32 to vector<8x256xf32>
    %15 = vector.extract_strided_slice %11 {offsets = [0, 0], sizes = [8, 128], strides = [1, 1]} : vector<8x768xf32> to vector<8x128xf32>
    %16 = vector.shape_cast %15 : vector<8x128xf32> to vector<1x8x128xf32>
    %17 = vector.extract_strided_slice %11 {offsets = [0, 256], sizes = [8, 128], strides = [1, 1]} : vector<8x768xf32> to vector<8x128xf32>
    %18 = vector.shape_cast %17 : vector<8x128xf32> to vector<1x8x128xf32>
    %19 = vector.extract_strided_slice %11 {offsets = [0, 512], sizes = [8, 128], strides = [1, 1]} : vector<8x768xf32> to vector<8x128xf32>
    %20 = vector.shape_cast %19 : vector<8x128xf32> to vector<1x8x128xf32>
    %21 = arith.truncf %16 : vector<1x8x128xf32> to vector<1x8x128xbf16>
    %22 = arith.truncf %18 : vector<1x8x128xf32> to vector<1x8x128xbf16>
    "tpu.trace_start"() <{level = 10 : i32, message = "bqd,bkd->bqk"}> : () -> ()
    %cst_12 = arith.constant dense<0.000000e+00> : vector<1x8x8xf32>
    %23 = tpu.matmul %21, %22, %cst_12 {dimension_numbers = #tpu.dot_dimension_numbers<[2], [2], [1], [1], [0, 0, 0, 1, 1, 1], [0], [0]>} : vector<1x8x128xbf16>, vector<1x8x128xbf16>, vector<1x8x8xf32> -> vector<1x8x8xf32>
    "tpu.trace_stop"() : () -> ()
    %cst_13 = arith.constant 0.0883883461 : f32
    %24 = vector.broadcast %cst_13 : f32 to vector<1x8x8xf32>
    %25 = arith.mulf %23, %24 : vector<1x8x8xf32>
    %cst_14 = arith.constant dense<0xFF800000> : vector<1x8xf32>
    %26 = vector.multi_reduction <maximumf>, %25, %cst_14 [2] : vector<1x8x8xf32> to vector<1x8xf32>
    %27 = vector.shape_cast %26 : vector<1x8xf32> to vector<1x8x1xf32>
    %28 = vector.broadcast %27 : vector<1x8x1xf32> to vector<1x8x8xf32>
    %29 = arith.subf %25, %28 : vector<1x8x8xf32>
    %30 = math.exp %29 : vector<1x8x8xf32>
    %cst_15 = arith.constant dense<0.000000e+00> : vector<1x8xf32>
    %31 = vector.multi_reduction <add>, %30, %cst_15 [2] : vector<1x8x8xf32> to vector<1x8xf32>
    %32 = vector.shape_cast %31 : vector<1x8xf32> to vector<1x8x1xf32>
    %33 = tpu.reciprocal %32 {approx = true} : vector<1x8x1xf32> -> vector<1x8x1xf32>
    %34 = vector.broadcast %33 : vector<1x8x1xf32> to vector<1x8x8xf32>
    %35 = arith.mulf %30, %34 : vector<1x8x8xf32>
    %36 = arith.truncf %35 : vector<1x8x8xf32> to vector<1x8x8xbf16>
    %37 = arith.truncf %20 : vector<1x8x128xf32> to vector<1x8x128xbf16>
    "tpu.trace_start"() <{level = 10 : i32, message = "bqk,bkd->bqd"}> : () -> ()
    %cst_16 = arith.constant dense<0.000000e+00> : vector<1x8x128xf32>
    %38 = tpu.matmul %36, %37, %cst_16 {dimension_numbers = #tpu.dot_dimension_numbers<[2], [1], [1], [2], [0, 0, 0, 1, 1, 2], [0], [0]>} : vector<1x8x8xbf16>, vector<1x8x128xbf16>, vector<1x8x128xf32> -> vector<1x8x128xf32>
    "tpu.trace_stop"() : () -> ()
    %39 = vector.shape_cast %38 : vector<1x8x128xf32> to vector<8x128xf32>
    %40 = arith.truncf %39 : vector<8x128xf32> to vector<8x128xbf16>
    %41 = vector.extract_strided_slice %13 {offsets = [0, 0], sizes = [128, 256], strides = [1, 1]} : vector<256x256xbf16> to vector<128x256xbf16>
    %cst_17 = arith.constant dense<0.000000e+00> : vector<8x256xf32>
    %42 = tpu.matmul %40, %41, %cst_17 {dimension_numbers = #tpu.dot_dimension_numbers<[1], [0], [0], [1], [0, 0, 1, 1], [], []>} : vector<8x128xbf16>, vector<128x256xbf16>, vector<8x256xf32> -> vector<8x256xf32>
    %43 = arith.addf %14, %42 : vector<8x256xf32>
    %44 = vector.extract_strided_slice %11 {offsets = [0, 128], sizes = [8, 128], strides = [1, 1]} : vector<8x768xf32> to vector<8x128xf32>
    %45 = vector.shape_cast %44 : vector<8x128xf32> to vector<1x8x128xf32>
    %46 = vector.extract_strided_slice %11 {offsets = [0, 384], sizes = [8, 128], strides = [1, 1]} : vector<8x768xf32> to vector<8x128xf32>
    %47 = vector.shape_cast %46 : vector<8x128xf32> to vector<1x8x128xf32>
    %48 = vector.extract_strided_slice %11 {offsets = [0, 640], sizes = [8, 128], strides = [1, 1]} : vector<8x768xf32> to vector<8x128xf32>
    %49 = vector.shape_cast %48 : vector<8x128xf32> to vector<1x8x128xf32>
    %50 = arith.truncf %45 : vector<1x8x128xf32> to vector<1x8x128xbf16>
    %51 = arith.truncf %47 : vector<1x8x128xf32> to vector<1x8x128xbf16>
    "tpu.trace_start"() <{level = 10 : i32, message = "bqd,bkd->bqk"}> : () -> ()
    %cst_18 = arith.constant dense<0.000000e+00> : vector<1x8x8xf32>
    %52 = tpu.matmul %50, %51, %cst_18 {dimension_numbers = #tpu.dot_dimension_numbers<[2], [2], [1], [1], [0, 0, 0, 1, 1, 1], [0], [0]>} : vector<1x8x128xbf16>, vector<1x8x128xbf16>, vector<1x8x8xf32> -> vector<1x8x8xf32>
    "tpu.trace_stop"() : () -> ()
    %cst_19 = arith.constant 0.0883883461 : f32
    %53 = vector.broadcast %cst_19 : f32 to vector<1x8x8xf32>
    %54 = arith.mulf %52, %53 : vector<1x8x8xf32>
    %cst_20 = arith.constant dense<0xFF800000> : vector<1x8xf32>
    %55 = vector.multi_reduction <maximumf>, %54, %cst_20 [2] : vector<1x8x8xf32> to vector<1x8xf32>
    %56 = vector.shape_cast %55 : vector<1x8xf32> to vector<1x8x1xf32>
    %57 = vector.broadcast %56 : vector<1x8x1xf32> to vector<1x8x8xf32>
    %58 = arith.subf %54, %57 : vector<1x8x8xf32>
    %59 = math.exp %58 : vector<1x8x8xf32>
    %cst_21 = arith.constant dense<0.000000e+00> : vector<1x8xf32>
    %60 = vector.multi_reduction <add>, %59, %cst_21 [2] : vector<1x8x8xf32> to vector<1x8xf32>
    %61 = vector.shape_cast %60 : vector<1x8xf32> to vector<1x8x1xf32>
    %62 = tpu.reciprocal %61 {approx = true} : vector<1x8x1xf32> -> vector<1x8x1xf32>
    %63 = vector.broadcast %62 : vector<1x8x1xf32> to vector<1x8x8xf32>
    %64 = arith.mulf %59, %63 : vector<1x8x8xf32>
    %65 = arith.truncf %64 : vector<1x8x8xf32> to vector<1x8x8xbf16>
    %66 = arith.truncf %49 : vector<1x8x128xf32> to vector<1x8x128xbf16>
    "tpu.trace_start"() <{level = 10 : i32, message = "bqk,bkd->bqd"}> : () -> ()
    %cst_22 = arith.constant dense<0.000000e+00> : vector<1x8x128xf32>
    %67 = tpu.matmul %65, %66, %cst_22 {dimension_numbers = #tpu.dot_dimension_numbers<[2], [1], [1], [2], [0, 0, 0, 1, 1, 2], [0], [0]>} : vector<1x8x8xbf16>, vector<1x8x128xbf16>, vector<1x8x128xf32> -> vector<1x8x128xf32>
    "tpu.trace_stop"() : () -> ()
    %68 = vector.shape_cast %67 : vector<1x8x128xf32> to vector<8x128xf32>
    %69 = arith.truncf %68 : vector<8x128xf32> to vector<8x128xbf16>
    %70 = vector.extract_strided_slice %13 {offsets = [128, 0], sizes = [128, 256], strides = [1, 1]} : vector<256x256xbf16> to vector<128x256xbf16>
    %cst_23 = arith.constant dense<0.000000e+00> : vector<8x256xf32>
    %71 = tpu.matmul %69, %70, %cst_23 {dimension_numbers = #tpu.dot_dimension_numbers<[1], [0], [0], [1], [0, 0, 1, 1], [], []>} : vector<8x128xbf16>, vector<128x256xbf16>, vector<8x256xf32> -> vector<8x256xf32>
    %72 = arith.addf %43, %71 : vector<8x256xf32>
    %c0_24 = arith.constant 0 : index
    %c0_25 = arith.constant 0 : index
    %c0_26 = arith.constant 0 : index
    %73 = vector.load %arg9[%c0_24, %c0_25, %c0_26] : memref<1x1x256xf32, #tpu.memory_space<vmem>>, vector<1x1x256xf32>
    %74 = vector.shape_cast %73 : vector<1x1x256xf32> to vector<1x256xf32>
    %75 = vector.broadcast %74 : vector<1x256xf32> to vector<8x256xf32>
    %76 = arith.addf %72, %75 : vector<8x256xf32>
    %77 = arith.addf %3, %76 : vector<8x256xf32>
    %c0_27 = arith.constant 0 : index
    %c0_28 = arith.constant 0 : index
    %c0_29 = arith.constant 0 : index
    %78 = vector.load %arg10[%c0_27, %c0_28, %c0_29] : memref<1x1x256xf32, #tpu.memory_space<vmem>>, vector<1x1x256xf32>
    %79 = vector.shape_cast %78 : vector<1x1x256xf32> to vector<1x256xf32>
    %c0_30 = arith.constant 0 : index
    %c0_31 = arith.constant 0 : index
    %c0_32 = arith.constant 0 : index
    %80 = vector.load %arg11[%c0_30, %c0_31, %c0_32] : memref<1x1x256xf32, #tpu.memory_space<vmem>>, vector<1x1x256xf32>
    %81 = vector.shape_cast %80 : vector<1x1x256xf32> to vector<1x256xf32>
    %cst_33 = arith.constant dense<0.000000e+00> : vector<8xf32>
    %82 = vector.multi_reduction <add>, %77, %cst_33 [1] : vector<8x256xf32> to vector<8xf32>
    %83 = vector.shape_cast %82 : vector<8xf32> to vector<8x1xf32>
    %cst_34 = arith.constant 2.560000e+02 : f32
    %84 = vector.broadcast %cst_34 : f32 to vector<8x1xf32>
    %85 = arith.divf %83, %84 : vector<8x1xf32>
    %86 = vector.broadcast %85 : vector<8x1xf32> to vector<8x256xf32>
    %87 = arith.subf %77, %86 : vector<8x256xf32>
    %88 = vector.broadcast %85 : vector<8x1xf32> to vector<8x256xf32>
    %89 = arith.subf %77, %88 : vector<8x256xf32>
    %90 = arith.mulf %87, %89 : vector<8x256xf32>
    %cst_35 = arith.constant dense<0.000000e+00> : vector<8xf32>
    %91 = vector.multi_reduction <add>, %90, %cst_35 [1] : vector<8x256xf32> to vector<8xf32>
    %92 = vector.shape_cast %91 : vector<8xf32> to vector<8x1xf32>
    %cst_36 = arith.constant 2.560000e+02 : f32
    %93 = vector.broadcast %cst_36 : f32 to vector<8x1xf32>
    %94 = arith.divf %92, %93 : vector<8x1xf32>
    %95 = vector.broadcast %85 : vector<8x1xf32> to vector<8x256xf32>
    %96 = arith.subf %77, %95 : vector<8x256xf32>
    %cst_37 = arith.constant 9.99999974E-6 : f32
    %97 = vector.broadcast %cst_37 : f32 to vector<8x1xf32>
    %98 = arith.addf %94, %97 : vector<8x1xf32>
    %99 = math.rsqrt %98 : vector<8x1xf32>
    %100 = vector.broadcast %99 : vector<8x1xf32> to vector<8x256xf32>
    %101 = arith.mulf %96, %100 : vector<8x256xf32>
    %102 = vector.broadcast %79 : vector<1x256xf32> to vector<8x256xf32>
    %103 = arith.mulf %101, %102 : vector<8x256xf32>
    %104 = vector.broadcast %81 : vector<1x256xf32> to vector<8x256xf32>
    %105 = arith.addf %103, %104 : vector<8x256xf32>
    %106 = arith.truncf %105 : vector<8x256xf32> to vector<8x256xbf16>
    %c0_38 = arith.constant 0 : index
    %c0_39 = arith.constant 0 : index
    %c0_40 = arith.constant 0 : index
    %107 = vector.load %arg12[%c0_38, %c0_39, %c0_40] : memref<1x256x1024xbf16, #tpu.memory_space<vmem>>, vector<1x256x1024xbf16>
    %108 = vector.shape_cast %107 : vector<1x256x1024xbf16> to vector<256x1024xbf16>
    %cst_41 = arith.constant dense<0.000000e+00> : vector<8x1024xf32>
    %109 = tpu.matmul %106, %108, %cst_41 {dimension_numbers = #tpu.dot_dimension_numbers<[1], [0], [0], [1], [0, 0, 1, 1], [], []>} : vector<8x256xbf16>, vector<256x1024xbf16>, vector<8x1024xf32> -> vector<8x1024xf32>
    %c0_42 = arith.constant 0 : index
    %c0_43 = arith.constant 0 : index
    %c0_44 = arith.constant 0 : index
    %110 = vector.load %arg13[%c0_42, %c0_43, %c0_44] : memref<1x1x1024xf32, #tpu.memory_space<vmem>>, vector<1x1x1024xf32>
    %111 = vector.shape_cast %110 : vector<1x1x1024xf32> to vector<1x1024xf32>
    %112 = vector.broadcast %111 : vector<1x1024xf32> to vector<8x1024xf32>
    %113 = arith.addf %109, %112 : vector<8x1024xf32>
    %cst_45 = arith.constant 0.000000e+00 : f32
    %114 = vector.broadcast %cst_45 : f32 to vector<8x1024xf32>
    %115 = arith.maximumf %113, %114 : vector<8x1024xf32>
    %116 = arith.truncf %115 : vector<8x1024xf32> to vector<8x1024xbf16>
    %c0_46 = arith.constant 0 : index
    %c0_47 = arith.constant 0 : index
    %c0_48 = arith.constant 0 : index
    %117 = vector.load %arg14[%c0_46, %c0_47, %c0_48] : memref<1x1024x256xbf16, #tpu.memory_space<vmem>>, vector<1x1024x256xbf16>
    %118 = vector.shape_cast %117 : vector<1x1024x256xbf16> to vector<1024x256xbf16>
    %cst_49 = arith.constant dense<0.000000e+00> : vector<8x256xf32>
    %119 = tpu.matmul %116, %118, %cst_49 {dimension_numbers = #tpu.dot_dimension_numbers<[1], [0], [0], [1], [0, 0, 1, 1], [], []>} : vector<8x1024xbf16>, vector<1024x256xbf16>, vector<8x256xf32> -> vector<8x256xf32>
    %c0_50 = arith.constant 0 : index
    %c0_51 = arith.constant 0 : index
    %c0_52 = arith.constant 0 : index
    %120 = vector.load %arg15[%c0_50, %c0_51, %c0_52] : memref<1x1x256xf32, #tpu.memory_space<vmem>>, vector<1x1x256xf32>
    %121 = vector.shape_cast %120 : vector<1x1x256xf32> to vector<1x256xf32>
    %122 = vector.broadcast %121 : vector<1x256xf32> to vector<8x256xf32>
    %123 = arith.addf %119, %122 : vector<8x256xf32>
    %124 = arith.addf %105, %123 : vector<8x256xf32>
    %c0_53 = arith.constant 0 : index
    %c0_54 = arith.constant 0 : index
    %c0_55 = arith.constant 0 : index
    %125 = vector.load %arg16[%c0_53, %c0_54, %c0_55] : memref<1x1x256xf32, #tpu.memory_space<vmem>>, vector<1x1x256xf32>
    %126 = vector.shape_cast %125 : vector<1x1x256xf32> to vector<1x256xf32>
    %c0_56 = arith.constant 0 : index
    %c0_57 = arith.constant 0 : index
    %c0_58 = arith.constant 0 : index
    %127 = vector.load %arg17[%c0_56, %c0_57, %c0_58] : memref<1x1x256xf32, #tpu.memory_space<vmem>>, vector<1x1x256xf32>
    %128 = vector.shape_cast %127 : vector<1x1x256xf32> to vector<1x256xf32>
    %cst_59 = arith.constant dense<0.000000e+00> : vector<8xf32>
    %129 = vector.multi_reduction <add>, %124, %cst_59 [1] : vector<8x256xf32> to vector<8xf32>
    %130 = vector.shape_cast %129 : vector<8xf32> to vector<8x1xf32>
    %cst_60 = arith.constant 2.560000e+02 : f32
    %131 = vector.broadcast %cst_60 : f32 to vector<8x1xf32>
    %132 = arith.divf %130, %131 : vector<8x1xf32>
    %133 = vector.broadcast %132 : vector<8x1xf32> to vector<8x256xf32>
    %134 = arith.subf %124, %133 : vector<8x256xf32>
    %135 = vector.broadcast %132 : vector<8x1xf32> to vector<8x256xf32>
    %136 = arith.subf %124, %135 : vector<8x256xf32>
    %137 = arith.mulf %134, %136 : vector<8x256xf32>
    %cst_61 = arith.constant dense<0.000000e+00> : vector<8xf32>
    %138 = vector.multi_reduction <add>, %137, %cst_61 [1] : vector<8x256xf32> to vector<8xf32>
    %139 = vector.shape_cast %138 : vector<8xf32> to vector<8x1xf32>
    %cst_62 = arith.constant 2.560000e+02 : f32
    %140 = vector.broadcast %cst_62 : f32 to vector<8x1xf32>
    %141 = arith.divf %139, %140 : vector<8x1xf32>
    %142 = vector.broadcast %132 : vector<8x1xf32> to vector<8x256xf32>
    %143 = arith.subf %124, %142 : vector<8x256xf32>
    %cst_63 = arith.constant 9.99999974E-6 : f32
    %144 = vector.broadcast %cst_63 : f32 to vector<8x1xf32>
    %145 = arith.addf %141, %144 : vector<8x1xf32>
    %146 = math.rsqrt %145 : vector<8x1xf32>
    %147 = vector.broadcast %146 : vector<8x1xf32> to vector<8x256xf32>
    %148 = arith.mulf %143, %147 : vector<8x256xf32>
    %149 = vector.broadcast %126 : vector<1x256xf32> to vector<8x256xf32>
    %150 = arith.mulf %148, %149 : vector<8x256xf32>
    %151 = vector.broadcast %128 : vector<1x256xf32> to vector<8x256xf32>
    %152 = arith.addf %150, %151 : vector<8x256xf32>
    %c0_64 = arith.constant 0 : index
    %c0_65 = arith.constant 0 : index
    %153 = vector.load %arg21[%c0_64, %c0_65] : memref<8x256xf32, #tpu.memory_space<vmem>>, vector<8x256xf32>
    tpu.vector_store %arg21[%c0_64, %c0_65], %152 {strides = array<i32>} : memref<8x256xf32, #tpu.memory_space<vmem>>, vector<8x256xf32>,
    %c1_i32 = arith.constant 1 : i32
    %154 = arith.cmpi eq, %arg1, %c1_i32 : i32
    %155 = arith.extui %154 : i1 to i32
    %c0_i32_66 = arith.constant 0 : i32
    %156 = arith.cmpi ne, %155, %c0_i32_66 : i32
    scf.if %156 {
      %c0_67 = arith.constant 0 : index
      %c0_68 = arith.constant 0 : index
      %157 = vector.load %arg18[%c0_67, %c0_68] : memref<1x256xf32, #tpu.memory_space<vmem>>, vector<1x256xf32>
      %c0_69 = arith.constant 0 : index
      %c0_70 = arith.constant 0 : index
      %158 = vector.load %arg19[%c0_69, %c0_70] : memref<1x256xf32, #tpu.memory_space<vmem>>, vector<1x256xf32>
      %cst_71 = arith.constant dense<0.000000e+00> : vector<8xf32>
      %159 = vector.multi_reduction <add>, %152, %cst_71 [1] : vector<8x256xf32> to vector<8xf32>
      %160 = vector.shape_cast %159 : vector<8xf32> to vector<8x1xf32>
      %cst_72 = arith.constant 2.560000e+02 : f32
      %161 = vector.broadcast %cst_72 : f32 to vector<8x1xf32>
      %162 = arith.divf %160, %161 : vector<8x1xf32>
      %163 = vector.broadcast %162 : vector<8x1xf32> to vector<8x256xf32>
      %164 = arith.subf %152, %163 : vector<8x256xf32>
      %165 = vector.broadcast %162 : vector<8x1xf32> to vector<8x256xf32>
      %166 = arith.subf %152, %165 : vector<8x256xf32>
      %167 = arith.mulf %164, %166 : vector<8x256xf32>
      %cst_73 = arith.constant dense<0.000000e+00> : vector<8xf32>
      %168 = vector.multi_reduction <add>, %167, %cst_73 [1] : vector<8x256xf32> to vector<8xf32>
      %169 = vector.shape_cast %168 : vector<8xf32> to vector<8x1xf32>
      %cst_74 = arith.constant 2.560000e+02 : f32
      %170 = vector.broadcast %cst_74 : f32 to vector<8x1xf32>
      %171 = arith.divf %169, %170 : vector<8x1xf32>
      %172 = vector.broadcast %162 : vector<8x1xf32> to vector<8x256xf32>
      %173 = arith.subf %152, %172 : vector<8x256xf32>
      %cst_75 = arith.constant 9.99999974E-6 : f32
      %174 = vector.broadcast %cst_75 : f32 to vector<8x1xf32>
      %175 = arith.addf %171, %174 : vector<8x1xf32>
      %176 = math.rsqrt %175 : vector<8x1xf32>
      %177 = vector.broadcast %176 : vector<8x1xf32> to vector<8x256xf32>
      %178 = arith.mulf %173, %177 : vector<8x256xf32>
      %179 = vector.broadcast %157 : vector<1x256xf32> to vector<8x256xf32>
      %180 = arith.mulf %178, %179 : vector<8x256xf32>
      %181 = vector.broadcast %158 : vector<1x256xf32> to vector<8x256xf32>
      %182 = arith.addf %180, %181 : vector<8x256xf32>
      %183 = vector.shape_cast %182 : vector<8x256xf32> to vector<1x8x256xf32>
      %c0_76 = arith.constant 0 : index
      %c0_77 = arith.constant 0 : index
      %c0_78 = arith.constant 0 : index
      %184 = vector.load %arg20[%c0_76, %c0_77, %c0_78] : memref<1x8x256xf32, #tpu.memory_space<vmem>>, vector<1x8x256xf32>
      tpu.vector_store %arg20[%c0_76, %c0_77, %c0_78], %183 {strides = array<i32>} : memref<1x8x256xf32, #tpu.memory_space<vmem>>, vector<1x8x256xf32>,
    } else {
    }
    return
  }
  func.func @transform_0(%arg0: i32, %arg1: i32) -> (i32, i32, i32) {
    %c0_i32 = arith.constant 0 : i32
    %c0_i32_0 = arith.constant 0 : i32
    %c0_i32_1 = arith.constant 0 : i32
    return %arg0, %c0_i32, %c0_i32_0 : i32, i32, i32
  }
  func.func @transform_1(%arg0: i32, %arg1: i32) -> (i32, i32, i32) {
    %c0_i32 = arith.constant 0 : i32
    %c0_i32_0 = arith.constant 0 : i32
    %c0_i32_1 = arith.constant 0 : i32
    return %arg0, %c0_i32, %c0_i32_0 : i32, i32, i32
  }
  func.func @transform_2(%arg0: i32, %arg1: i32) -> (i32, i32) {
    %c0_i32 = arith.constant 0 : i32
    %c0_i32_0 = arith.constant 0 : i32
    %c0_i32_1 = arith.constant 0 : i32
    return %c0_i32, %c0_i32_0 : i32, i32
  }
  func.func @transform_3(%arg0: i32, %arg1: i32) -> (i32, i32) {
    %c0_i32 = arith.constant 0 : i32
    %c0_i32_0 = arith.constant 0 : i32
    %c0_i32_1 = arith.constant 0 : i32
    return %c0_i32, %c0_i32_0 : i32, i32
  }
  func.func @transform_4(%arg0: i32, %arg1: i32) -> (i32, i32, i32) {
    %c0_i32 = arith.constant 0 : i32
    %c0_i32_0 = arith.constant 0 : i32
    %c0_i32_1 = arith.constant 0 : i32
    return %arg1, %c0_i32, %c0_i32_0 : i32, i32, i32
  }
  func.func @transform_5(%arg0: i32, %arg1: i32) -> (i32, i32, i32) {
    %c0_i32 = arith.constant 0 : i32
    %c0_i32_0 = arith.constant 0 : i32
    %c0_i32_1 = arith.constant 0 : i32
    return %arg1, %c0_i32, %c0_i32_0 : i32, i32, i32
  }
  func.func @transform_6(%arg0: i32, %arg1: i32) -> (i32, i32, i32) {
    %c0_i32 = arith.constant 0 : i32
    %c0_i32_0 = arith.constant 0 : i32
    %c0_i32_1 = arith.constant 0 : i32
    return %arg1, %c0_i32, %c0_i32_0 : i32, i32, i32
  }
  func.func @transform_7(%arg0: i32, %arg1: i32) -> (i32, i32, i32) {
    %c0_i32 = arith.constant 0 : i32
    %c0_i32_0 = arith.constant 0 : i32
    %c0_i32_1 = arith.constant 0 : i32
    return %arg1, %c0_i32, %c0_i32_0 : i32, i32, i32
  }
  func.func @transform_8(%arg0: i32, %arg1: i32) -> (i32, i32, i32) {
    %c0_i32 = arith.constant 0 : i32
    %c0_i32_0 = arith.constant 0 : i32
    %c0_i32_1 = arith.constant 0 : i32
    return %arg1, %c0_i32, %c0_i32_0 : i32, i32, i32
  }
  func.func @transform_9(%arg0: i32, %arg1: i32) -> (i32, i32, i32) {
    %c0_i32 = arith.constant 0 : i32
    %c0_i32_0 = arith.constant 0 : i32
    %c0_i32_1 = arith.constant 0 : i32
    return %arg1, %c0_i32, %c0_i32_0 : i32, i32, i32
  }
  func.func @transform_10(%arg0: i32, %arg1: i32) -> (i32, i32, i32) {
    %c0_i32 = arith.constant 0 : i32
    %c0_i32_0 = arith.constant 0 : i32
    %c0_i32_1 = arith.constant 0 : i32
    return %arg1, %c0_i32, %c0_i32_0 : i32, i32, i32
  }
  func.func @transform_11(%arg0: i32, %arg1: i32) -> (i32, i32, i32) {
    %c0_i32 = arith.constant 0 : i32
    %c0_i32_0 = arith.constant 0 : i32
    %c0_i32_1 = arith.constant 0 : i32
    return %arg1, %c0_i32, %c0_i32_0 : i32, i32, i32
  }
  func.func @transform_12(%arg0: i32, %arg1: i32) -> (i32, i32, i32) {
    %c0_i32 = arith.constant 0 : i32
    %c0_i32_0 = arith.constant 0 : i32
    %c0_i32_1 = arith.constant 0 : i32
    return %arg1, %c0_i32, %c0_i32_0 : i32, i32, i32
  }
  func.func @transform_13(%arg0: i32, %arg1: i32) -> (i32, i32, i32) {
    %c0_i32 = arith.constant 0 : i32
    %c0_i32_0 = arith.constant 0 : i32
    %c0_i32_1 = arith.constant 0 : i32
    return %arg1, %c0_i32, %c0_i32_0 : i32, i32, i32
  }
  func.func @transform_14(%arg0: i32, %arg1: i32) -> (i32, i32, i32) {
    %c0_i32 = arith.constant 0 : i32
    %c0_i32_0 = arith.constant 0 : i32
    %c0_i32_1 = arith.constant 0 : i32
    return %arg1, %c0_i32, %c0_i32_0 : i32, i32, i32
  }
  func.func @transform_15(%arg0: i32, %arg1: i32) -> (i32, i32, i32) {
    %c0_i32 = arith.constant 0 : i32
    %c0_i32_0 = arith.constant 0 : i32
    %c0_i32_1 = arith.constant 0 : i32
    return %arg1, %c0_i32, %c0_i32_0 : i32, i32, i32
  }
  func.func @transform_16(%arg0: i32, %arg1: i32) -> (i32, i32) {
    %c0_i32 = arith.constant 0 : i32
    %c0_i32_0 = arith.constant 0 : i32
    %c0_i32_1 = arith.constant 0 : i32
    return %c0_i32, %c0_i32_0 : i32, i32
  }
  func.func @transform_17(%arg0: i32, %arg1: i32) -> (i32, i32) {
    %c0_i32 = arith.constant 0 : i32
    %c0_i32_0 = arith.constant 0 : i32
    %c0_i32_1 = arith.constant 0 : i32
    return %c0_i32, %c0_i32_0 : i32, i32
  }
  func.func @transform_18(%arg0: i32, %arg1: i32) -> (i32, i32, i32) {
    %c0_i32 = arith.constant 0 : i32
    %c0_i32_0 = arith.constant 0 : i32
    %c0_i32_1 = arith.constant 0 : i32
    return %arg0, %c0_i32, %c0_i32_0 : i32, i32, i32
  }
}

</mosaic_0001>

<bundles_post_ra>
// kernel: tpu_custom_call.1
= control target key start
LH: loop header
LB: loop body
LE: loop exit
PB: predicated region body
PF: predicated region fallthrough
CT: control target
= control target key end

     0   :  { %s7571_s0 = inlined_call_operand.hbm [shape: f32[2,8,16], index: 0, kind: input, shape index: {}]   ;;  %s7572_s1 = inlined_call_operand.hbm [shape: f32[2,8,256], index: 1, kind: input, shape index: {}]   ;;  %s7573_s2 = inlined_call_operand.hbm [shape: bf16[16,256], index: 2, kind: input, shape index: {}]   ;;  %s7574_s3 = inlined_call_operand.hbm [shape: f32[1,256], index: 3, kind: input, shape index: {}]   ;;  %s7575_s4 = inlined_call_operand.hbm [shape: bf16[2,256,768], index: 4, kind: input, shape index: {}]   ;;  %s7576_s5 = inlined_call_operand.vmem [shape: f32[2,1,768], index: 5, kind: input, shape index: {}]   ;;  %s7577_s6 = inlined_call_operand.hbm [shape: bf16[2,256,256], index: 6, kind: input, shape index: {}]   ;;  %s7578_s7 = inlined_call_operand.hbm [shape: f32[2,1,256], index: 7, kind: input, shape index: {}]   ;;  %s7579_s8 = inlined_call_operand.hbm [shape: f32[2,1,256], index: 8, kind: input, shape index: {}]   ;;  %s7580_s9 = inlined_call_operand.vmem [shape: f32[2,1,256], index: 9, kind: input, shape index: {}]   ;;  %s7581_s10 = inlined_call_operand.hbm [shape: bf16[2,256,1024], index: 10, kind: input, shape index: {}]   ;;  %s7582_s11 = inlined_call_operand.vmem [shape: f32[2,1,1024], index: 11, kind: input, shape index: {}]   ;;  %s7583_s12 = inlined_call_operand.hbm [shape: bf16[2,1024,256], index: 12, kind: input, shape index: {}]   ;;  %s7584_s13 = inlined_call_operand.vmem [shape: f32[2,1,256], index: 13, kind: input, shape index: {}]   ;;  %s7585_s14 = inlined_call_operand.vmem [shape: f32[2,1,256], index: 14, kind: input, shape index: {}]   ;;  %s7586_s15 = inlined_call_operand.vmem [shape: f32[2,1,256], index: 15, kind: input, shape index: {}]   ;;  %s7587_s16 = inlined_call_operand.vmem [shape: f32[1,256], index: 16, kind: input, shape index: {}]   ;;  %s7588_s17 = inlined_call_operand.vmem [shape: f32[1,256], index: 17, kind: input, shape index: {}]   ;;  %s7589_s18 = inlined_call_operand.hbm [shape: f32[2,8,256], index: 18, kind: output, shape index: {}]  }
   0x1   :  { %7636 = sst [smem:[#allocation48_spill]] %s7571_s0 }
   0x2   :  { %7637 = sst [smem:[#allocation49_spill]] %s7572_s1 }
   0x3   :  { %7638 = sst [smem:[#allocation50_spill]] %s7573_s2 }
   0x4   :  { %7639 = sst [smem:[#allocation51_spill]] %s7574_s3 }
   0x5   :  { %7640 = sst [smem:[#allocation52_spill]] %s7575_s4 }
   0x6   :  { %7641 = sst [smem:[#allocation53_spill]] %s7576_s5 }
   0x7   :  { %7642 = sst [smem:[#allocation54_spill]] %s7577_s6 }
   0x8   :  { %7643 = sst [smem:[#allocation55_spill]] %s7578_s7 }
   0x9   :  { %7644 = sst [smem:[#allocation56_spill]] %s7579_s8 }
   0xa   :  { %7645 = sst [smem:[#allocation57_spill]] %s7580_s9 }
   0xb   :  { %7646 = sst [smem:[#allocation58_spill]] %s7581_s10 }
   0xc   :  { %7647 = sst [smem:[#allocation59_spill]] %s7582_s11 }
   0xd   :  { %7648 = sst [smem:[#allocation60_spill]] %s7583_s12 }
   0xe   :  { %7649 = sst [smem:[#allocation61_spill]] %s7584_s13 }
   0xf   :  { %7650 = sst [smem:[#allocation62_spill]] %s7585_s14 }
  0x10   :  { %7651 = sst [smem:[#allocation63_spill]] %s7586_s15 }
  0x11   :  { %7652 = sst [smem:[#allocation64_spill]] %s7587_s16 }
  0x12   :  { %7653 = sst [smem:[#allocation65_spill]] %s7588_s17 }
  0x13   :  { %7654 = sst [smem:[#allocation66_spill]] %s7589_s18 }
  0x14   :  { %23 = vsyncpa [#allocation4], 0 }
  0x15   :  { %25 = vsyncpa [#allocation4 + $0x1], 0 }
  0x16   :  { %26 = vsyncpa [#allocation7], 0 }
  0x17   :  { %28 = vsyncpa [#allocation7 + $0x1], 0 }
  0x18   :  { %29 = vsyncpa [#allocation10], 0 }
  0x19   :  { %30 = vsyncpa [#allocation5], 0 }
  0x1a   :  { %32 = vsyncpa [#allocation5 + $0x1], 0  ;;  %s6335_s27 = smov 0   ;;  %s6337_s28 = smov 0  }
  0x1b   :  { %s6339_s29 = smov 0   ;;  %s6341_s30 = smov 0  }
  0x1c   :  { %s6343_s0 = smov 0   ;;  %s6345_s19 = smov 0  }
  0x1d   :  { %s6347_s1 = smov 0   ;;  %s6349_s20 = smov 0  }
  0x1e   :  { %s6351_s21 = smov 0   ;;  %s6353_s22 = smov 0  }
  0x1f   :  { %s6355_s2 = smov 0  }
  0x20 LB: > { %7655 = sst [smem:[#allocation29_spill]] %s6181_s28  ;;  %s6389_s23 = sadd.s32 4294967295, %s6217_s2   ;;  %s6217_s2 = sphi %s6355_s2, %s38_s2   ;;  %s6213_s22 = sphi %s6353_s22, %s7757_s22   ;;  %s6209_s21 = sphi %s6351_s21, %s7756_s21   ;;  %s6205_s20 = sphi %s6349_s20, %s7755_s20   ;;  %s6201_s1 = sphi %s6347_s1, %s7754_s1   ;;  %s6197_s19 = sphi %s6345_s19, %s7753_s19   ;;  %s6193_s0 = sphi %s6343_s0, %s7752_s0   ;;  %s6189_s30 = sphi %s6341_s30, %s7751_s30   ;;  %s6185_s29 = sphi %s6339_s29, %s7750_s29   ;;  %s6181_s28 = sphi %s6337_s28, %s7749_s28   ;;  %s6177_s27 = sphi %s6335_s27, %s7748_s27  }
  0x21   : > { %7656 = sst [smem:[#allocation30_spill]] %s6185_s29  ;;  %p164_p0 = scmp.ne.s32.totalorder %s6181_s28, %s6177_s27 }
  0x22   : > { %7657 = sst [smem:[#allocation31_spill]] %s6189_s30  ;;  %p7594_p1 = scmp.eq.s32.totalorder %s6389_s23, 0 }
  0x23   : > { %7658 = sst [smem:[#allocation32_spill]] %s6193_s0  ;;  %p4714_p2 = scmp.ge.s32.totalorder %s6217_s2, 1 }
  0x24   : > { %7659 = sst [smem:[#allocation33_spill]] %s6197_s19  ;;  %p529_p3 = scmp.lt.s32.totalorder %s6217_s2, 5 }
  0x25   : > { %7660 = sst [smem:[#allocation34_spill]] %s6201_s1  ;;  %p6397_p4 = por %p164_p0, %p7594_p1 }
  0x26   : > { %7661 = sst [smem:[#allocation35_spill]] %s6205_s20  ;;  %p6401_p5 = pnand %p4714_p2, %p529_p3 }
  0x27   : > { %7662 = sst [smem:[#allocation36_spill]] %s6209_s21  ;;  %s6219_s26 = smov [#allocation8]  }
  0x28   : > { %7663 = sst [smem:[#allocation37_spill]] %s6213_s22  ;;  %s541_s18 = sshll.u32 %s6219_s26, 4  ;;  %s542_s18 = int_to_ptr.vmem [resolvable:$true] %s541_s18 }
  0x29   : > { %7664 = sst [smem:[#allocation38_spill]] %s6217_s2  ;;  %p5220_p6 = pneg %p6401_p5 }
  0x2a   : > { %s7665_s24 = scalar_select %p6397_p4, 1, 0 }
  0x2b   : > { %s7667_s25 = scalar_select %p6401_p5, 1, 0 }
  0x2c   : > { %7666 = sst [smem:[#allocation39_spill]] %s7665_s24  ;;  %p6409_p7 = pnand %p5220_p6, %p7594_p1 }
  0x2d   : > { %s7669_s16 = sld [smem:[#allocation50_spill]] }
  0x2e   : > { %s7668_s27 = scalar_select %p6409_p7, 1, 0 }
  0x2f   : > { %p7603_p9 = pneg %p6409_p7 }
  0x33   : > { %s5763_s15 = scalar_lea.hbm %s7669_s16, 256 }
  0x34   : > { %p5764_p8 = scmp.ne.s32.totalorder %s7669_s16, %s5763_s15  ;;  %p5770_p12 = scmp.lt.u32.totalorder %s5763_s15, %s7669_s16 }
  0x36   : > { %p5766_p10 = pnand %p7603_p9, %p5764_p8 }
  0x38   : > { %p5767_p11 = pneg %p5766_p10 }
  0x3a   : > { %p5772_p13 = pnand %p5770_p12, %p5767_p11 }
  0x3c   : > { %5775 = shalt.err (!%p5772_p13)
}
  0x3d   : > { %s5776_s17 = scalar_lea.vmem %s542_s18, 256  ;;  %p5784_p6 = scmp.lt.s32.totalorder %s542_s18, %s542_s18 }
  0x3e   : > { %p5777_p0 = scmp.ne.s32.totalorder %s542_s18, %s5776_s17  ;;  %p5785_p1 = scmp.lt.s32.totalorder %s5776_s17, %s5776_s17 }
  0x40   : > { %p5779_p2 = pnand %p5777_p0, %p7603_p9  ;;  %p5786_p4 = por %p5785_p1, %p5784_p6 }
  0x42   : > { %p5780_p3 = pneg %p5779_p2 }
  0x44   : > { %p5787_p5 = pnand %p5786_p4, %p5780_p3 }
  0x46   : > { %5790 = shalt.err (!%p5787_p5)
}
  0x47   : > { %s7597_s13 = smov 128   ;;  %s7599_s11 = smov 8  }
  0x48   : > { %5223 = dma.hbm_to_vmem [thread:$0]  (!%p6409_p7), %s7669_s16, 256, %s542_s18, [#allocation7], %s7597_s13, %s7597_s13, %s7599_s11  }
  0x49   : > { %s4713_s20 = sadd.s32 4294967294, %s6217_s2   ;;  %s47_s26 = sadd.s32 1, %s6209_s21 }
  0x4a   : > { %s50_s17 = sadd.s32 1, %s6213_s22  ;;  %p48_p1 = scmp.ge.s32.totalorder %s47_s26, 2 }
  0x4b   : > { %s57_s5 = sadd.s32 1, %s6197_s19  ;;  %p64_p4 = scmp.ne.s32.totalorder %s6197_s19, %s6193_s0 }
  0x4c   : > { %p65_p5 = scmp.eq.s32.totalorder %s6217_s2, 0  ;;  %s7759_s26 = smov (%p48_p1, %s47_s26), 0 }
  0x4d   : > { %7670 = sst [smem:[#allocation40_spill]] %s7759_s26  ;;  %s7761_s17 = smov (!%p48_p1, %s50_s17), %s6213_s22 }
  0x4e   : > { %p6453_p8 = por %p65_p5, %p64_p4  ;;  %p70_p10 = scmp.ne.s32.totalorder %s6193_s0, %s6189_s30 }
  0x4f   : > { %p52_p11 = scmp.ge.s32.totalorder %s7761_s17, 2  ;;  %s148_s14 = ssub.s32 %s6209_s21, %s7759_s26 }
  0x50   : > { %p7672_p12 = scmp.eq.s32.totalorder %s6389_s23, 0  ;;  %p149_p0 = scmp.eq.s32.totalorder %s148_s14, 0 }
  0x51   : > { %s7763_s17 = smov (%p52_p11, %s7761_s17), 0  ;;  %s151_s13 = sadd.s32 1, %s6185_s29 }
  0x52   : > { %p6466_p13 = por %p7672_p12, %p70_p10  ;;  %7674 = sst [smem:[#allocation41_spill]] %s7763_s17 }
  0x53   : > { %p158_p2 = scmp.ne.s32.totalorder %s6185_s29, %s6181_s28  ;;  %s54_s11 = ssub.s32 %s6213_s22, %s7763_s17 }
  0x54   : > { %s7673_s15 = scalar_select %p6466_p13, 1, 0 }
  0x55   : > { %p516_p3 = scmp.eq.s32.totalorder %s6389_s23, 3  ;;  %p55_p6 = scmp.eq.s32.totalorder %s54_s11, 0 }
  0x56   : > { %p6480_p1 = por %p158_p2, %p65_p5  ;;  %p522_p12 = scmp.eq.s32.totalorder %s4713_s20, 3 }
  0x57   : > { %s6485_s26 = scalar_select %p149_p0, %s6185_s29, %s151_s13  }
  0x58   : > { %s6488_s14 = scalar_select %p55_p6, %s6197_s19, %s57_s5  }
  0x59   : > { %7676 = sst [smem:[#allocation42_spill]] %s6485_s26  ;;  %p6493_p11 = por %p516_p3, %p64_p4 }
  0x5a   : > { %7677 = sst [smem:[#allocation43_spill]] %s6488_s14  ;;  %p7615_p9 = scmp.lt.s32.totalorder %s6217_s2, 4 }
  0x5b   : > { %s7678_s9 = scalar_select %p6493_p11, 1, 0 }
  0x5c   : > { %p6502_p13 = por %p522_p12, %p70_p10  ;;  %s7611_s1 = sand.u32 1, %s6197_s19  }
  0x5d   : > { %7679 = sst [smem:[#allocation44_spill]] %s7678_s9  ;;  %s4719_s24 = sshll.u32 %s6213_s22, 7 }
  0x5e   : > { %s7680_s11 = scalar_select %p6502_p13, 1, 0 }
  0x5f   : > { %s4718_s13 = sshll.u32 %s7611_s1, 3  ;;  %s7682_s14 = sld [smem:[#allocation48_spill]] }
  0x60   : > { %7681 = sst [smem:[#allocation45_spill]] %s7680_s11  ;;  %p6519_p4 = pnand %p7615_p9, %p6453_p8 }
  0x61   : > { %s576_s17 = scalar_lea.vmem [#allocation3], %s4718_s13  ;;  %s7684_s1 = sand.u32 1, %s6217_s2  }
  0x62   : > { %s583_s11 = sshll.u32 %s576_s17, 4  ;;  %s6527_s26 = scalar_lea.sflag [#allocation4], %s7684_s1  ;;  %s6523_s11 = int_to_ptr.vmem [resolvable:$true] %s583_s11 }
  0x63   : > { %p5793_p10 = pneg %p6519_p4 }
  0x65   : > { %s6513_s28 = scalar_lea.hbm %s7682_s14, %s4719_s24  ;;  %s5796_s30 = scalar_lea.hbm %s7682_s14, 256 }
  0x66   : > { %s5791_s24 = scalar_lea.hbm %s6513_s28, 128  ;;  %p5797_p2 = scmp.lt.u32.totalorder %s6513_s28, %s7682_s14 }
  0x67   : > { %p5792_p5 = scmp.ne.s32.totalorder %s6513_s28, %s5791_s24  ;;  %p5798_p3 = scmp.lt.u32.totalorder %s5796_s30, %s5791_s24 }
  0x68   : > { %p5800_p12 = scmp.lt.u32.totalorder %s5791_s24, %s6513_s28 }
  0x69   : > { %p5794_p0 = pnand %p5793_p10, %p5792_p5  ;;  %p5799_p6 = por %p5798_p3, %p5797_p2 }
  0x6b   : > { %p5795_p8 = pneg %p5794_p0  ;;  %p5801_p9 = por %p5800_p12, %p5799_p6 }
  0x6d   : > { %p5802_p13 = pnand %p5801_p9, %p5795_p8 }
  0x6f   : > { %5805 = shalt.err (!%p5802_p13)
}
  0x70   : > { %s5806_s1 = scalar_lea.vmem %s6523_s11, 128  ;;  %s6222_s17 = smov [#allocation3]  }
  0x71   : > { %p5807_p5 = scmp.ne.s32.totalorder %s6523_s11, %s5806_s1  ;;  %s5811_s18 = sshll.u32 %s6222_s17, 4  ;;  %s5812_s18 = int_to_ptr.vmem [resolvable:$false] %s5811_s18 }
  0x72   : > { %s5813_s9 = scalar_lea.vmem %s5812_s18, 256  ;;  %p5814_p7 = scmp.lt.s32.totalorder %s6523_s11, %s5812_s18 }
  0x73   : > { %p5809_p0 = pnand %p5807_p5, %p5793_p10  ;;  %p5815_p2 = scmp.lt.s32.totalorder %s5813_s9, %s5806_s1 }
  0x75   : > { %p5810_p11 = pneg %p5809_p0  ;;  %p5816_p3 = por %p5815_p2, %p5814_p7 }
  0x77   : > { %p5817_p6 = pnand %p5816_p3, %p5810_p11 }
  0x79   : > { %5820 = shalt.err (!%p5817_p6)
}
  0x7a   : > { %5230 = dma.hbm_to_vmem [thread:$0]  (!%p6519_p4), %s6513_s28, 128, %s6523_s11, %s6527_s26  }
  0x7b   : > { %s7685_s30 = sand.u32 1, %s6197_s19   ;;  %p7686_p9 = scmp.lt.s32.totalorder %s6217_s2, 4 }
  0x7c   : > { %s4720_s24 = sshll.u32 %s7685_s30, 4  ;;  %s5151_s13 = sshll.u32 %s6213_s22, 8 }
  0x7d   : > { %p6561_p7 = pnand %p7686_p9, %p6480_p1  ;;  %s7688_s18 = sld [smem:[#allocation49_spill]] }
  0x7e   : > { %s594_s14 = scalar_lea.vmem [#allocation6], %s4720_s24  ;;  %s6572_s11 = sand.u32 1, %s6185_s29  }
  0x7f   : > { %s7687_s5 = scalar_select %p6561_p7, 1, 0 }
  0x80   : > { %s602_s28 = sshll.u32 %s594_s14, 4  ;;  %s5190_s16 = smul.u32 768, %s6572_s11  ;;  %s6574_s28 = int_to_ptr.vmem [resolvable:$true] %s602_s28 }
  0x81   : > { %s7689_s30 = sand.u32 1, %s6217_s2  }
  0x82   : > { %s6579_s19 = scalar_lea.sflag [#allocation7], %s7689_s30 }
  0x83   : > { %s6569_s9 = scalar_lea.hbm %s7688_s18, %s5151_s13  ;;  %s5826_s24 = scalar_lea.hbm %s7688_s18, 512 }
  0x84   : > { %s5821_s22 = scalar_lea.hbm %s6569_s9, 256  ;;  %p5827_p8 = scmp.lt.u32.totalorder %s6569_s9, %s7688_s18 }
  0x85   : > { %p5822_p13 = scmp.ne.s32.totalorder %s6569_s9, %s5821_s22  ;;  %p5828_p12 = scmp.lt.u32.totalorder %s5826_s24, %s5821_s22 }
  0x86   : > { %p5830_p0 = scmp.lt.u32.totalorder %s5821_s22, %s6569_s9 }
  0x87   : > { %p5824_p1 = pnand %p5822_p13, %p5793_p10  ;;  %p5829_p5 = por %p5828_p12, %p5827_p8 }
  0x89   : > { %p5825_p11 = pneg %p5824_p1  ;;  %p5831_p2 = por %p5830_p0, %p5829_p5 }
  0x8b   : > { %p5832_p3 = pnand %p5831_p2, %p5825_p11 }
  0x8d   : > { %5835 = shalt.err (!%p5832_p3)
}
  0x8e   : > { %s5836_s30 = scalar_lea.vmem %s6574_s28, 256  ;;  %s6223_s13 = smov [#allocation6]  }
  0x8f   : > { %p5837_p6 = scmp.ne.s32.totalorder %s6574_s28, %s5836_s30  ;;  %s5841_s1 = sshll.u32 %s6223_s13, 4  ;;  %s5842_s1 = int_to_ptr.vmem [resolvable:$false] %s5841_s1 }
  0x90   : > { %s5843_s14 = scalar_lea.vmem %s5842_s1, 512  ;;  %p5844_p1 = scmp.lt.s32.totalorder %s6574_s28, %s5842_s1 }
  0x91   : > { %p5839_p9 = pnand %p5837_p6, %p5793_p10  ;;  %p5845_p8 = scmp.lt.s32.totalorder %s5843_s14, %s5836_s30 }
  0x93   : > { %p5840_p13 = pneg %p5839_p9  ;;  %p5846_p12 = por %p5845_p8, %p5844_p1 }
  0x95   : > { %p5847_p5 = pnand %p5846_p12, %p5840_p13 }
  0x97   : > { %5850 = shalt.err (!%p5847_p5)
}
  0x98   : > { %5233 = dma.hbm_to_vmem [thread:$0]  (!%p6519_p4), %s6569_s9, 256, %s6574_s28, %s6579_s19  }
  0x99   : > { %s5191_s22 = smul.u32 12288, %s6209_s21  ;;  %s613_s24 = scalar_lea.vmem [#allocation11], %s5190_s16 }
  0x9a   : > { %s620_s17 = sshll.u32 %s613_s24, 4  ;;  %s7690_s4 = sld [smem:[#allocation52_spill]]  ;;  %s6613_s17 = int_to_ptr.vmem [resolvable:$true] %s620_s17 }
  0x9b   : > { %p6620_p4 = pneg %p6561_p7 }
  0x9d   : > { %s7691_s9 = scalar_select %p6620_p4, 1, 0 }
  0xa0   : > { %s6611_s30 = scalar_lea.hbm %s7690_s4, %s5191_s22  ;;  %s5856_s22 = scalar_lea.hbm %s7690_s4, 24576 }
  0xa1   : > { %s5851_s14 = scalar_lea.hbm %s6611_s30, 12288  ;;  %p5857_p2 = scmp.lt.u32.totalorder %s6611_s30, %s7690_s4 }
  0xa2   : > { %p5852_p10 = scmp.ne.s32.totalorder %s6611_s30, %s5851_s14  ;;  %p5858_p3 = scmp.lt.u32.totalorder %s5856_s22, %s5851_s14 }
  0xa3   : > { %p5860_p9 = scmp.lt.u32.totalorder %s5851_s14, %s6611_s30 }
  0xa4   : > { %p5854_p11 = pnand %p6620_p4, %p5852_p10  ;;  %p5859_p6 = por %p5858_p3, %p5857_p2 }
  0xa6   : > { %p5855_p0 = pneg %p5854_p11  ;;  %p5861_p13 = por %p5860_p9, %p5859_p6 }
  0xa8   : > { %p5862_p1 = pnand %p5861_p13, %p5855_p0 }
  0xaa   : > { %5865 = shalt.err (!%p5862_p1)
}
  0xab   : > { %s5866_s1 = scalar_lea.vmem %s6613_s17, 12288  ;;  %s6224_s28 = smov [#allocation11]  }
  0xac   : > { %p5867_p8 = scmp.ne.s32.totalorder %s6613_s17, %s5866_s1  ;;  %s5871_s16 = sshll.u32 %s6224_s28, 4  ;;  %s5872_s16 = int_to_ptr.vmem [resolvable:$false] %s5871_s16 }
  0xad   : > { %s5873_s24 = scalar_lea.vmem %s5872_s16, 24576  ;;  %p5874_p10 = scmp.lt.s32.totalorder %s6613_s17, %s5872_s16 }
  0xae   : > { %p5869_p12 = pnand %p5867_p8, %p6620_p4  ;;  %p5875_p11 = scmp.lt.s32.totalorder %s5873_s24, %s5866_s1 }
  0xb0   : > { %p5870_p5 = pneg %p5869_p12  ;;  %p5876_p2 = por %p5875_p11, %p5874_p10 }
  0xb2   : > { %p5877_p3 = pnand %p5876_p2, %p5870_p5 }
  0xb4   : > { %5880 = shalt.err (!%p5877_p3)
}
  0xb5   : > { %s6225_s14 = smov 384   ;;  %s6226_s22 = smov 24  }
  0xb6   : > { %5236 = dma.hbm_to_vmem [thread:$0]  (!%p6561_p7), %s6611_s30, 12288, %s6613_s17, %s6527_s26, %s6225_s14, %s6225_s14, %s6226_s22  }
  0xb7   : > { %s5152_s13 = sshll.u32 %s6209_s21, 12  ;;  %s7692_s6 = sld [smem:[#allocation54_spill]] }
  0xb8   : > { %s7693_s16 = sshll.u32 %s6572_s11, 8  ;;  %s7624_s18 = sshll.u32 %s6572_s11, 1 }
  0xb9   : > { %s641_s24 = scalar_lea.vmem [#allocation12], %s7693_s16 }
  0xba   : > { %s648_s4 = sshll.u32 %s641_s24, 4  ;;  %s6652_s4 = int_to_ptr.vmem [resolvable:$true] %s648_s4 }
  0xbd   : > { %s6648_s1 = scalar_lea.hbm %s7692_s6, %s5152_s13  ;;  %s5886_s20 = scalar_lea.hbm %s7692_s6, 8192 }
  0xbe   : > { %s5881_s29 = scalar_lea.hbm %s6648_s1, 4096  ;;  %p5887_p13 = scmp.lt.u32.totalorder %s6648_s1, %s7692_s6 }
  0xbf   : > { %p5882_p0 = scmp.ne.s32.totalorder %s6648_s1, %s5881_s29  ;;  %p5888_p1 = scmp.lt.u32.totalorder %s5886_s20, %s5881_s29 }
  0xc0   : > { %p5890_p12 = scmp.lt.u32.totalorder %s5881_s29, %s6648_s1 }
  0xc1   : > { %p5884_p6 = pnand %p5882_p0, %p6620_p4  ;;  %p5889_p8 = por %p5888_p1, %p5887_p13 }
  0xc3   : > { %p5885_p9 = pneg %p5884_p6  ;;  %p5891_p5 = por %p5890_p12, %p5889_p8 }
  0xc5   : > { %p5892_p10 = pnand %p5891_p5, %p5885_p9 }
  0xc7   : > { %5895 = shalt.err (!%p5892_p10)
}
  0xc8   : > { %s5896_s13 = scalar_lea.vmem %s6652_s4, 4096  ;;  %s6227_s28 = smov [#allocation12]  }
  0xc9   : > { %p5897_p11 = scmp.ne.s32.totalorder %s6652_s4, %s5896_s13  ;;  %s5901_s16 = sshll.u32 %s6227_s28, 4  ;;  %s5902_s16 = int_to_ptr.vmem [resolvable:$false] %s5901_s16 }
  0xca   : > { %s5903_s24 = scalar_lea.vmem %s5902_s16, 8192  ;;  %p5904_p0 = scmp.lt.s32.totalorder %s6652_s4, %s5902_s16 }
  0xcb   : > { %p5899_p2 = pnand %p5897_p11, %p6620_p4  ;;  %p5905_p6 = scmp.lt.s32.totalorder %s5903_s24, %s5896_s13 }
  0xcd   : > { %p5900_p3 = pneg %p5899_p2  ;;  %p5906_p13 = por %p5905_p6, %p5904_p0 }
  0xcf   : > { %p5907_p1 = pnand %p5906_p13, %p5900_p3 }
  0xd1   : > { %5910 = shalt.err (!%p5907_p1)
}
  0xd2   : > { %s7694_s29 = smov 8   ;;  %s7695_s17 = smov 128  }
  0xd3   : > { %5239 = dma.hbm_to_vmem [thread:$0]  (!%p6561_p7), %s6648_s1, 4096, %s6652_s4, %s6579_s19, %s7695_s17, %s7695_s17, %s7694_s29  }
  0xd4   : > { %s7625_s30 = sshll.u32 %s6209_s21, 5  ;;  %s7696_s7 = sld [smem:[#allocation55_spill]] }
  0xd5   : > { %s662_s13 = scalar_lea.vmem [#allocation13], %s7624_s18 }
  0xd6   : > { %s670_s28 = sshll.u32 %s662_s13, 4  ;;  %s671_s28 = int_to_ptr.vmem [resolvable:$true] %s670_s28 }
  0xda   : > { %s6686_s22 = scalar_lea.hbm %s7696_s7, %s7625_s30  ;;  %s5916_s24 = scalar_lea.hbm %s7696_s7, 64 }
  0xdb   : > { %s5911_s16 = scalar_lea.hbm %s6686_s22, 32  ;;  %p5917_p5 = scmp.lt.u32.totalorder %s6686_s22, %s7696_s7 }
  0xdc   : > { %p5912_p9 = scmp.ne.s32.totalorder %s6686_s22, %s5911_s16  ;;  %p5918_p10 = scmp.lt.u32.totalorder %s5916_s24, %s5911_s16 }
  0xdd   : > { %p5920_p2 = scmp.lt.u32.totalorder %s5911_s16, %s6686_s22 }
  0xde   : > { %p5914_p8 = pnand %p5912_p9, %p6620_p4  ;;  %p5919_p11 = por %p5918_p10, %p5917_p5 }
  0xe0   : > { %p5915_p12 = pneg %p5914_p8  ;;  %p5921_p3 = por %p5920_p2, %p5919_p11 }
  0xe2   : > { %p5922_p0 = pnand %p5921_p3, %p5915_p12 }
  0xe4   : > { %5925 = shalt.err (!%p5922_p0)
}
  0xe5   : > { %s5926_s13 = scalar_lea.vmem %s671_s28, 32  ;;  %s6228_s18 = smov [#allocation13]  }
  0xe6   : > { %p5927_p6 = scmp.ne.s32.totalorder %s671_s28, %s5926_s13  ;;  %s5931_s30 = sshll.u32 %s6228_s18, 4  ;;  %s5932_s30 = int_to_ptr.vmem [resolvable:$false] %s5931_s30 }
  0xe7   : > { %s5933_s4 = scalar_lea.vmem %s5932_s30, 64  ;;  %p5934_p9 = scmp.lt.s32.totalorder %s671_s28, %s5932_s30 }
  0xe8   : > { %p5929_p13 = pnand %p5927_p6, %p6620_p4  ;;  %p5935_p8 = scmp.lt.s32.totalorder %s5933_s4, %s5926_s13 }
  0xea   : > { %p5930_p1 = pneg %p5929_p13  ;;  %p5936_p7 = por %p5935_p8, %p5934_p9 }
  0xec   : > { %p5937_p5 = pnand %p5936_p7, %p5930_p1 }
  0xee   : > { %5940 = shalt.err (!%p5937_p5)
}
  0xef   : > { %p7697_p10 = scmp.ne.s32.totalorder %s7687_s5, 0  ;;  %s7698_s16 = sshll.u32 %s6209_s21, 5 }
  0xf0   : > { %s7699_s8 = sld [smem:[#allocation56_spill]]  ;;  %s7700_s20 = sshll.u32 %s6572_s11, 1 }
  0xf1   : > { %5242 = dma.hbm_to_vmem [thread:$0]  (!%p7697_p10), %s6686_s22, 32, %s671_s28, %s6527_s26  }
  0xf2   : > { %s681_s30 = scalar_lea.vmem [#allocation14], %s7700_s20 }
  0xf3   : > { %s689_s14 = sshll.u32 %s681_s30, 4  ;;  %s690_s14 = int_to_ptr.vmem [resolvable:$true] %s689_s14 }
  0xf6   : > { %s6713_s18 = scalar_lea.hbm %s7699_s8, %s7698_s16  ;;  %s5946_s4 = scalar_lea.hbm %s7699_s8, 64 }
  0xf7   : > { %s5941_s13 = scalar_lea.hbm %s6713_s18, 32  ;;  %p5947_p2 = scmp.lt.u32.totalorder %s6713_s18, %s7699_s8 }
  0xf8   : > { %p5942_p7 = scmp.ne.s32.totalorder %s6713_s18, %s5941_s13  ;;  %p5948_p3 = scmp.lt.u32.totalorder %s5946_s4, %s5941_s13 }
  0xf9   : > { %p5950_p6 = scmp.lt.u32.totalorder %s5941_s13, %s6713_s18 }
  0xfa   : > { %p5944_p12 = pnand %p5942_p7, %p6620_p4  ;;  %p5949_p0 = por %p5948_p3, %p5947_p2 }
  0xfc   : > { %p5945_p11 = pneg %p5944_p12  ;;  %p5951_p13 = por %p5950_p6, %p5949_p0 }
  0xfe   : > { %p5952_p1 = pnand %p5951_p13, %p5945_p11 }
 0x100   : > { %5955 = shalt.err (!%p5952_p1)
}
 0x101   : > { %s5956_s24 = scalar_lea.vmem %s690_s14, 32  ;;  %s6229_s20 = smov [#allocation14]  }
 0x102   : > { %p5957_p9 = scmp.ne.s32.totalorder %s690_s14, %s5956_s24  ;;  %s5961_s30 = sshll.u32 %s6229_s20, 4  ;;  %s5962_s30 = int_to_ptr.vmem [resolvable:$false] %s5961_s30 }
 0x103   : > { %s5963_s22 = scalar_lea.vmem %s5962_s30, 64  ;;  %p5964_p7 = scmp.lt.s32.totalorder %s690_s14, %s5962_s30 }
 0x104   : > { %p5959_p8 = pnand %p5957_p9, %p6620_p4  ;;  %p5965_p12 = scmp.lt.s32.totalorder %s5963_s22, %s5956_s24 }
 0x106   : > { %p5960_p5 = pneg %p5959_p8  ;;  %p5966_p10 = por %p5965_p12, %p5964_p7 }
 0x108   : > { %p5967_p2 = pnand %p5966_p10, %p5960_p5 }
 0x10a   : > { %5970 = shalt.err (!%p5967_p2)
}
 0x10b   : > { %p7701_p3 = scmp.ne.s32.totalorder %s7687_s5, 0  ;;  %s6230_s13 = smov [#allocation9]  }
 0x10c   : > { %s555_s28 = sshll.u32 %s6230_s13, 4  ;;  %s4733_s4 = sshll.u32 %s6572_s11, 10  ;;  %s556_s28 = int_to_ptr.vmem [resolvable:$true] %s555_s28 }
 0x10d   : > { %5245 = dma.hbm_to_vmem [thread:$0]  (!%p7701_p3), %s6713_s18, 32, %s690_s14, %s6579_s19  }
 0x10e   : > { %s7702_s3 = sld [smem:[#allocation51_spill]]  ;;  %p7703_p11 = scmp.ne.s32.totalorder %s7668_s27, 0 }
 0x110   : > { %p7704_p0 = pneg %p7703_p11 }
 0x114   : > { %s5971_s20 = scalar_lea.hbm %s7702_s3, 32 }
 0x115   : > { %p5972_p10 = scmp.ne.s32.totalorder %s7702_s3, %s5971_s20  ;;  %p5978_p1 = scmp.lt.u32.totalorder %s5971_s20, %s7702_s3 }
 0x117   : > { %p5974_p6 = pnand %p5972_p10, %p7704_p0 }
 0x119   : > { %p5975_p13 = pneg %p5974_p6 }
 0x11b   : > { %p5980_p9 = pnand %p5978_p1, %p5975_p13 }
 0x11d   : > { %5983 = shalt.err (!%p5980_p9)
}
 0x11e   : > { %s5984_s18 = scalar_lea.vmem %s556_s28, 32  ;;  %p7705_p5 = pmov %p7704_p0 }
 0x11f   : > { %p5985_p8 = scmp.ne.s32.totalorder %s556_s28, %s5984_s18  ;;  %p5992_p2 = scmp.lt.s32.totalorder %s556_s28, %s556_s28 }
 0x120   : > { %p5993_p3 = scmp.lt.s32.totalorder %s5984_s18, %s5984_s18 }
 0x121   : > { %p5987_p7 = pnand %p5985_p8, %p7705_p5 }
 0x122   : > { %p5994_p4 = por %p5993_p3, %p5992_p2 }
 0x123   : > { %p5988_p12 = pneg %p5987_p7 }
 0x125   : > { %p5995_p0 = pnand %p5994_p4, %p5988_p12 }
 0x127   : > { %5998 = shalt.err (!%p5995_p0)
}
 0x128   : > { %5226 = dma.hbm_to_vmem [thread:$0]  (!%p7703_p11), %s7702_s3, 32, %s556_s28, [#allocation10]  }
 0x129   : > { %s5155_s6 = sshll.u32 %s6209_s21, 14  ;;  %s707_s1 = scalar_lea.vmem [#allocation15], %s4733_s4 }
 0x12a   : > { %s714_s16 = sshll.u32 %s707_s1, 4  ;;  %s7706_s10 = sld [smem:[#allocation58_spill]]  ;;  %s6766_s16 = int_to_ptr.vmem [resolvable:$true] %s714_s16 }
 0x12b   : > { %p7707_p3 = scmp.ne.s32.totalorder %s7691_s9, 0 }
 0x130   : > { %s6764_s24 = scalar_lea.hbm %s7706_s10, %s5155_s6  ;;  %s6004_s18 = scalar_lea.hbm %s7706_s10, 32768 }
 0x131   : > { %s5999_s27 = scalar_lea.hbm %s6764_s24, 16384  ;;  %p6005_p6 = scmp.lt.u32.totalorder %s6764_s24, %s7706_s10 }
 0x132   : > { %p6000_p4 = scmp.ne.s32.totalorder %s6764_s24, %s5999_s27  ;;  %p6006_p13 = scmp.lt.u32.totalorder %s6004_s18, %s5999_s27 }
 0x133   : > { %p6008_p9 = scmp.lt.u32.totalorder %s5999_s27, %s6764_s24 }
 0x134   : > { %p6002_p10 = pnand %p6000_p4, %p7707_p3  ;;  %p6007_p1 = por %p6006_p13, %p6005_p6 }
 0x136   : > { %p6003_p11 = pneg %p6002_p10  ;;  %p6009_p8 = por %p6008_p9, %p6007_p1 }
 0x138   : > { %p6010_p5 = pnand %p6009_p8, %p6003_p11 }
 0x13a   : > { %6013 = shalt.err (!%p6010_p5)
}
 0x13b   : > { %s6014_s1 = scalar_lea.vmem %s6766_s16, 16384  ;;  %s6231_s20 = smov [#allocation15]  }
 0x13c   : > { %p6015_p7 = scmp.ne.s32.totalorder %s6766_s16, %s6014_s1  ;;  %s6019_s30 = sshll.u32 %s6231_s20, 4  ;;  %s6020_s30 = int_to_ptr.vmem [resolvable:$false] %s6019_s30 }
 0x13d   : > { %s6021_s28 = scalar_lea.vmem %s6020_s30, 32768  ;;  %p6022_p0 = scmp.lt.s32.totalorder %s6766_s16, %s6020_s30 }
 0x13e   : > { %p6017_p12 = pnand %p6015_p7, %p7707_p3  ;;  %p6023_p4 = scmp.lt.s32.totalorder %s6021_s28, %s6014_s1 }
 0x140   : > { %p6018_p2 = pneg %p6017_p12  ;;  %p6024_p10 = por %p6023_p4, %p6022_p0 }
 0x142   : > { %p6025_p6 = pnand %p6024_p10, %p6018_p2 }
 0x144   : > { %6028 = shalt.err (!%p6025_p6)
}
 0x145   : > { %s6232_s27 = smov 512   ;;  %s6233_s22 = smov 32  }
 0x146   : > { %p7708_p11 = scmp.ne.s32.totalorder %s7687_s5, 0  ;;  %s7709_s12 = sld [smem:[#allocation60_spill]] }
 0x147   : > { %s735_s1 = scalar_lea.vmem [#allocation16], %s4733_s4 }
 0x148   : > { %5248 = dma.hbm_to_vmem [thread:$0]  (!%p7708_p11), %s6764_s24, 16384, %s6766_s16, %s6527_s26, %s6232_s27, %s6232_s27, %s6233_s22  }
 0x149   : > { %s742_s20 = sshll.u32 %s735_s1, 4  ;;  %s6799_s20 = int_to_ptr.vmem [resolvable:$true] %s742_s20 }
 0x14c   : > { %s6795_s13 = scalar_lea.hbm %s7709_s12, %s5155_s6  ;;  %s6034_s24 = scalar_lea.hbm %s7709_s12, 32768 }
 0x14d   : > { %s6029_s30 = scalar_lea.hbm %s6795_s13, 16384  ;;  %p6035_p8 = scmp.lt.u32.totalorder %s6795_s13, %s7709_s12 }
 0x14e   : > { %p6030_p13 = scmp.ne.s32.totalorder %s6795_s13, %s6029_s30  ;;  %p6036_p5 = scmp.lt.u32.totalorder %s6034_s24, %s6029_s30 }
 0x14f   : > { %p6038_p12 = scmp.lt.u32.totalorder %s6029_s30, %s6795_s13 }
 0x150   : > { %p6032_p1 = pnand %p6030_p13, %p7707_p3  ;;  %p6037_p7 = por %p6036_p5, %p6035_p8 }
 0x152   : > { %p6033_p9 = pneg %p6032_p1  ;;  %p6039_p2 = por %p6038_p12, %p6037_p7 }
 0x154   : > { %p6040_p0 = pnand %p6039_p2, %p6033_p9 }
 0x156   : > { %6043 = shalt.err (!%p6040_p0)
}
 0x157   : > { %s6044_s11 = scalar_lea.vmem %s6799_s20, 16384  ;;  %s6234_s4 = smov [#allocation16]  }
 0x158   : > { %p6045_p4 = scmp.ne.s32.totalorder %s6799_s20, %s6044_s11  ;;  %s6049_s27 = sshll.u32 %s6234_s4, 4  ;;  %s6050_s27 = int_to_ptr.vmem [resolvable:$false] %s6049_s27 }
 0x159   : > { %s6051_s22 = scalar_lea.vmem %s6050_s27, 32768  ;;  %p6052_p13 = scmp.lt.s32.totalorder %s6799_s20, %s6050_s27 }
 0x15a   : > { %p6047_p10 = pnand %p6045_p4, %p7707_p3  ;;  %p6053_p1 = scmp.lt.s32.totalorder %s6051_s22, %s6044_s11 }
 0x15c   : > { %p6048_p6 = pneg %p6047_p10  ;;  %p6054_p8 = por %p6053_p1, %p6052_p13 }
 0x15e   : > { %p6055_p5 = pnand %p6054_p8, %p6048_p6 }
 0x160   : > { %6058 = shalt.err (!%p6055_p5)
}
 0x161   : > { %5251 = dma.hbm_to_vmem [thread:$0]  (!%p7708_p11), %s6795_s13, 16384, %s6799_s20, %s6579_s19, %s7695_s17, %s7695_s17, %s7694_s29  }
 0x162   : > { %p7710_p3 = scmp.ne.s32.totalorder %s7667_s25, 0 }
 0x164   : > { %775 = sbr.rel (%p7710_p3) target bundleno = 3903 (0xf3f), region = 92 }
 0x16b   : > { %s777_s9 = sand.u32 1, %s6389_s23   ;;  %s6830_s18 = sand.u32 1, %s6193_s0  }
 0x16c   : > { %s4740_s14 = sshll.u32 %s6830_s18, 3  ;;  %s6833_s1 = scalar_lea.sflag [#allocation4], %s777_s9 }
 0x16d   : > { %s6835_s5 = scalar_lea.vmem [#allocation3], %s4740_s14  ;;  %p7711_p9 = scmp.ne.s32.totalorder %s7673_s15, 0 }
 0x16f   : > { %6132 = dma.done.wait (%p7711_p9), %s6833_s1, 128  }
 0x170   : > { %6134 = vsyncadd (%p7711_p9), %s6833_s1, 4294967168  ;;  %s7630_s19 = sshll.u32 %s6830_s18, 4  ;;  %s6844_s25 = scalar_lea.sflag [#allocation7], %s777_s9 }
 0x171   : > { %s6848_s29 = scalar_lea.vmem [#allocation6], %s7630_s19 }
 0x172   : > { %6136 = dma.done.wait (%p7711_p9), %s6844_s25, 256  }
 0x173   : > { %6138 = vsyncadd (%p7711_p9), %s6844_s25, 4294967040  ;;  %p7712_p11 = scmp.eq.s32.totalorder %s6389_s23, 0 }
 0x175   : > { %6140 = dma.done.wait (%p7712_p11), [#allocation7], 256   ;;  %p7713_p7 = pmov %p7712_p11 }
 0x177   : > { %6142 = vsyncadd (%p7713_p7), [#allocation7], 4294967040  ;;  %p7714_p12 = pmov %p7713_p7 }
 0x178   : > { %p7715_p2 = pmov %p7713_p7 }
 0x179   : > { %6144 = dma.done.wait (%p7714_p12), [#allocation10], 32  }
 0x17a   : > { %6146 = vsyncadd (%p7715_p2), [#allocation10], 4294967264  ;;  %s7716_s17 = sld [smem:[#allocation29_spill]]  ;;  %s7717_s13 = sld [smem:[#allocation39_spill]] }
 0x180   : > { %s805_s20 = sand.u32 1, %s7716_s17   ;;  %p7718_p0 = scmp.ne.s32.totalorder %s7717_s13, 0 }
 0x181   : > { %s5192_s30 = smul.u32 768, %s805_s20 }
 0x183   : > { %s6865_s15 = scalar_lea.vmem [#allocation11], %s5192_s30 }
 0x184   : > { %6148 = dma.done.wait (%p7718_p0), %s6833_s1, 12288  }
 0x185   : > { %6150 = vsyncadd (%p7718_p0), %s6833_s1, 4294955008  ;;  %s4744_s26 = sshll.u32 %s805_s20, 8 }
 0x186   : > { %s6873_s16 = scalar_lea.vmem [#allocation12], %s4744_s26 }
 0x187   : > { %6152 = dma.done.wait (%p7718_p0), %s6844_s25, 4096  }
 0x188   : > { %6154 = vsyncadd (%p7718_p0), %s6844_s25, 4294963200  ;;  %s4745_s23 = sshll.u32 %s805_s20, 1 }
 0x189   : > { %s6881_s24 = scalar_lea.vmem [#allocation13], %s4745_s23 }
 0x18a   : > { %6156 = dma.done.wait (%p7718_p0), %s6833_s1, 32  }
 0x18b   : > { %6158 = vsyncadd (%p7718_p0), %s6833_s1, 4294967264  ;;  %s6889_s6 = scalar_lea.vmem [#allocation14], %s4745_s23 }
 0x18c   : > { %7719 = sst [smem:[#allocation46_spill]] %s6889_s6 }
 0x18d   : > { %6160 = dma.done.wait (%p7718_p0), %s6844_s25, 32  }
 0x18e   : > { %6162 = vsyncadd (%p7718_p0), %s6844_s25, 4294967264  ;;  %s4747_s28 = sshll.u32 %s805_s20, 10 }
 0x18f   : > { %s6897_s11 = scalar_lea.vmem [#allocation15], %s4747_s28 }
 0x190   : > { %6164 = dma.done.wait (%p7718_p0), %s6833_s1, 16384  }
 0x191   : > { %6166 = vsyncadd (%p7718_p0), %s6833_s1, 4294950912  ;;  %s6905_s4 = scalar_lea.vmem [#allocation16], %s4747_s28 }
 0x192   : > { %7720 = sst [smem:[#allocation47_spill]] %s6905_s4 }
 0x193   : > { %6168 = dma.done.wait (%p7718_p0), %s6844_s25, 16384  }
 0x194   : > { %6170 = vsyncadd (%p7718_p0), %s6844_s25, 4294950912  ;;  %s7721_s27 = sld [smem:[#allocation34_spill]]  ;;  %s7723_s25 = sld [smem:[#allocation53_spill]] }
 0x195   : > { %s7724_s7 = sld [smem:[#allocation59_spill]]  ;;  %s7725_s21 = sld [smem:[#allocation61_spill]] }
 0x196   : > { %s7726_s2 = sld [smem:[#allocation62_spill]]  ;;  %s7727_s30 = sld [smem:[#allocation63_spill]] }
 0x197   : > { %s7728_s13 = sshll.u32 %s6830_s18, 4 }
 0x19a   : > { %p964_p4 = scmp.lt.s32.totalorder %s7721_s27, 1  ;;  %p4755_p10 = scmp.ne.s32.totalorder %s7721_s27, 0 }
 0x19b   : > { %v5362_v0 = vld [vmem:[#allocation8 + $0x4] ss:$8 sps:$4 sm:$0xff] (!%p4755_p10)   ;;  %v5364_v1 = vld [vmem:[#allocation8] ss:$8 sps:$4 sm:$0xff] (!%p4755_p10)   ;;  %v6235_v2 = vmov (!%p4755_p10), 0   ;;  %v993_v3 = vld [vmem:[%s6835_s5] sm:$0xff] (!%p4755_p10)  ;;  %v999_v5 = vlaneseq (!%p4755_p10) }
 0x19c   : > { %s965_s22 = scalar_select %p964_p4, %s7721_s27, 1 }
 0x19d   : > { %992 = sbr.rel (%p4755_p10) target bundleno = 635 (0x27b), region = 136  ;;  %1055 = vmatprep.mubr.bf16.mxu0 (!%p4755_p10), %v6235_v2  ;;  %1023 = vmatprep.subr.bf16.mxu0 (!%p4755_p10), %v5362_v0  ;;  %v994_v4 = vpack.c.bf16 (!%p4755_p10), %v993_v3, %v993_v3  ;;  %vm1019_vm0 = vcmask (!%p4755_p10), 130048   ;;  %v1000_v6 = vshrl.u32 (!%p4755_p10), %v999_v5, 7  ;;  %v997_v8 = vld [vmem:[#allocation9] sm:$0x3] (!%p4755_p10)  ;;  %v1065_v16 = vld [vmem:[%s6848_s29 + $0x8] sm:$0xff] (!%p4755_p10) }
 0x19e   : > { %s5193_s9 = smul.u32 6, %s965_s22  ;;  %s6915_s14 = sshll.u32 %s965_s22, 1  ;;  %1024 = vmatpush1.bf16.msra.mxu0 (!%p4755_p10), %v5364_v1  ;;  %v1064_v13 = vld [vmem:[%s6848_s29] sm:$0xff] (!%p4755_p10) }
 0x19f   : > { %s4751_s26 = sshll.u32 %s965_s22, 3  ;;  %s979_s0 = scalar_lea.vmem %s7725_s21, %s6915_s14  ;;  %v1001_v7 = vsub.s32 (!%p4755_p10), 0, %v1000_v6  ;;  %v1005_v9 = vsub.s32 (!%p4755_p10), 1, %v1000_v6 }
 0x1a0   : > { %s6924_s28 = scalar_lea.vmem %s7723_s25, %s5193_s9  ;;  %s6929_s8 = scalar_lea.vmem %s7724_s7, %s4751_s26 }
 0x1a1   : > { %s983_s4 = scalar_lea.vmem %s7726_s2, %s6915_s14  ;;  %s987_s6 = scalar_lea.vmem %s7727_s30, %s6915_s14  ;;  %4758 = vmatmul.mubr.msk.bf16.vlgmr.msra.gmra.mrb[0].mxu0 (!%p4755_p10), %vm1019_vm0, %v994_v4  ;;  %v1002_v10 = vrot.slane (!%p4755_p10), %v997_v8, %v1001_v7  ;;  %v1006_v11 = vrot.slane (!%p4755_p10), %v997_v8, %v1005_v9 }
 0x1a2   : > { %s6945_s9 = scalar_lea.vmem [#allocation17], %s7728_s13 }
 0x274   : > { %v1057_v12 = vpop.f32.mrb[0].mxu0 }
 0x275   : > { %v1058_v14 = vadd.f32 %v1057_v12, %v1002_v10  ;;  %v1059_v15 = vpop.f32.mrb[1].mxu0 }
 0x276   : > { %v1060_v17 = vadd.f32 %v1059_v15, %v1006_v11  ;;  %v1061_v18 = vpop.f32.mrb[2].mxu0 }
 0x277   : > { %v1066_v19 = vadd.f32 %v1064_v13, %v1058_v14  ;;  %v1062_v20 = vpop.f32.mrb[3].mxu0 }
 0x278   : > { %v1067_v21 = vadd.f32 %v1065_v16, %v1060_v17 }
 0x279   : > { %1068 = vst [vmem:[#allocation2] sm:$0xff] %v1066_v19 }
 0x27a   : > { %1069 = vst [vmem:[#allocation2 + $0x8] sm:$0xff] %v1067_v21 }
 0x27b PF: > { %v5365_v22 = vld [vmem:[%s6865_s15 + $0xc] ss:$24 sps:$4 sm:$0xff]   ;;  %v5367_v23 = vld [vmem:[%s6865_s15 + $0x8] ss:$24 sps:$4 sm:$0xff]   ;;  %v5368_v24 = vld [vmem:[%s6865_s15 + $0x3c] ss:$24 sps:$4 sm:$0xff]  }
 0x27c   : > { %1723 = vmatprep.subr.bf16.mxu1 %v5365_v22  ;;  %v5370_v25 = vld [vmem:[%s6865_s15 + $0x4] ss:$24 sps:$4 sm:$0xff]   ;;  %v5372_v26 = vld [vmem:[%s6865_s15 + $0x38] ss:$24 sps:$4 sm:$0xff]   ;;  %v5376_v29 = vld [vmem:[%s6865_s15 + $0x34] ss:$24 sps:$4 sm:$0xff]  }
 0x27d   : > { %1724 = vmatpush1.bf16.msra.mxu1 %v5367_v23  ;;  %v5373_v27 = vld [vmem:[%s6865_s15] ss:$24 sps:$4 sm:$0xff]   ;;  %v5374_v28 = vld [vmem:[%s6865_s15 + $0x6c] ss:$24 sps:$4 sm:$0xff]   ;;  %1682 = vmatprep.subr.bf16.mxu0 %v5370_v25  ;;  %v5379_v30 = vld [vmem:[%s6865_s15 + $0x30] ss:$24 sps:$4 sm:$0xff]  }
 0x27e   : > { %1725 = vmatprep.subr.bf16.mxu1 %v5368_v24  ;;  %1683 = vmatpush1.bf16.msra.mxu0 %v5373_v27  ;;  %v5378_v31 = vld [vmem:[%s6865_s15 + $0x68] ss:$24 sps:$4 sm:$0xff]   ;;  %v5380_v32 = vld [vmem:[%s6865_s15 + $0x9c] ss:$24 sps:$4 sm:$0xff]   ;;  %v5384_v35 = vld [vmem:[%s6865_s15 + $0x98] ss:$24 sps:$4 sm:$0xff]   ;;  %v1172_v27 = vlaneseq }
 0x27f   : > { %1684 = vmatprep.subr.bf16.mxu0 %v5376_v29  ;;  %v5382_v33 = vld [vmem:[%s6865_s15 + $0x64] ss:$24 sps:$4 sm:$0xff]   ;;  %v5385_v34 = vld [vmem:[%s6865_s15 + $0x60] ss:$24 sps:$4 sm:$0xff]   ;;  %v5388_v36 = vld [vmem:[%s6865_s15 + $0x94] ss:$24 sps:$4 sm:$0xff]  }
 0x280   : > { %v5386_v37 = vld [vmem:[%s6865_s15 + $0xcc] ss:$24 sps:$4 sm:$0xff]   ;;  %v5390_v38 = vld [vmem:[%s6865_s15 + $0xc8] ss:$24 sps:$4 sm:$0xff]   ;;  %v5392_v41 = vld [vmem:[%s6865_s15 + $0xfc] ss:$24 sps:$4 sm:$0xff]  }
 0x281   : > { %1726 = vmatpush1.bf16.msra.mxu1 %v5372_v26  ;;  %v5391_v39 = vld [vmem:[%s6865_s15 + $0x90] ss:$24 sps:$4 sm:$0xff]   ;;  %v5394_v40 = vld [vmem:[%s6865_s15 + $0xc4] ss:$24 sps:$4 sm:$0xff]   ;;  %v5397_v42 = vld [vmem:[%s6865_s15 + $0xc0] ss:$24 sps:$4 sm:$0xff]  }
 0x282   : > { %1727 = vmatprep.subr.bf16.mxu1 %v5374_v28  ;;  %1685 = vmatpush1.bf16.msra.mxu0 %v5379_v30  ;;  %v5396_v43 = vld [vmem:[%s6865_s15 + $0xf8] ss:$24 sps:$4 sm:$0xff]   ;;  %v5400_v44 = vld [vmem:[%s6865_s15 + $0xf4] ss:$24 sps:$4 sm:$0xff]   ;;  %v5402_v46 = vld [vmem:[%s6865_s15 + $0x128] ss:$24 sps:$4 sm:$0xff]  }
 0x283   : > { %1686 = vmatprep.subr.bf16.mxu0 %v5382_v33  ;;  %v5398_v45 = vld [vmem:[%s6865_s15 + $0x12c] ss:$24 sps:$4 sm:$0xff]   ;;  %v5403_v47 = vld [vmem:[%s6865_s15 + $0xf0] ss:$24 sps:$4 sm:$0xff]   ;;  %v5404_v49 = vld [vmem:[%s6865_s15 + $0x15c] ss:$24 sps:$4 sm:$0xff]  }
 0x284   : > { %v5406_v48 = vld [vmem:[%s6865_s15 + $0x124] ss:$24 sps:$4 sm:$0xff]   ;;  %v5409_v50 = vld [vmem:[%s6865_s15 + $0x120] ss:$24 sps:$4 sm:$0xff]   ;;  %v5412_v52 = vld [vmem:[%s6865_s15 + $0x154] ss:$24 sps:$4 sm:$0xff]  }
 0x285   : > { %1728 = vmatpush1.bf16.msra.mxu1 %v5378_v31  ;;  %v5408_v51 = vld [vmem:[%s6865_s15 + $0x158] ss:$24 sps:$4 sm:$0xff]   ;;  %v5410_v53 = vld [vmem:[%s6865_s15 + $0x18c] ss:$24 sps:$4 sm:$0xff]   ;;  %v5414_v54 = vld [vmem:[%s6865_s15 + $0x188] ss:$24 sps:$4 sm:$0xff]  }
 0x286   : > { %1729 = vmatprep.subr.bf16.mxu1 %v5380_v32  ;;  %1687 = vmatpush1.bf16.msra.mxu0 %v5385_v34  ;;  %v5415_v55 = vld [vmem:[%s6865_s15 + $0x150] ss:$24 sps:$4 sm:$0xff]   ;;  %v5418_v56 = vld [vmem:[%s6865_s15 + $0x184] ss:$24 sps:$4 sm:$0xff]   ;;  %v5421_v58 = vld [vmem:[%s6865_s15 + $0x180] ss:$24 sps:$4 sm:$0xff]  }
 0x287   : > { %1688 = vmatprep.subr.bf16.mxu0 %v5388_v36  ;;  %v5416_v57 = vld [vmem:[%s6865_s15 + $0x1bc] ss:$24 sps:$4 sm:$0xff]   ;;  %v5420_v59 = vld [vmem:[%s6865_s15 + $0x1b8] ss:$24 sps:$4 sm:$0xff]   ;;  %v5422_v61 = vld [vmem:[%s6865_s15 + $0x1ec] ss:$24 sps:$4 sm:$0xff]  }
 0x288   : > { %v5424_v60 = vld [vmem:[%s6865_s15 + $0x1b4] ss:$24 sps:$4 sm:$0xff]   ;;  %v5426_v62 = vld [vmem:[%s6865_s15 + $0x1e8] ss:$24 sps:$4 sm:$0xff]   ;;  %v5430_v0 = vld [vmem:[%s6865_s15 + $0x1e4] ss:$24 sps:$4 sm:$0xff]  }
 0x289   : > { %1730 = vmatpush1.bf16.msra.mxu1 %v5384_v35  ;;  %v5427_v63 = vld [vmem:[%s6865_s15 + $0x1b0] ss:$24 sps:$4 sm:$0xff]   ;;  %v5428_v1 = vld [vmem:[%s6865_s15 + $0x21c] ss:$24 sps:$4 sm:$0xff]   ;;  %v5433_v4 = vld [vmem:[%s6865_s15 + $0x1e0] ss:$24 sps:$4 sm:$0xff]  }
 0x28a   : > { %1731 = vmatprep.subr.bf16.mxu1 %v5386_v37  ;;  %1689 = vmatpush1.bf16.msra.mxu0 %v5391_v39  ;;  %v5432_v2 = vld [vmem:[%s6865_s15 + $0x218] ss:$24 sps:$4 sm:$0xff]   ;;  %v5434_v6 = vld [vmem:[%s6865_s15 + $0x24c] ss:$24 sps:$4 sm:$0xff]   ;;  %v5438_v9 = vld [vmem:[%s6865_s15 + $0x248] ss:$24 sps:$4 sm:$0xff]  }
 0x28b   : > { %1690 = vmatprep.subr.bf16.mxu0 %v5394_v40  ;;  %v6996_v3 = vld [vmem:[#allocation2 + $0x8] sm:$0xff]  ;;  %v5439_v8 = vld [vmem:[%s6865_s15 + $0x210] ss:$24 sps:$4 sm:$0xff]   ;;  %v5446_v15 = vld [vmem:[%s6865_s15 + $0x2ac] ss:$24 sps:$4 sm:$0xff]   ;;  %v6236_v26 = vmov 0.0  }
 0x28c   : > { %v1073_v5 = vpack.c.bf16 %v6996_v3, %v6996_v3  ;;  %v5436_v7 = vld [vmem:[%s6865_s15 + $0x214] ss:$24 sps:$4 sm:$0xff]   ;;  %v5442_v10 = vld [vmem:[%s6865_s15 + $0x244] ss:$24 sps:$4 sm:$0xff]   ;;  %v5445_v12 = vld [vmem:[%s6865_s15 + $0x240] ss:$24 sps:$4 sm:$0xff]  }
 0x28d   : > { %1732 = vmatpush1.bf16.msra.mxu1 %v5390_v38  ;;  %v5440_v11 = vld [vmem:[%s6865_s15 + $0x27c] ss:$24 sps:$4 sm:$0xff]   ;;  %v5444_v13 = vld [vmem:[%s6865_s15 + $0x278] ss:$24 sps:$4 sm:$0xff]   ;;  %v5450_v17 = vld [vmem:[%s6865_s15 + $0x2a8] ss:$24 sps:$4 sm:$0xff]  }
 0x28e   : > { %1733 = vmatprep.subr.bf16.mxu1 %v5392_v41  ;;  %1691 = vmatpush1.bf16.msra.mxu0 %v5397_v42  ;;  %v5448_v14 = vld [vmem:[%s6865_s15 + $0x274] ss:$24 sps:$4 sm:$0xff]   ;;  %v5451_v16 = vld [vmem:[%s6865_s15 + $0x270] ss:$24 sps:$4 sm:$0xff]   ;;  %v5454_v18 = vld [vmem:[%s6865_s15 + $0x2a4] ss:$24 sps:$4 sm:$0xff]  }
 0x28f   : > { %1692 = vmatprep.subr.bf16.mxu0 %v5400_v44  ;;  %1755 = vmatprep.mubr.bf16.mxu1 %v1073_v5  ;;  %v5452_v19 = vld [vmem:[%s6865_s15 + $0x2dc] ss:$24 sps:$4 sm:$0xff]   ;;  %v5457_v20 = vld [vmem:[%s6865_s15 + $0x2a0] ss:$24 sps:$4 sm:$0xff]   ;;  %v5460_v24 = vld [vmem:[%s6865_s15 + $0x2d0] ss:$24 sps:$4 sm:$0xff]  }
 0x290   : > { %1714 = vmatprep.mubr.bf16.mxu0 %v1073_v5  ;;  %v5456_v21 = vld [vmem:[%s6865_s15 + $0x2d8] ss:$24 sps:$4 sm:$0xff]   ;;  %v5458_v23 = vld [vmem:[%s6865_s15 + $0x2d4] ss:$24 sps:$4 sm:$0xff]   ;;  %vm6237_vm1 = vmmov 0   ;;  %v7030_v28 = vshrl.u32 %v1172_v27, 7 }
 0x291   : > { %1734 = vmatpush1.bf16.msra.mxu1 %v5396_v43  ;;  %v7017_v22 = vld [vmem:[#allocation2] sm:$0xff]  ;;  %vm1880_vm2 = vcmask 64512   ;;  %vm1897_vm3 = vcmask 1043456   ;;  %s7729_s3 = sld [smem:[#allocation46_spill]]  ;;  %s7730_s12 = sld [smem:[#allocation57_spill]] }
 0x292   : > { %1735 = vmatprep.subr.bf16.mxu1 %v5398_v45  ;;  %1693 = vmatpush1.bf16.msra.mxu0 %v5403_v47  ;;  %v7023_v25 = vpack.c.bf16 %v7017_v22, %v7017_v22  ;;  %v1182_v29 = vsub.s32 2, %v7030_v28  ;;  %v7034_v30 = vld [vmem:[%s6924_s28] sm:$0x3f]  ;;  %v7037_v31 = vsub.s32 0, %v7030_v28  ;;  %v1194_v27 = vsub.s32 5, %v7030_v28  ;;  %s7732_s2 = sld [smem:[#allocation47_spill]] }
 0x293   : > { %1694 = vmatprep.subr.bf16.mxu0 %v5406_v48  ;;  %v5463_v47 = vld [vmem:[%s6865_s15 + $0x14] ss:$24 sps:$4 sm:$0xff]   ;;  %v5466_v48 = vld [vmem:[%s6865_s15 + $0x44] ss:$24 sps:$4 sm:$0xff]  }
 0x294   : > { %v1183_v32 = vrot.slane %v7034_v30, %v1182_v29  ;;  %v1175_v34 = vrot.slane %v7034_v30, %v7037_v31 }
 0x295   : > { %1736 = vmatpush1.bf16.msra.mxu1 %v5402_v46  ;;  %v5461_v46 = vld [vmem:[%s6865_s15 + $0x10] ss:$24 sps:$4 sm:$0xff]  }
 0x296   : > { %1737 = vmatprep.subr.bf16.mxu1 %v5404_v49  ;;  %1695 = vmatpush1.bf16.msra.mxu0 %v5409_v50  ;;  %v5464_v49 = vld [vmem:[%s6865_s15 + $0x40] ss:$24 sps:$4 sm:$0xff]   ;;  %v5469_v50 = vld [vmem:[%s6865_s15 + $0x74] ss:$24 sps:$4 sm:$0xff]  }
 0x297   : > { %1696 = vmatprep.subr.bf16.mxu0 %v5412_v52  ;;  %v5472_v52 = vld [vmem:[%s6865_s15 + $0xa4] ss:$24 sps:$4 sm:$0xff]   ;;  %s7731_s21 = scalar_lea.vmem %s7730_s12, %s6915_s14 }
 0x299   : > { %1738 = vmatpush1.bf16.msra.mxu1 %v5408_v51  ;;  %v5467_v51 = vld [vmem:[%s6865_s15 + $0x70] ss:$24 sps:$4 sm:$0xff]  }
 0x29a   : > { %1739 = vmatprep.subr.bf16.mxu1 %v5410_v53  ;;  %1697 = vmatpush1.bf16.msra.mxu0 %v5415_v55  ;;  %v5470_v53 = vld [vmem:[%s6865_s15 + $0xa0] ss:$24 sps:$4 sm:$0xff]   ;;  %v5473_v55 = vld [vmem:[%s6865_s15 + $0xd0] ss:$24 sps:$4 sm:$0xff]  }
 0x29b   : > { %1698 = vmatprep.subr.bf16.mxu0 %v5418_v56  ;;  %v5478_v56 = vld [vmem:[%s6865_s15 + $0x104] ss:$24 sps:$4 sm:$0xff]  }
 0x29d   : > { %1740 = vmatpush1.bf16.msra.mxu1 %v5414_v54  ;;  %v5475_v54 = vld [vmem:[%s6865_s15 + $0xd4] ss:$24 sps:$4 sm:$0xff]  }
 0x29e   : > { %1741 = vmatprep.subr.bf16.mxu1 %v5416_v57  ;;  %1699 = vmatpush1.bf16.msra.mxu0 %v5421_v58  ;;  %v5476_v57 = vld [vmem:[%s6865_s15 + $0x100] ss:$24 sps:$4 sm:$0xff]   ;;  %v5481_v58 = vld [vmem:[%s6865_s15 + $0x134] ss:$24 sps:$4 sm:$0xff]  }
 0x29f   : > { %1700 = vmatprep.subr.bf16.mxu0 %v5424_v60  ;;  %v5484_v60 = vld [vmem:[%s6865_s15 + $0x164] ss:$24 sps:$4 sm:$0xff]  }
 0x2a1   : > { %1742 = vmatpush1.bf16.msra.mxu1 %v5420_v59  ;;  %v5479_v59 = vld [vmem:[%s6865_s15 + $0x130] ss:$24 sps:$4 sm:$0xff]  }
 0x2a2   : > { %1743 = vmatprep.subr.bf16.mxu1 %v5422_v61  ;;  %1701 = vmatpush1.bf16.msra.mxu0 %v5427_v63  ;;  %v5482_v61 = vld [vmem:[%s6865_s15 + $0x160] ss:$24 sps:$4 sm:$0xff]   ;;  %v5485_v63 = vld [vmem:[%s6865_s15 + $0x190] ss:$24 sps:$4 sm:$0xff]  }
 0x2a3   : > { %1702 = vmatprep.subr.bf16.mxu0 %v5430_v0  ;;  %v5490_v0 = vld [vmem:[%s6865_s15 + $0x1c4] ss:$24 sps:$4 sm:$0xff]  }
 0x2a5   : > { %1744 = vmatpush1.bf16.msra.mxu1 %v5426_v62  ;;  %v5487_v62 = vld [vmem:[%s6865_s15 + $0x194] ss:$24 sps:$4 sm:$0xff]  }
 0x2a6   : > { %1745 = vmatprep.subr.bf16.mxu1 %v5428_v1  ;;  %1703 = vmatpush1.bf16.msra.mxu0 %v5433_v4  ;;  %v5488_v1 = vld [vmem:[%s6865_s15 + $0x1c0] ss:$24 sps:$4 sm:$0xff]   ;;  %v5491_v4 = vld [vmem:[%s6865_s15 + $0x1f0] ss:$24 sps:$4 sm:$0xff]  }
 0x2a7   : > { %1704 = vmatprep.subr.bf16.mxu0 %v5436_v7  ;;  %v5499_v7 = vld [vmem:[%s6865_s15 + $0x254] ss:$24 sps:$4 sm:$0xff]  }
 0x2a9   : > { %1746 = vmatpush1.bf16.msra.mxu1 %v5432_v2  ;;  %v5493_v2 = vld [vmem:[%s6865_s15 + $0x1f4] ss:$24 sps:$4 sm:$0xff]  }
 0x2aa   : > { %1747 = vmatprep.subr.bf16.mxu1 %v5434_v6  ;;  %1705 = vmatpush1.bf16.msra.mxu0 %v5439_v8  ;;  %v5494_v6 = vld [vmem:[%s6865_s15 + $0x220] ss:$24 sps:$4 sm:$0xff]   ;;  %v5497_v8 = vld [vmem:[%s6865_s15 + $0x250] ss:$24 sps:$4 sm:$0xff]  }
 0x2ab   : > { %1706 = vmatprep.subr.bf16.mxu0 %v5442_v10  ;;  %v5500_v10 = vld [vmem:[%s6865_s15 + $0x280] ss:$24 sps:$4 sm:$0xff]  }
 0x2ad   : > { %1748 = vmatpush1.bf16.msra.mxu1 %v5438_v9  ;;  %v5502_v9 = vld [vmem:[%s6865_s15 + $0x284] ss:$24 sps:$4 sm:$0xff]  }
 0x2ae   : > { %1749 = vmatprep.subr.bf16.mxu1 %v5440_v11  ;;  %1707 = vmatpush1.bf16.msra.mxu0 %v5445_v12  ;;  %v5505_v11 = vld [vmem:[%s6865_s15 + $0x2b4] ss:$24 sps:$4 sm:$0xff]   ;;  %v5503_v12 = vld [vmem:[%s6865_s15 + $0x2b0] ss:$24 sps:$4 sm:$0xff]  }
 0x2af   : > { %1708 = vmatprep.subr.bf16.mxu0 %v5448_v14  ;;  %v5506_v14 = vld [vmem:[%s6865_s15 + $0x2e0] ss:$24 sps:$4 sm:$0xff]  }
 0x2b1   : > { %1750 = vmatpush1.bf16.msra.mxu1 %v5444_v13  ;;  %v5508_v13 = vld [vmem:[%s6865_s15 + $0x2e4] ss:$24 sps:$4 sm:$0xff]  }
 0x2b2   : > { %1751 = vmatprep.subr.bf16.mxu1 %v5446_v15  ;;  %1709 = vmatpush1.bf16.msra.mxu0 %v5451_v16 }
 0x2b3   : > { %1710 = vmatprep.subr.bf16.mxu0 %v5454_v18 }
 0x2b5   : > { %1752 = vmatpush1.bf16.msra.mxu1 %v5450_v17 }
 0x2b6   : > { %1753 = vmatprep.subr.bf16.mxu1 %v5452_v19  ;;  %1711 = vmatpush1.bf16.msra.mxu0 %v5457_v20 }
 0x2b7   : > { %1712 = vmatprep.subr.bf16.mxu0 %v5458_v23 }
 0x2b9   : > { %1754 = vmatpush1.bf16.msra.mxu1 %v5456_v21 }
 0x2ba   : > { %1713 = vmatpush1.bf16.msra.mxu0 %v5460_v24  ;;  %5166 = vmatprep.subr.bf16.mxu1 %v6236_v26  ;;  %v1190_v24 = vsub.s32 4, %v7030_v28 }
 0x2bb   : > { %1764 = vmatprep.subr.bf16.mxu0 %v5463_v47 }
 0x2bc   : > { %1756 = vmatmul.mubr.bf16.vlgmr.msra.gmra.mrb[0].mxu1 %v7023_v25 }
 0x2bd   : > { %1715 = vmatmul.mubr.bf16.vlgmr.msra.gmra.mrb[0].mxu0 %v7023_v25  ;;  %5168 = vmatprep.mubr.msk.bf16.mxu1 %vm6237_vm1, %v6236_v26 }
 0x2be   : > { %1796 = vmatprep.mubr.bf16.mxu0 %v1073_v5  ;;  %1765 = vmatpush1.bf16.msra.mxu0 %v5461_v46  ;;  %v5496_v5 = vld [vmem:[%s6865_s15 + $0x224] ss:$24 sps:$4 sm:$0xff]  }
 0x2bf   : > { %1766 = vmatprep.subr.bf16.mxu0 %v5466_v48  ;;  %v5509_v48 = vld [vmem:[%s6873_s16] ss:$8 sps:$4 sm:$0xff]  }
 0x2c2   : > { %1767 = vmatpush1.bf16.msra.mxu0 %v5464_v49  ;;  %v5511_v49 = vld [vmem:[%s6873_s16 + $0x4] ss:$8 sps:$4 sm:$0xff]  }
 0x2c3   : > { %1768 = vmatprep.subr.bf16.mxu0 %v5469_v50  ;;  %v5514_v50 = vld [vmem:[%s6873_s16 + $0x14] ss:$8 sps:$4 sm:$0xff]  }
 0x2c6   : > { %1769 = vmatpush1.bf16.msra.mxu0 %v5467_v51  ;;  %v5512_v51 = vld [vmem:[%s6873_s16 + $0x10] ss:$8 sps:$4 sm:$0xff]  }
 0x2c7   : > { %1770 = vmatprep.subr.bf16.mxu0 %v5472_v52  ;;  %v5517_v52 = vld [vmem:[%s6873_s16 + $0x24] ss:$8 sps:$4 sm:$0xff]  }
 0x2ca   : > { %1771 = vmatpush1.bf16.msra.mxu0 %v5470_v53  ;;  %v5515_v53 = vld [vmem:[%s6873_s16 + $0x20] ss:$8 sps:$4 sm:$0xff]  }
 0x2cb   : > { %1772 = vmatprep.subr.bf16.mxu0 %v5475_v54  ;;  %v5520_v54 = vld [vmem:[%s6873_s16 + $0x34] ss:$8 sps:$4 sm:$0xff]  }
 0x2ce   : > { %1773 = vmatpush1.bf16.msra.mxu0 %v5473_v55  ;;  %v5518_v55 = vld [vmem:[%s6873_s16 + $0x30] ss:$8 sps:$4 sm:$0xff]  }
 0x2cf   : > { %1774 = vmatprep.subr.bf16.mxu0 %v5478_v56  ;;  %v5523_v56 = vld [vmem:[%s6873_s16 + $0x44] ss:$8 sps:$4 sm:$0xff]  }
 0x2d2   : > { %1775 = vmatpush1.bf16.msra.mxu0 %v5476_v57  ;;  %v5521_v57 = vld [vmem:[%s6873_s16 + $0x40] ss:$8 sps:$4 sm:$0xff]  }
 0x2d3   : > { %1776 = vmatprep.subr.bf16.mxu0 %v5481_v58  ;;  %v5526_v58 = vld [vmem:[%s6873_s16 + $0x54] ss:$8 sps:$4 sm:$0xff]  }
 0x2d6   : > { %1777 = vmatpush1.bf16.msra.mxu0 %v5479_v59  ;;  %v5524_v59 = vld [vmem:[%s6873_s16 + $0x50] ss:$8 sps:$4 sm:$0xff]  }
 0x2d7   : > { %1778 = vmatprep.subr.bf16.mxu0 %v5484_v60  ;;  %v5529_v60 = vld [vmem:[%s6873_s16 + $0x64] ss:$8 sps:$4 sm:$0xff]  }
 0x2da   : > { %1779 = vmatpush1.bf16.msra.mxu0 %v5482_v61  ;;  %v5527_v61 = vld [vmem:[%s6873_s16 + $0x60] ss:$8 sps:$4 sm:$0xff]  }
 0x2db   : > { %1780 = vmatprep.subr.bf16.mxu0 %v5487_v62  ;;  %v5532_v62 = vld [vmem:[%s6873_s16 + $0x74] ss:$8 sps:$4 sm:$0xff]  }
 0x2de   : > { %1781 = vmatpush1.bf16.msra.mxu0 %v5485_v63  ;;  %v5530_v63 = vld [vmem:[%s6873_s16 + $0x70] ss:$8 sps:$4 sm:$0xff]  }
 0x2df   : > { %1782 = vmatprep.subr.bf16.mxu0 %v5490_v0 }
 0x2e2   : > { %1783 = vmatpush1.bf16.msra.mxu0 %v5488_v1  ;;  %v1186_v1 = vsub.s32 3, %v7030_v28 }
 0x2e3   : > { %1784 = vmatprep.subr.bf16.mxu0 %v5493_v2 }
 0x2e4   : > { %v1187_v2 = vrot.slane %v7034_v30, %v1186_v1 }
 0x2e6   : > { %1785 = vmatpush1.bf16.msra.mxu0 %v5491_v4  ;;  %v7116_v4 = vsub.s32 1, %v7030_v28 }
 0x2e7   : > { %1786 = vmatprep.subr.bf16.mxu0 %v5496_v5 }
 0x2ea   : > { %1787 = vmatpush1.bf16.msra.mxu0 %v5494_v6 }
 0x2eb   : > { %1788 = vmatprep.subr.bf16.mxu0 %v5499_v7 }
 0x2ee   : > { %1789 = vmatpush1.bf16.msra.mxu0 %v5497_v8  ;;  %v1179_v8 = vrot.slane %v7034_v30, %v7116_v4 }
 0x2ef   : > { %1790 = vmatprep.subr.bf16.mxu0 %v5502_v9 }
 0x2f2   : > { %1791 = vmatpush1.bf16.msra.mxu0 %v5500_v10 }
 0x2f3   : > { %1792 = vmatprep.subr.bf16.mxu0 %v5505_v11 }
 0x2f6   : > { %1793 = vmatpush1.bf16.msra.mxu0 %v5503_v12 }
 0x2f7   : > { %1794 = vmatprep.subr.bf16.mxu0 %v5508_v13 }
 0x2fa   : > { %1795 = vmatpush1.bf16.msra.mxu0 %v5506_v14 }
 0x2fb   : > { %2246 = vmatprep.subr.bf16.mxu0 %v5511_v49  ;;  %v5539_v49 = vld [vmem:[%s6873_s16 + $0xa0] ss:$8 sps:$4 sm:$0xff]  }
 0x2fd   : > { %1797 = vmatmul.mubr.bf16.vlgmr.msra.gmra.mrb[4].mxu0 %v7023_v25  ;;  %v1191_v25 = vrot.slane %v7034_v30, %v1190_v24 }
 0x2fe   : > { %2247 = vmatpush1.bf16.msra.mxu0 %v5509_v48  ;;  %v5541_v48 = vld [vmem:[%s6873_s16 + $0xa4] ss:$8 sps:$4 sm:$0xff]  }
 0x2ff   : > { %2248 = vmatprep.subr.bf16.mxu0 %v5514_v50  ;;  %v5544_v50 = vld [vmem:[%s6873_s16 + $0xb4] ss:$8 sps:$4 sm:$0xff]  }
 0x302   : > { %2249 = vmatpush1.bf16.msra.mxu0 %v5512_v51  ;;  %v5542_v51 = vld [vmem:[%s6873_s16 + $0xb0] ss:$8 sps:$4 sm:$0xff]  }
 0x303   : > { %2250 = vmatprep.subr.bf16.mxu0 %v5517_v52  ;;  %v5547_v52 = vld [vmem:[%s6873_s16 + $0xc4] ss:$8 sps:$4 sm:$0xff]  }
 0x306   : > { %2251 = vmatpush1.bf16.msra.mxu0 %v5515_v53  ;;  %v5545_v53 = vld [vmem:[%s6873_s16 + $0xc0] ss:$8 sps:$4 sm:$0xff]  }
 0x307   : > { %2252 = vmatprep.subr.bf16.mxu0 %v5520_v54  ;;  %v5550_v54 = vld [vmem:[%s6873_s16 + $0xd4] ss:$8 sps:$4 sm:$0xff]  }
 0x30a   : > { %2253 = vmatpush1.bf16.msra.mxu0 %v5518_v55  ;;  %v5548_v55 = vld [vmem:[%s6873_s16 + $0xd0] ss:$8 sps:$4 sm:$0xff]  }
 0x30b   : > { %2254 = vmatprep.subr.bf16.mxu0 %v5523_v56  ;;  %v5553_v56 = vld [vmem:[%s6873_s16 + $0xe4] ss:$8 sps:$4 sm:$0xff]  }
 0x30e   : > { %2255 = vmatpush1.bf16.msra.mxu0 %v5521_v57  ;;  %v5551_v57 = vld [vmem:[%s6873_s16 + $0xe0] ss:$8 sps:$4 sm:$0xff]  }
 0x30f   : > { %2256 = vmatprep.subr.bf16.mxu0 %v5526_v58  ;;  %v5556_v58 = vld [vmem:[%s6873_s16 + $0xf4] ss:$8 sps:$4 sm:$0xff]  }
 0x312   : > { %2257 = vmatpush1.bf16.msra.mxu0 %v5524_v59  ;;  %v5554_v59 = vld [vmem:[%s6873_s16 + $0xf0] ss:$8 sps:$4 sm:$0xff]  }
 0x313   : > { %2258 = vmatprep.subr.bf16.mxu0 %v5529_v60 }
 0x316   : > { %2259 = vmatpush1.bf16.msra.mxu0 %v5527_v61 }
 0x317   : > { %2260 = vmatprep.subr.bf16.mxu0 %v5532_v62 }
 0x31a   : > { %2261 = vmatpush1.bf16.msra.mxu0 %v5530_v63 }
 0x38f   : > { %v1757_v33 = vpop.f32.mrb[0].mxu1 }
 0x390   : > { %v1758_v35 = vadd.f32 %v1757_v33, %v1183_v32  ;;  %v7044_v36 = vpop.f32.mrb[1].mxu1  ;;  %v1716_v40 = vpop.f32.mrb[0].mxu0  ;;  %v1195_v33 = vrot.slane %v7034_v30, %v1194_v27 }
 0x391   : > { %v1761_v37 = vpop.f32.mrb[2].mxu1  ;;  %v1717_v41 = vadd.f32 %v1716_v40, %v1175_v34  ;;  %v7046_v42 = vpop.f32.mrb[1].mxu0  ;;  %v1760_v6 = vadd.f32 %v7044_v36, %v1187_v2  ;;  %v6238_v36 = vmov 0   ;;  %v2287_v2 = vld [vmem:[%s6881_s24] sm:$0x3] }
 0x392   : > { %v1838_v38 = vpack.c.bf16 %v1758_v35, %v1758_v35  ;;  %v1762_v39 = vpop.f32.mrb[3].mxu1  ;;  %v1720_v43 = vpop.f32.mrb[2].mxu0  ;;  %v1719_v11 = vadd.f32 %v7046_v42, %v1179_v8  ;;  %2278 = vmatprep.mubr.bf16.mxu0 %v6238_v36 }
 0x393   : > { %v1721_v44 = vpop.f32.mrb[3].mxu0  ;;  %v1837_v45 = vpack.c.bf16 %v1717_v41, %v1717_v41  ;;  %v1943_v10 = vpack.c.bf16 %v1760_v6, %v1760_v6 }
 0x394   : > { %5167 = vmatpush3.bf16.xpose.msra.mxu1 %v1838_v38  ;;  %v1942_v12 = vpack.c.bf16 %v1719_v11, %v1719_v11 }
 0x395   : > { %5172 = vmatprep.subr.bf16.mxu1 %v6236_v26 }
 0x39b   : > { %5169 = vmatmul.mubr.bf16.vlgmr.msra.gmra.mrb[4].mxu1 %v1837_v45 }
 0x39c   : > { %5174 = vmatprep.mubr.msk.bf16.mxu1 %vm6237_vm1, %v6236_v26 }
 0x3d0   : > { %v1798_v34 = vpop.f32.mrb[4].mxu0 }
 0x3d1   : > { %v1799_v35 = vadd.f32 %v1798_v34, %v1191_v25  ;;  %v1800_v37 = vpop.f32.mrb[5].mxu0  ;;  %v5535_v34 = vld [vmem:[%s6873_s16 + $0x84] ss:$8 sps:$4 sm:$0xff]  }
 0x3d2   : > { %v1801_v38 = vadd.f32 %v1800_v37, %v1195_v33  ;;  %v1802_v39 = vpop.f32.mrb[6].mxu0 }
 0x3d3   : > { %v1893_v40 = vpack.c.bf16 %v1799_v35, %v1799_v35  ;;  %v1803_v41 = vpop.f32.mrb[7].mxu0 }
 0x3d4   : > { %v1997_v43 = vpack.c.bf16 %v1801_v38, %v1801_v38 }
 0x3d5   : > { %v1899_v44 = vsel %vm1897_vm3, %v1893_v40, 0 }
 0x3d6   : > { %v2002_v45 = vsel %vm1897_vm3, %v1997_v43, 0  ;;  %5173 = vmatpush3.bf16.msra.mxu1 %v1899_v44  ;;  %v5533_v44 = vld [vmem:[%s6873_s16 + $0x80] ss:$8 sps:$4 sm:$0xff]  }
 0x3d7   : > { %5178 = vmatprep.subr.bf16.mxu1 %v6236_v26 }
 0x46e   : > { %v1873_v15 = vpop.f32.mrb[4].mxu1 }
 0x46f   : > { %v1879_v16 = vmul.f32 0.088388346, %v1873_v15  ;;  %v5170_v17 = vpop.f32.mrb[5].mxu1 }
 0x470   : > { %v1876_v18 = vpop.f32.mrb[6].mxu1 }
 0x471   : > { %v5171_v19 = vpop.f32.mrb[7].mxu1  ;;  %v1881_v20 = vsel %vm1880_vm2, %v1879_v16, -inf }
 0x472   : > { %1882 = vmax.xlane.f32.xlu0 %v1881_v20 }
 0x4ff   : > { %v1883_v21 = vpop.xlane.xlu0 %1882 }
 0x500   : > { %v1884_v23 = vsub.f32 %v1879_v16, %v1883_v21 }
 0x502   : > { %v1885_v32 = vmul.f32 1.442695, %v1884_v23 }
 0x504   : > { %5749 = vpow2.f32 %v1885_v32 }
 0x50e   : > { %v5750_v46 = vpop.eup %5749 }
 0x50f   : > { %v1887_v47 = vsel %vm1880_vm2, %v5750_v46, 0.0 }
 0x510   : > { %1888 = vadd.xlane.f32.xlu0 %v1887_v47  ;;  %v5536_v47 = vld [vmem:[%s6873_s16 + $0x90] ss:$8 sps:$4 sm:$0xff]  }
 0x59d   : > { %v1889_v0 = vpop.xlane.xlu0 %1888 }
 0x59e   : > { %5751 = vrcp.f32 %v1889_v0 }
 0x5a8   : > { %v5752_v5 = vpop.eup %5751 }
 0x5a9   : > { %v1891_v7 = vmul.f32 %v5752_v5, %v5750_v46  ;;  %v5538_v46 = vld [vmem:[%s6873_s16 + $0x94] ss:$8 sps:$4 sm:$0xff]   ;;  %v2292_v5 = vrot.slane %v2287_v2, %v7037_v31 }
 0x5ab   : > { %v1892_v9 = vpack.c.bf16 %v1891_v7, %v1891_v7  ;;  %v2296_v7 = vrot.slane %v2287_v2, %v7116_v4 }
 0x5ad   : > { %5175 = vmatmul.mubr.msk.bf16.vlgmr.msra.gmra.mrb[8].mxu1 %vm1880_vm2, %v1892_v9 }
 0x5ae   : > { %5179 = vmatpush3.bf16.xpose.msra.mxu1 %v1943_v10  ;;  %5180 = vmatprep.mubr.msk.bf16.mxu1 %vm6237_vm1, %v6236_v26 }
 0x5af   : > { %5184 = vmatprep.subr.bf16.mxu1 %v6236_v26 }
 0x5b5   : > { %5181 = vmatmul.mubr.bf16.vlgmr.msra.gmra.mrb[12].mxu1 %v1942_v12 }
 0x5b6   : > { %5185 = vmatpush3.bf16.msra.mxu1 %v2002_v45  ;;  %5186 = vmatprep.mubr.msk.bf16.mxu1 %vm6237_vm1, %v6236_v26 }
 0x5b7   : > { %2125 = vmatprep.subr.bf16.mxu1 %v5535_v34 }
 0x680   : > { %v1935_v30 = vpop.f32.mrb[8].mxu1 }
 0x681   : > { %v1941_v13 = vpack.c.bf16 %v1935_v30, %v1935_v30  ;;  %v5176_v14 = vpop.f32.mrb[9].mxu1 }
 0x682   : > { %v1938_v15 = vpop.f32.mrb[10].mxu1 }
 0x683   : > { %v5177_v16 = vpop.f32.mrb[11].mxu1  ;;  %2279 = vmatmul.mubr.bf16.vlgmr.msra.gmra.mrb[8].mxu0 %v1941_v13 }
 0x684   : > { %v2350_v16 = vld [vmem:[%s6897_s11] sm:$0xff] }
 0x688   : > { %v1978_v17 = vpop.f32.mrb[12].mxu1 }
 0x689   : > { %v1984_v18 = vmul.f32 0.088388346, %v1978_v17  ;;  %v5182_v42 = vpop.f32.mrb[13].mxu1  ;;  %v2354_v17 = vld [vmem:[%s6897_s11 + $0x20] sm:$0xff] }
 0x68a   : > { %v1981_v19 = vpop.f32.mrb[14].mxu1  ;;  %v4889_v42 = vcombine.low %v2350_v16, %v2354_v17 }
 0x68b   : > { %v5183_v20 = vpop.f32.mrb[15].mxu1  ;;  %v1985_v21 = vsel %vm1880_vm2, %v1984_v18, -inf  ;;  %v4890_v19 = vcombine.high %v2350_v16, %v2354_v17  ;;  %v2410_v16 = vld [vmem:[%s6897_s11 + $0x1e0] sm:$0xff]  ;;  %v2407_v17 = vld [vmem:[%s6897_s11 + $0x1c8] sm:$0xff] }
 0x68c   : > { %1986 = vmax.xlane.f32.xlu1 %v1985_v21  ;;  %v2355_v20 = vld [vmem:[%s6897_s11 + $0x28] sm:$0xff]  ;;  %v2362_v21 = vld [vmem:[%s6897_s11 + $0x60] sm:$0xff] }
 0x719   : > { %v1987_v23 = vpop.xlane.xlu1 %1986 }
 0x71a   : > { %v1988_v32 = vsub.f32 %v1984_v18, %v1987_v23  ;;  %v2351_v18 = vld [vmem:[%s6897_s11 + $0x8] sm:$0xff] }
 0x71b   : > { %v4891_v23 = vcombine.low %v2351_v18, %v2355_v20 }
 0x71c   : > { %v1989_v26 = vmul.f32 1.442695, %v1988_v32  ;;  %v4892_v32 = vcombine.high %v2351_v18, %v2355_v20  ;;  %v2411_v18 = vld [vmem:[%s6897_s11 + $0x1e8] sm:$0xff] }
 0x71e   : > { %5753 = vpow2.f32 %v1989_v26  ;;  %v2359_v26 = vld [vmem:[%s6897_s11 + $0x48] sm:$0xff]  ;;  %3201 = vmatprep.subr.bf16.mxu0 %v4892_v32 }
 0x71f   : > { %3202 = vmatpush1.bf16.msra.mxu0 %v4891_v23  ;;  %v2418_v23 = vld [vmem:[%s6897_s11 + $0x220] sm:$0xff]  ;;  %v2415_v32 = vld [vmem:[%s6897_s11 + $0x208] sm:$0xff] }
 0x728   : > { %v5754_v25 = vpop.eup %5753 }
 0x729   : > { %v1991_v33 = vsel %vm1880_vm2, %v5754_v25, 0.0 }
 0x72a   : > { %1992 = vadd.xlane.f32.xlu1 %v1991_v33  ;;  %v2366_v33 = vld [vmem:[%s6897_s11 + $0x80] sm:$0xff] }
 0x756   : > { %v2280_v35 = vpop.f32.mrb[8].mxu0 }
 0x757   : > { %v2282_v37 = vpop.f32.mrb[9].mxu0 }
 0x758   : > { %v2284_v38 = vpop.f32.mrb[10].mxu0 }
 0x759   : > { %v2285_v39 = vpop.f32.mrb[11].mxu0  ;;  %v2371_v38 = vld [vmem:[%s6897_s11 + $0xa8] sm:$0xff] }
 0x7b7   : > { %v1993_v40 = vpop.xlane.xlu1 %1992 }
 0x7b8   : > { %5755 = vrcp.f32 %v1993_v40 }
 0x7c2   : > { %v5756_v41 = vpop.eup %5755 }
 0x7c3   : > { %v1995_v43 = vmul.f32 %v5756_v41, %v5754_v25  ;;  %v2363_v25 = vld [vmem:[%s6897_s11 + $0x68] sm:$0xff] }
 0x7c4   : > { %v4900_v34 = vcombine.high %v2359_v26, %v2363_v25  ;;  %v4899_v40 = vcombine.low %v2359_v26, %v2363_v25  ;;  %v4947_v25 = vcombine.low %v2407_v17, %v2411_v18 }
 0x7c5   : > { %v1996_v45 = vpack.c.bf16 %v1995_v43, %v1995_v43 }
 0x7c6   : > { %3203 = vmatprep.subr.bf16.mxu0 %v4900_v34 }
 0x7c7   : > { %5187 = vmatmul.mubr.msk.bf16.vlgmr.msra.gmra.mrb[16].mxu1 %vm1880_vm2, %v1996_v45  ;;  %v2378_v45 = vld [vmem:[%s6897_s11 + $0xe0] sm:$0xff]  ;;  %3204 = vmatpush1.bf16.msra.mxu0 %v4899_v40 }
 0x7c8   : > { %2126 = vmatpush1.bf16.msra.mxu1 %v5533_v44  ;;  %2157 = vmatprep.mubr.bf16.mxu1 %v6238_v36  ;;  %v2374_v44 = vld [vmem:[%s6897_s11 + $0xc0] sm:$0xff] }
 0x7c9   : > { %2127 = vmatprep.subr.bf16.mxu1 %v5538_v46  ;;  %v2375_v46 = vld [vmem:[%s6897_s11 + $0xc8] sm:$0xff] }
 0x7cc   : > { %2128 = vmatpush1.bf16.msra.mxu1 %v5536_v47  ;;  %v2379_v47 = vld [vmem:[%s6897_s11 + $0xe8] sm:$0xff] }
 0x7cd   : > { %2129 = vmatprep.subr.bf16.mxu1 %v5541_v48 }
 0x7d0   : > { %2130 = vmatpush1.bf16.msra.mxu1 %v5539_v49 }
 0x7d1   : > { %2131 = vmatprep.subr.bf16.mxu1 %v5544_v50  ;;  %v4914_v50 = vcombine.high %v2374_v44, %v2378_v45 }
 0x7d4   : > { %2132 = vmatpush1.bf16.msra.mxu1 %v5542_v51  ;;  %v4916_v51 = vcombine.high %v2375_v46, %v2379_v47 }
 0x7d5   : > { %2133 = vmatprep.subr.bf16.mxu1 %v5547_v52  ;;  %v2382_v52 = vld [vmem:[%s6897_s11 + $0x100] sm:$0xff] }
 0x7d8   : > { %2134 = vmatpush1.bf16.msra.mxu1 %v5545_v53  ;;  %v2386_v53 = vld [vmem:[%s6897_s11 + $0x120] sm:$0xff] }
 0x7d9   : > { %2135 = vmatprep.subr.bf16.mxu1 %v5550_v54  ;;  %v2383_v54 = vld [vmem:[%s6897_s11 + $0x108] sm:$0xff] }
 0x7dc   : > { %2136 = vmatpush1.bf16.msra.mxu1 %v5548_v55  ;;  %v2387_v55 = vld [vmem:[%s6897_s11 + $0x128] sm:$0xff] }
 0x7dd   : > { %2137 = vmatprep.subr.bf16.mxu1 %v5553_v56  ;;  %v4913_v56 = vcombine.low %v2374_v44, %v2378_v45  ;;  %v4923_v2 = vcombine.low %v2383_v54, %v2387_v55  ;;  %v2430_v45 = vld [vmem:[%s6897_s11 + $0x280] sm:$0xff] }
 0x7e0   : > { %2138 = vmatpush1.bf16.msra.mxu1 %v5551_v57  ;;  %v4915_v57 = vcombine.low %v2375_v46, %v2379_v47  ;;  %v2434_v46 = vld [vmem:[%s6897_s11 + $0x2a0] sm:$0xff]  ;;  %v2431_v47 = vld [vmem:[%s6897_s11 + $0x288] sm:$0xff] }
 0x7e1   : > { %2139 = vmatprep.subr.bf16.mxu1 %v5556_v58  ;;  %v4922_v58 = vcombine.high %v2382_v52, %v2386_v53 }
 0x7e4   : > { %2140 = vmatpush1.bf16.msra.mxu1 %v5554_v59  ;;  %v4924_v59 = vcombine.high %v2383_v54, %v2387_v55 }
 0x7e5   : > { %3160 = vmatprep.subr.bf16.mxu1 %v4890_v19 }
 0x89a   : > { %v2038_v60 = vpop.f32.mrb[16].mxu1 }
 0x89b   : > { %v2044_v61 = vpack.c.bf16 %v2038_v60, %v2038_v60  ;;  %v5188_v62 = vpop.f32.mrb[17].mxu1  ;;  %v2390_v60 = vld [vmem:[%s6897_s11 + $0x140] sm:$0xff] }
 0x89c   : > { %v2041_v63 = vpop.f32.mrb[18].mxu1  ;;  %v2391_v62 = vld [vmem:[%s6897_s11 + $0x148] sm:$0xff] }
 0x89d   : > { %v5189_v0 = vpop.f32.mrb[19].mxu1  ;;  %2158 = vmatmul.mubr.bf16.vlgmr.msra.gmra.mrb[20].mxu1 %v2044_v61  ;;  %v2394_v61 = vld [vmem:[%s6897_s11 + $0x160] sm:$0xff]  ;;  %v2395_v63 = vld [vmem:[%s6897_s11 + $0x168] sm:$0xff] }
 0x89e   : > { %3161 = vmatpush1.bf16.msra.mxu1 %v4889_v42  ;;  %v4921_v0 = vcombine.low %v2382_v52, %v2386_v53  ;;  %v4969_v53 = vcombine.low %v2430_v45, %v2434_v46 }
 0x970   : > { %v2159_v6 = vpop.f32.mrb[20].mxu1 }
 0x971   : > { %v2281_v8 = vadd.f32 %v2280_v35, %v2159_v6  ;;  %v2161_v9 = vpop.f32.mrb[21].mxu1  ;;  %v2370_v35 = vld [vmem:[%s6897_s11 + $0xa0] sm:$0xff]  ;;  %v4932_v6 = vcombine.high %v2391_v62, %v2395_v63 }
 0x972   : > { %v2283_v10 = vadd.f32 %v2282_v37, %v2161_v9  ;;  %v2163_v11 = vpop.f32.mrb[22].mxu1  ;;  %v2367_v37 = vld [vmem:[%s6897_s11 + $0x88] sm:$0xff]  ;;  %v4906_v41 = vcombine.high %v2366_v33, %v2370_v35  ;;  %v4905_v48 = vcombine.low %v2366_v33, %v2370_v35  ;;  %v2422_v35 = vld [vmem:[%s6897_s11 + $0x240] sm:$0xff] }
 0x973   : > { %v2299_v12 = vadd.f32 %v2292_v5, %v2281_v8  ;;  %v2164_v36 = vpop.f32.mrb[23].mxu1  ;;  %v4908_v43 = vcombine.high %v2367_v37, %v2371_v38  ;;  %v4907_v49 = vcombine.low %v2367_v37, %v2371_v38  ;;  %v4930_v5 = vcombine.high %v2390_v60, %v2394_v61  ;;  %v2402_v8 = vld [vmem:[%s6897_s11 + $0x1a0] sm:$0xff]  ;;  %v2399_v9 = vld [vmem:[%s6897_s11 + $0x188] sm:$0xff] }
 0x974   : > { %v2300_v30 = vadd.f32 %v2296_v7, %v2283_v10  ;;  %v2398_v7 = vld [vmem:[%s6897_s11 + $0x180] sm:$0xff]  ;;  %v2403_v10 = vld [vmem:[%s6897_s11 + $0x1a8] sm:$0xff]  ;;  %v4929_v11 = vcombine.low %v2390_v60, %v2394_v61 }
 0x975   : > { %v7151_v13 = vadd.f32 %v2299_v12, %v7017_v22  ;;  %v2358_v22 = vld [vmem:[%s6897_s11 + $0x40] sm:$0xff]  ;;  %3205 = vmatprep.subr.bf16.mxu0 %v4908_v43  ;;  %v4931_v12 = vcombine.low %v2391_v62, %v2395_v63  ;;  %v4938_v36 = vcombine.high %v2398_v7, %v2402_v8  ;;  %v4937_v42 = vcombine.low %v2398_v7, %v2402_v8  ;;  %v2423_v38 = vld [vmem:[%s6897_s11 + $0x248] sm:$0xff] }
 0x976   : > { %v7154_v14 = vadd.f32 %v2300_v30, %v6996_v3  ;;  %v4898_v3 = vcombine.high %v2358_v22, %v2362_v21  ;;  %v4897_v39 = vcombine.low %v2358_v22, %v2362_v21  ;;  %3206 = vmatpush1.bf16.msra.mxu0 %v4907_v49  ;;  %v4940_v30 = vcombine.high %v2399_v9, %v2403_v10  ;;  %v2414_v21 = vld [vmem:[%s6897_s11 + $0x200] sm:$0xff] }
 0x977   : > { %3207 = vmatprep.subr.bf16.mxu0 %v4916_v51  ;;  %v4939_v19 = vcombine.low %v2399_v9, %v2403_v10  ;;  %v4948_v22 = vcombine.high %v2407_v17, %v2411_v18  ;;  %v4954_v33 = vcombine.high %v2414_v21, %v2418_v23  ;;  %v2426_v37 = vld [vmem:[%s6897_s11 + $0x260] sm:$0xff]  ;;  %v4953_v40 = vcombine.low %v2414_v21, %v2418_v23  ;;  %v2447_v9 = vld [vmem:[%s6897_s11 + $0x308] sm:$0xff] }
 0x978   : > { %v2305_v15 = vadd.f32 %v7154_v14, %v7151_v13  ;;  %3162 = vmatprep.subr.bf16.mxu1 %v4898_v3  ;;  %v2419_v3 = vld [vmem:[%s6897_s11 + $0x228] sm:$0xff]  ;;  %v4962_v43 = vcombine.high %v2422_v35, %v2426_v37  ;;  %v4961_v49 = vcombine.low %v2422_v35, %v2426_v37  ;;  %v4970_v51 = vcombine.high %v2430_v45, %v2434_v46  ;;  %v2438_v62 = vld [vmem:[%s6897_s11 + $0x2c0] sm:$0xff]  ;;  %v2352_v45 = vld [vmem:[%s6897_s11 + $0x10] sm:$0xff] }
 0x979   : > { %3163 = vmatpush1.bf16.msra.mxu1 %v4897_v39  ;;  %v4956_v34 = vcombine.high %v2415_v32, %v2419_v3  ;;  %v2427_v39 = vld [vmem:[%s6897_s11 + $0x268] sm:$0xff]  ;;  %v2442_v63 = vld [vmem:[%s6897_s11 + $0x2e0] sm:$0xff]  ;;  %v2356_v46 = vld [vmem:[%s6897_s11 + $0x30] sm:$0xff] }
 0x97a   : > { %2306 = vadd.xlane.f32.xlu0 %v2305_v15  ;;  %3164 = vmatprep.subr.bf16.mxu1 %v4906_v41  ;;  %v2406_v15 = vld [vmem:[%s6897_s11 + $0x1c0] sm:$0xff]  ;;  %v4955_v41 = vcombine.low %v2415_v32, %v2419_v3  ;;  %v4964_v44 = vcombine.high %v2423_v38, %v2427_v39  ;;  %v2455_v17 = vld [vmem:[%s6897_s11 + $0x348] sm:$0xff] }
 0x97b   : > { %3208 = vmatpush1.bf16.msra.mxu0 %v4915_v57  ;;  %v4946_v20 = vcombine.high %v2406_v15, %v2410_v16  ;;  %v4945_v26 = vcombine.low %v2406_v15, %v2410_v16  ;;  %v2446_v7 = vld [vmem:[%s6897_s11 + $0x300] sm:$0xff]  ;;  %v2463_v32 = vld [vmem:[%s6897_s11 + $0x388] sm:$0xff] }
 0x97c   : > { %3209 = vmatprep.subr.bf16.mxu0 %v4924_v59  ;;  %v2450_v8 = vld [vmem:[%s6897_s11 + $0x320] sm:$0xff] }
 0x97d   : > { %3165 = vmatpush1.bf16.msra.mxu1 %v4905_v48  ;;  %v2435_v48 = vld [vmem:[%s6897_s11 + $0x2a8] sm:$0xff]  ;;  %v4986_v10 = vcombine.high %v2446_v7, %v2450_v8  ;;  %v2454_v15 = vld [vmem:[%s6897_s11 + $0x340] sm:$0xff] }
 0x97e   : > { %3166 = vmatprep.subr.bf16.mxu1 %v4914_v50  ;;  %v4963_v50 = vcombine.low %v2423_v38, %v2427_v39  ;;  %v4972_v52 = vcombine.high %v2431_v47, %v2435_v48  ;;  %v4971_v54 = vcombine.low %v2431_v47, %v2435_v48  ;;  %v2458_v16 = vld [vmem:[%s6897_s11 + $0x360] sm:$0xff]  ;;  %v2471_v38 = vld [vmem:[%s6897_s11 + $0x3c8] sm:$0xff]  ;;  %v2353_v47 = vld [vmem:[%s6897_s11 + $0x18] sm:$0xff]  ;;  %v4894_v48 = vcombine.high %v2352_v45, %v2356_v46 }
 0x97f   : > { %3210 = vmatpush1.bf16.msra.mxu0 %v4923_v2  ;;  %v2443_v2 = vld [vmem:[%s6897_s11 + $0x2e8] sm:$0xff]  ;;  %v4994_v18 = vcombine.high %v2454_v15, %v2458_v16  ;;  %v2462_v21 = vld [vmem:[%s6897_s11 + $0x380] sm:$0xff] }
 0x980   : > { %3211 = vmatprep.subr.bf16.mxu0 %v4932_v6  ;;  %v2466_v23 = vld [vmem:[%s6897_s11 + $0x3a0] sm:$0xff] }
 0x981   : > { %3167 = vmatpush1.bf16.msra.mxu1 %v4913_v56  ;;  %v5002_v3 = vcombine.high %v2462_v21, %v2466_v23  ;;  %v2470_v35 = vld [vmem:[%s6897_s11 + $0x3c0] sm:$0xff] }
 0x982   : > { %3168 = vmatprep.subr.bf16.mxu1 %v4922_v58  ;;  %v2474_v37 = vld [vmem:[%s6897_s11 + $0x3e0] sm:$0xff] }
 0x983   : > { %3212 = vmatpush1.bf16.msra.mxu0 %v4931_v12  ;;  %v4985_v12 = vcombine.low %v2446_v7, %v2450_v8  ;;  %v5010_v39 = vcombine.high %v2470_v35, %v2474_v37  ;;  %v2360_v8 = vld [vmem:[%s6897_s11 + $0x50] sm:$0xff] }
 0x984   : > { %3213 = vmatprep.subr.bf16.mxu0 %v4940_v30 }
 0x985   : > { %3169 = vmatpush1.bf16.msra.mxu1 %v4921_v0  ;;  %v2439_v0 = vld [vmem:[%s6897_s11 + $0x2c8] sm:$0xff] }
 0x986   : > { %3170 = vmatprep.subr.bf16.mxu1 %v4930_v5  ;;  %v4977_v5 = vcombine.low %v2438_v62, %v2442_v63  ;;  %v4980_v6 = vcombine.high %v2439_v0, %v2443_v2 }
 0x987   : > { %3214 = vmatpush1.bf16.msra.mxu0 %v4939_v19  ;;  %v4993_v19 = vcombine.low %v2454_v15, %v2458_v16  ;;  %v2372_v15 = vld [vmem:[%s6897_s11 + $0xb0] sm:$0xff]  ;;  %v2369_v16 = vld [vmem:[%s6897_s11 + $0x98] sm:$0xff] }
 0x988   : > { %3215 = vmatprep.subr.bf16.mxu0 %v4948_v22 }
 0x989   : > { %3171 = vmatpush1.bf16.msra.mxu1 %v4929_v11  ;;  %v2451_v11 = vld [vmem:[%s6897_s11 + $0x328] sm:$0xff] }
 0x98a   : > { %3172 = vmatprep.subr.bf16.mxu1 %v4938_v36  ;;  %v4987_v36 = vcombine.low %v2447_v9, %v2451_v11  ;;  %v4988_v30 = vcombine.high %v2447_v9, %v2451_v11  ;;  %v2364_v9 = vld [vmem:[%s6897_s11 + $0x70] sm:$0xff]  ;;  %v2365_v11 = vld [vmem:[%s6897_s11 + $0x78] sm:$0xff] }
 0x98b   : > { %3216 = vmatpush1.bf16.msra.mxu0 %v4947_v25  ;;  %v5001_v25 = vcombine.low %v2462_v21, %v2466_v23  ;;  %v2380_v21 = vld [vmem:[%s6897_s11 + $0xf0] sm:$0xff]  ;;  %v2377_v23 = vld [vmem:[%s6897_s11 + $0xd8] sm:$0xff] }
 0x98c   : > { %3217 = vmatprep.subr.bf16.mxu0 %v4956_v34 }
 0x98d   : > { %3173 = vmatpush1.bf16.msra.mxu1 %v4937_v42  ;;  %v2459_v42 = vld [vmem:[%s6897_s11 + $0x368] sm:$0xff] }
 0x98e   : > { %3174 = vmatprep.subr.bf16.mxu1 %v4946_v20  ;;  %v4995_v20 = vcombine.low %v2455_v17, %v2459_v42  ;;  %v4996_v22 = vcombine.high %v2455_v17, %v2459_v42  ;;  %v2373_v17 = vld [vmem:[%s6897_s11 + $0xb8] sm:$0xff] }
 0x98f   : > { %3218 = vmatpush1.bf16.msra.mxu0 %v4955_v41  ;;  %v5009_v41 = vcombine.low %v2470_v35, %v2474_v37  ;;  %v2388_v35 = vld [vmem:[%s6897_s11 + $0x130] sm:$0xff]  ;;  %v2385_v37 = vld [vmem:[%s6897_s11 + $0x118] sm:$0xff] }
 0x990   : > { %3219 = vmatprep.subr.bf16.mxu0 %v4964_v44 }
 0x991   : > { %3175 = vmatpush1.bf16.msra.mxu1 %v4945_v26  ;;  %v2467_v26 = vld [vmem:[%s6897_s11 + $0x3a8] sm:$0xff] }
 0x992   : > { %3176 = vmatprep.subr.bf16.mxu1 %v4954_v33  ;;  %v5003_v33 = vcombine.low %v2463_v32, %v2467_v26  ;;  %v5004_v34 = vcombine.high %v2463_v32, %v2467_v26  ;;  %v2381_v32 = vld [vmem:[%s6897_s11 + $0xf8] sm:$0xff]  ;;  %v4911_v26 = vcombine.low %v2369_v16, %v2373_v17 }
 0x993   : > { %3220 = vmatpush1.bf16.msra.mxu0 %v4963_v50  ;;  %v4893_v50 = vcombine.low %v2352_v45, %v2356_v46  ;;  %v2396_v45 = vld [vmem:[%s6897_s11 + $0x170] sm:$0xff]  ;;  %v2393_v46 = vld [vmem:[%s6897_s11 + $0x158] sm:$0xff] }
 0x994   : > { %3221 = vmatprep.subr.bf16.mxu0 %v4972_v52 }
 0x995   : > { %3177 = vmatpush1.bf16.msra.mxu1 %v4953_v40  ;;  %v2475_v40 = vld [vmem:[%s6897_s11 + $0x3e8] sm:$0xff] }
 0x996   : > { %3178 = vmatprep.subr.bf16.mxu1 %v4962_v43  ;;  %v5012_v43 = vcombine.high %v2471_v38, %v2475_v40  ;;  %v5011_v44 = vcombine.low %v2471_v38, %v2475_v40  ;;  %v2389_v38 = vld [vmem:[%s6897_s11 + $0x138] sm:$0xff]  ;;  %v4919_v40 = vcombine.low %v2377_v23, %v2381_v32 }
 0x997   : > { %3222 = vmatpush1.bf16.msra.mxu0 %v4971_v54 }
 0x998   : > { %3223 = vmatprep.subr.bf16.mxu0 %v4980_v6 }
 0x999   : > { %3179 = vmatpush1.bf16.msra.mxu1 %v4961_v49  ;;  %v2357_v49 = vld [vmem:[%s6897_s11 + $0x38] sm:$0xff] }
 0x99a   : > { %3180 = vmatprep.subr.bf16.mxu1 %v4970_v51  ;;  %v4895_v51 = vcombine.low %v2353_v47, %v2357_v49  ;;  %v4896_v52 = vcombine.high %v2353_v47, %v2357_v49  ;;  %v2397_v47 = vld [vmem:[%s6897_s11 + $0x178] sm:$0xff]  ;;  %v4927_v49 = vcombine.low %v2385_v37, %v2389_v38 }
 0x99d   : > { %3181 = vmatpush1.bf16.msra.mxu1 %v4969_v53 }
 0xa07   : > { %v2307_v55 = vpop.xlane.xlu0 %2306 }
 0xa08   : > { %v2309_v56 = vmul.f32 0.00390625, %v2307_v55 }
 0xa0a   : > { %v7203_v57 = vsub.f32 %v7151_v13, %v2309_v56  ;;  %v7206_v58 = vsub.f32 %v7154_v14, %v2309_v56  ;;  %v4978_v13 = vcombine.high %v2438_v62, %v2442_v63  ;;  %v4979_v14 = vcombine.low %v2439_v0, %v2443_v2  ;;  %v2303_v56 = vld [vmem:[%s7729_s3] sm:$0x3] }
 0xa0c   : > { %v2312_v59 = vmul.f32 %v7203_v57, %v7203_v57  ;;  %v2313_v60 = vmul.f32 %v7206_v58, %v7206_v58  ;;  %3182 = vmatprep.subr.bf16.mxu1 %v4978_v13  ;;  %3224 = vmatpush1.bf16.msra.mxu0 %v4979_v14 }
 0xa0d   : > { %3183 = vmatpush1.bf16.msra.mxu1 %v4977_v5  ;;  %3225 = vmatprep.subr.bf16.mxu0 %v4988_v30 }
 0xa0e   : > { %v2314_v61 = vadd.f32 %v2313_v60, %v2312_v59  ;;  %3184 = vmatprep.subr.bf16.mxu1 %v4986_v10  ;;  %v2304_v59 = vld [vmem:[%s7731_s21] sm:$0x3]  ;;  %v2330_v60 = vrot.slane %v2303_v56, %v7116_v4  ;;  %v2361_v10 = vld [vmem:[%s6897_s11 + $0x58] sm:$0xff] }
 0xa0f   : > { %v2343_v13 = vrot.slane %v2304_v59, %v7116_v4  ;;  %v2339_v2 = vrot.slane %v2304_v59, %v7037_v31  ;;  %v4904_v30 = vcombine.high %v2361_v10, %v2365_v11  ;;  %v4903_v42 = vcombine.low %v2361_v10, %v2365_v11  ;;  %v2420_v10 = vld [vmem:[%s6897_s11 + $0x230] sm:$0xff]  ;;  %v2417_v11 = vld [vmem:[%s6897_s11 + $0x218] sm:$0xff] }
 0xa10   : > { %2315 = vadd.xlane.f32.xlu1 %v2314_v61  ;;  %3226 = vmatpush1.bf16.msra.mxu0 %v4987_v36  ;;  %v2326_v61 = vrot.slane %v2303_v56, %v7037_v31  ;;  %v4902_v36 = vcombine.high %v2360_v8, %v2364_v9  ;;  %v4935_v59 = vcombine.low %v2393_v46, %v2397_v47 }
 0xa11   : > { %3185 = vmatpush1.bf16.msra.mxu1 %v4985_v12  ;;  %3227 = vmatprep.subr.bf16.mxu0 %v4996_v22  ;;  %v2368_v12 = vld [vmem:[%s6897_s11 + $0x90] sm:$0xff] }
 0xa12   : > { %3186 = vmatprep.subr.bf16.mxu1 %v4994_v18  ;;  %v4901_v18 = vcombine.low %v2360_v8, %v2364_v9  ;;  %v2376_v22 = vld [vmem:[%s6897_s11 + $0xd0] sm:$0xff] }
 0xa13   : > { %v2416_v9 = vld [vmem:[%s6897_s11 + $0x210] sm:$0xff] }
 0xa14   : > { %3228 = vmatpush1.bf16.msra.mxu0 %v4995_v20  ;;  %v4912_v20 = vcombine.high %v2369_v16, %v2373_v17  ;;  %v2424_v16 = vld [vmem:[%s6897_s11 + $0x250] sm:$0xff] }
 0xa15   : > { %3187 = vmatpush1.bf16.msra.mxu1 %v4993_v19  ;;  %3229 = vmatprep.subr.bf16.mxu0 %v5004_v34  ;;  %v4910_v19 = vcombine.high %v2368_v12, %v2372_v15  ;;  %v2384_v34 = vld [vmem:[%s6897_s11 + $0x110] sm:$0xff] }
 0xa16   : > { %3188 = vmatprep.subr.bf16.mxu1 %v5002_v3  ;;  %v4909_v3 = vcombine.low %v2368_v12, %v2372_v15  ;;  %v2428_v17 = vld [vmem:[%s6897_s11 + $0x270] sm:$0xff] }
 0xa18   : > { %3230 = vmatpush1.bf16.msra.mxu0 %v5003_v33  ;;  %v4920_v33 = vcombine.high %v2377_v23, %v2381_v32  ;;  %v2432_v23 = vld [vmem:[%s6897_s11 + $0x290] sm:$0xff] }
 0xa19   : > { %3189 = vmatpush1.bf16.msra.mxu1 %v5001_v25  ;;  %3231 = vmatprep.subr.bf16.mxu0 %v5012_v43  ;;  %v4918_v25 = vcombine.high %v2376_v22, %v2380_v21  ;;  %v4928_v43 = vcombine.high %v2385_v37, %v2389_v38  ;;  %v2436_v32 = vld [vmem:[%s6897_s11 + $0x2b0] sm:$0xff] }
 0xa1a   : > { %3190 = vmatprep.subr.bf16.mxu1 %v5010_v39  ;;  %v4917_v39 = vcombine.low %v2376_v22, %v2380_v21  ;;  %v4966_v22 = vcombine.high %v2424_v16, %v2428_v17  ;;  %v2440_v37 = vld [vmem:[%s6897_s11 + $0x2d0] sm:$0xff] }
 0xa1b   : > { %v2444_v38 = vld [vmem:[%s6897_s11 + $0x2f0] sm:$0xff] }
 0xa1c   : > { %3232 = vmatpush1.bf16.msra.mxu0 %v5011_v44  ;;  %v2392_v44 = vld [vmem:[%s6897_s11 + $0x150] sm:$0xff] }
 0xa1d   : > { %3191 = vmatpush1.bf16.msra.mxu1 %v5009_v41  ;;  %3283 = vmatprep.subr.bf16.mxu0 %v4896_v52  ;;  %v4926_v41 = vcombine.high %v2384_v34, %v2388_v35  ;;  %v2400_v52 = vld [vmem:[%s6897_s11 + $0x190] sm:$0xff]  ;;  %v4933_v56 = vcombine.low %v2392_v44, %v2396_v45 }
 0xa1e   : > { %3242 = vmatprep.subr.bf16.mxu1 %v4894_v48  ;;  %v4925_v48 = vcombine.low %v2384_v34, %v2388_v35  ;;  %v4974_v34 = vcombine.high %v2432_v23, %v2436_v32 }
 0xa9d   : > { %v2316_v53 = vpop.xlane.xlu1 %2315 }
 0xa9e   : > { %v2317_v54 = vmul.f32 0.00390625, %v2316_v53  ;;  %v2404_v53 = vld [vmem:[%s6897_s11 + $0x1b0] sm:$0xff] }
 0xaa0   : > { %v2318_v55 = vadd.f32 1e-05, %v2317_v54  ;;  %v2401_v54 = vld [vmem:[%s6897_s11 + $0x198] sm:$0xff] }
 0xaa2   : > { %5757 = vrsqrt.f32 %v2318_v55  ;;  %v2405_v55 = vld [vmem:[%s6897_s11 + $0x1b8] sm:$0xff] }
 0xaac   : > { %v5758_v62 = vpop.eup %5757 }
 0xaad   : > { %v2320_v63 = vmul.f32 %v5758_v62, %v7203_v57  ;;  %v2321_v0 = vmul.f32 %v5758_v62, %v7206_v58  ;;  %v2408_v62 = vld [vmem:[%s6897_s11 + $0x1d0] sm:$0xff] }
 0xaaf   : > { %v2334_v5 = vmul.f32 %v2330_v60, %v2321_v0  ;;  %v2333_v14 = vmul.f32 %v2326_v61, %v2320_v63  ;;  %v4942_v60 = vcombine.high %v2400_v52, %v2404_v53  ;;  %v4944_v61 = vcombine.high %v2401_v54, %v2405_v55  ;;  %v2412_v63 = vld [vmem:[%s6897_s11 + $0x1f0] sm:$0xff]  ;;  %v2409_v0 = vld [vmem:[%s6897_s11 + $0x1d8] sm:$0xff] }
 0xab0   : > { %v4949_v12 = vcombine.low %v2408_v62, %v2412_v63 }
 0xab1   : > { %v7248_v6 = vadd.f32 %v2343_v13, %v2334_v5  ;;  %v7250_v7 = vadd.f32 %v2339_v2, %v2333_v14  ;;  %v2413_v13 = vld [vmem:[%s6897_s11 + $0x1f8] sm:$0xff]  ;;  %v4941_v2 = vcombine.low %v2400_v52, %v2404_v53  ;;  %v4943_v5 = vcombine.low %v2401_v54, %v2405_v55  ;;  %v2456_v54 = vld [vmem:[%s6897_s11 + $0x350] sm:$0xff] }
 0xab2   : > { %v4950_v14 = vcombine.high %v2408_v62, %v2412_v63  ;;  %v4952_v8 = vcombine.high %v2409_v0, %v2413_v13  ;;  %v2460_v55 = vld [vmem:[%s6897_s11 + $0x370] sm:$0xff] }
 0xab3   : > { %v2349_v57 = vpack.c.bf16 %v7248_v6, %v7248_v6  ;;  %v7260_v58 = vpack.c.bf16 %v7250_v7, %v7250_v7  ;;  %v4998_v62 = vcombine.high %v2456_v54, %v2460_v55 }
 0xab5   : > { %3192 = vmatprep.mubr.bf16.mxu1 %v2349_v57  ;;  %3233 = vmatprep.mubr.bf16.mxu0 %v2349_v57 }
 0xab6   : > { %3193 = vmatmul.mubr.bf16.vlgmr.msra.gmra.mrb[24].mxu1 %v7260_v58  ;;  %3234 = vmatmul.mubr.bf16.vlgmr.msra.gmra.mrb[12].mxu0 %v7260_v58 }
 0xab7   : > { %3243 = vmatpush1.bf16.msra.mxu1 %v4893_v50  ;;  %3284 = vmatpush1.bf16.msra.mxu0 %v4895_v51  ;;  %v4934_v50 = vcombine.high %v2392_v44, %v2396_v45  ;;  %v4936_v51 = vcombine.high %v2393_v46, %v2397_v47  ;;  %v4982_v44 = vcombine.high %v2440_v37, %v2444_v38  ;;  %v2448_v46 = vld [vmem:[%s6897_s11 + $0x310] sm:$0xff] }
 0xab8   : > { %3274 = vmatprep.mubr.bf16.mxu1 %v2349_v57  ;;  %3315 = vmatprep.mubr.bf16.mxu0 %v2349_v57  ;;  %v2421_v57 = vld [vmem:[%s6897_s11 + $0x238] sm:$0xff]  ;;  %v2452_v47 = vld [vmem:[%s6897_s11 + $0x330] sm:$0xff] }
 0xab9   : > { %3244 = vmatprep.subr.bf16.mxu1 %v4902_v36  ;;  %3285 = vmatprep.subr.bf16.mxu0 %v4904_v30  ;;  %v4951_v36 = vcombine.low %v2409_v0, %v2413_v13  ;;  %v4958_v30 = vcombine.high %v2416_v9, %v2420_v10  ;;  %v4960_v15 = vcombine.high %v2417_v11, %v2421_v57  ;;  %v2464_v0 = vld [vmem:[%s6897_s11 + $0x390] sm:$0xff] }
 0xaba   : > { %v4990_v52 = vcombine.high %v2448_v46, %v2452_v47  ;;  %v2468_v13 = vld [vmem:[%s6897_s11 + $0x3b0] sm:$0xff] }
 0xabb   : > { %3245 = vmatpush1.bf16.msra.mxu1 %v4901_v18  ;;  %3286 = vmatpush1.bf16.msra.mxu0 %v4903_v42  ;;  %v2425_v18 = vld [vmem:[%s6897_s11 + $0x258] sm:$0xff] }
 0xabc   : > { %3246 = vmatprep.subr.bf16.mxu1 %v4910_v19  ;;  %3287 = vmatprep.subr.bf16.mxu0 %v4912_v20  ;;  %v2429_v42 = vld [vmem:[%s6897_s11 + $0x278] sm:$0xff]  ;;  %v4957_v19 = vcombine.low %v2416_v9, %v2420_v10  ;;  %v4959_v20 = vcombine.low %v2417_v11, %v2421_v57  ;;  %v5006_v9 = vcombine.high %v2464_v0, %v2468_v13  ;;  %v2472_v11 = vld [vmem:[%s6897_s11 + $0x3d0] sm:$0xff] }
 0xabd   : > { %v4968_v21 = vcombine.high %v2425_v18, %v2429_v42  ;;  %v2476_v57 = vld [vmem:[%s6897_s11 + $0x3f0] sm:$0xff] }
 0xabf   : > { %3247 = vmatpush1.bf16.msra.mxu1 %v4909_v3  ;;  %3288 = vmatpush1.bf16.msra.mxu0 %v4911_v26  ;;  %v2433_v3 = vld [vmem:[%s6897_s11 + $0x298] sm:$0xff] }
 0xac0   : > { %3248 = vmatprep.subr.bf16.mxu1 %v4918_v25  ;;  %3289 = vmatprep.subr.bf16.mxu0 %v4920_v33  ;;  %v2437_v26 = vld [vmem:[%s6897_s11 + $0x2b8] sm:$0xff]  ;;  %v4965_v25 = vcombine.low %v2424_v16, %v2428_v17  ;;  %v4967_v33 = vcombine.low %v2425_v18, %v2429_v42  ;;  %v5014_v16 = vcombine.high %v2472_v11, %v2476_v57 }
 0xac1   : > { %v4976_v35 = vcombine.high %v2433_v3, %v2437_v26  ;;  %v5013_v18 = vcombine.low %v2472_v11, %v2476_v57  ;;  %v5628_v11 = vld [vmem:[%s7732_s2 + $0x1b4] ss:$8 sps:$4 sm:$0xff]   ;;  %v5623_v57 = vld [vmem:[%s7732_s2 + $0xb0] ss:$8 sps:$4 sm:$0xff]  }
 0xac3   : > { %3249 = vmatpush1.bf16.msra.mxu1 %v4917_v39  ;;  %3290 = vmatpush1.bf16.msra.mxu0 %v4919_v40  ;;  %v2441_v39 = vld [vmem:[%s6897_s11 + $0x2d8] sm:$0xff] }
 0xac4   : > { %3250 = vmatprep.subr.bf16.mxu1 %v4926_v41  ;;  %3291 = vmatprep.subr.bf16.mxu0 %v4928_v43  ;;  %v2445_v40 = vld [vmem:[%s6897_s11 + $0x2f8] sm:$0xff]  ;;  %v4973_v41 = vcombine.low %v2432_v23, %v2436_v32  ;;  %v4975_v43 = vcombine.low %v2433_v3, %v2437_v26 }
 0xac5   : > { %v4984_v45 = vcombine.high %v2441_v39, %v2445_v40  ;;  %v5565_v23 = vld [vmem:[%s7732_s2 + $0x14] ss:$8 sps:$4 sm:$0xff]   ;;  %v5563_v3 = vld [vmem:[%s7732_s2 + $0x10] ss:$8 sps:$4 sm:$0xff]  }
 0xac6   : > { %v5568_v32 = vld [vmem:[%s7732_s2 + $0x114] ss:$8 sps:$4 sm:$0xff]   ;;  %v5566_v26 = vld [vmem:[%s7732_s2 + $0x110] ss:$8 sps:$4 sm:$0xff]  }
 0xac7   : > { %3251 = vmatpush1.bf16.msra.mxu1 %v4925_v48  ;;  %3292 = vmatpush1.bf16.msra.mxu0 %v4927_v49  ;;  %v2449_v48 = vld [vmem:[%s6897_s11 + $0x318] sm:$0xff] }
 0xac8   : > { %3252 = vmatprep.subr.bf16.mxu1 %v4934_v50  ;;  %3293 = vmatprep.subr.bf16.mxu0 %v4936_v51  ;;  %v2453_v49 = vld [vmem:[%s6897_s11 + $0x338] sm:$0xff]  ;;  %v4981_v50 = vcombine.low %v2440_v37, %v2444_v38  ;;  %v4983_v51 = vcombine.low %v2441_v39, %v2445_v40  ;;  %v5583_v40 = vld [vmem:[%s7732_s2 + $0x44] ss:$8 sps:$4 sm:$0xff]  }
 0xac9   : > { %v4992_v53 = vcombine.high %v2449_v48, %v2453_v49  ;;  %v5580_v37 = vld [vmem:[%s7732_s2 + $0x134] ss:$8 sps:$4 sm:$0xff]   ;;  %v5575_v38 = vld [vmem:[%s7732_s2 + $0x30] ss:$8 sps:$4 sm:$0xff]  }
 0xaca   : > { %v5578_v39 = vld [vmem:[%s7732_s2 + $0x130] ss:$8 sps:$4 sm:$0xff]  }
 0xacb   : > { %3253 = vmatpush1.bf16.msra.mxu1 %v4933_v56  ;;  %3294 = vmatpush1.bf16.msra.mxu0 %v4935_v59  ;;  %v2457_v56 = vld [vmem:[%s6897_s11 + $0x358] sm:$0xff] }
 0xacc   : > { %3254 = vmatprep.subr.bf16.mxu1 %v4942_v60  ;;  %3295 = vmatprep.subr.bf16.mxu0 %v4944_v61  ;;  %v2461_v59 = vld [vmem:[%s6897_s11 + $0x378] sm:$0xff]  ;;  %v4989_v60 = vcombine.low %v2448_v46, %v2452_v47  ;;  %v4991_v61 = vcombine.low %v2449_v48, %v2453_v49  ;;  %v5595_v49 = vld [vmem:[%s7732_s2 + $0x64] ss:$8 sps:$4 sm:$0xff]  }
 0xacd   : > { %v5000_v63 = vcombine.high %v2457_v56, %v2461_v59  ;;  %v5592_v46 = vld [vmem:[%s7732_s2 + $0x154] ss:$8 sps:$4 sm:$0xff]   ;;  %v5587_v47 = vld [vmem:[%s7732_s2 + $0x50] ss:$8 sps:$4 sm:$0xff]  }
 0xace   : > { %v5590_v48 = vld [vmem:[%s7732_s2 + $0x150] ss:$8 sps:$4 sm:$0xff]  }
 0xacf   : > { %3255 = vmatpush1.bf16.msra.mxu1 %v4941_v2  ;;  %3296 = vmatpush1.bf16.msra.mxu0 %v4943_v5  ;;  %v2465_v2 = vld [vmem:[%s6897_s11 + $0x398] sm:$0xff] }
 0xad0   : > { %3256 = vmatprep.subr.bf16.mxu1 %v4950_v14  ;;  %3297 = vmatprep.subr.bf16.mxu0 %v4952_v8  ;;  %v2469_v5 = vld [vmem:[%s6897_s11 + $0x3b8] sm:$0xff]  ;;  %v4997_v14 = vcombine.low %v2456_v54, %v2460_v55  ;;  %v4999_v8 = vcombine.low %v2457_v56, %v2461_v59  ;;  %v5607_v59 = vld [vmem:[%s7732_s2 + $0x84] ss:$8 sps:$4 sm:$0xff]  }
 0xad1   : > { %v5008_v10 = vcombine.high %v2465_v2, %v2469_v5  ;;  %v5604_v54 = vld [vmem:[%s7732_s2 + $0x174] ss:$8 sps:$4 sm:$0xff]   ;;  %v5599_v55 = vld [vmem:[%s7732_s2 + $0x70] ss:$8 sps:$4 sm:$0xff]  }
 0xad2   : > { %v5602_v56 = vld [vmem:[%s7732_s2 + $0x170] ss:$8 sps:$4 sm:$0xff]  }
 0xad3   : > { %3257 = vmatpush1.bf16.msra.mxu1 %v4949_v12  ;;  %3298 = vmatpush1.bf16.msra.mxu0 %v4951_v36  ;;  %v2473_v12 = vld [vmem:[%s6897_s11 + $0x3d8] sm:$0xff] }
 0xad4   : > { %3258 = vmatprep.subr.bf16.mxu1 %v4958_v30  ;;  %3299 = vmatprep.subr.bf16.mxu0 %v4960_v15  ;;  %v2477_v36 = vld [vmem:[%s6897_s11 + $0x3f8] sm:$0xff]  ;;  %v5005_v30 = vcombine.low %v2464_v0, %v2468_v13  ;;  %v5007_v15 = vcombine.low %v2465_v2, %v2469_v5  ;;  %v5619_v5 = vld [vmem:[%s7732_s2 + $0xa4] ss:$8 sps:$4 sm:$0xff]  }
 0xad5   : > { %v5016_v17 = vcombine.high %v2473_v12, %v2477_v36  ;;  %v5015_v42 = vcombine.low %v2473_v12, %v2477_v36  ;;  %v5616_v0 = vld [vmem:[%s7732_s2 + $0x194] ss:$8 sps:$4 sm:$0xff]   ;;  %v5611_v13 = vld [vmem:[%s7732_s2 + $0x90] ss:$8 sps:$4 sm:$0xff]   ;;  %v5631_v36 = vld [vmem:[%s7732_s2 + $0xc4] ss:$8 sps:$4 sm:$0xff]  }
 0xad6   : > { %v5614_v2 = vld [vmem:[%s7732_s2 + $0x190] ss:$8 sps:$4 sm:$0xff]  }
 0xad7   : > { %3259 = vmatpush1.bf16.msra.mxu1 %v4957_v19  ;;  %3300 = vmatpush1.bf16.msra.mxu0 %v4959_v20  ;;  %v5559_v19 = vld [vmem:[%s7732_s2 + $0x4] ss:$8 sps:$4 sm:$0xff]   ;;  %v5626_v12 = vld [vmem:[%s7732_s2 + $0x1b0] ss:$8 sps:$4 sm:$0xff]  }
 0xad8   : > { %3260 = vmatprep.subr.bf16.mxu1 %v4966_v22  ;;  %3301 = vmatprep.subr.bf16.mxu0 %v4968_v21  ;;  %v5562_v20 = vld [vmem:[%s7732_s2 + $0x104] ss:$8 sps:$4 sm:$0xff]   ;;  %v5557_v22 = vld [vmem:[%s7732_s2] ss:$8 sps:$4 sm:$0xff]  }
 0xad9   : > { %v5560_v21 = vld [vmem:[%s7732_s2 + $0x100] ss:$8 sps:$4 sm:$0xff]  }
 0xadb   : > { %3261 = vmatpush1.bf16.msra.mxu1 %v4965_v25  ;;  %3302 = vmatpush1.bf16.msra.mxu0 %v4967_v33  ;;  %v5571_v25 = vld [vmem:[%s7732_s2 + $0x24] ss:$8 sps:$4 sm:$0xff]  }
 0xadc   : > { %3262 = vmatprep.subr.bf16.mxu1 %v4974_v34  ;;  %3303 = vmatprep.subr.bf16.mxu0 %v4976_v35  ;;  %v5574_v33 = vld [vmem:[%s7732_s2 + $0x124] ss:$8 sps:$4 sm:$0xff]   ;;  %v5569_v34 = vld [vmem:[%s7732_s2 + $0x20] ss:$8 sps:$4 sm:$0xff]  }
 0xadd   : > { %v5572_v35 = vld [vmem:[%s7732_s2 + $0x120] ss:$8 sps:$4 sm:$0xff]  }
 0xadf   : > { %3263 = vmatpush1.bf16.msra.mxu1 %v4973_v41  ;;  %3304 = vmatpush1.bf16.msra.mxu0 %v4975_v43  ;;  %v5586_v41 = vld [vmem:[%s7732_s2 + $0x144] ss:$8 sps:$4 sm:$0xff]   ;;  %v5581_v43 = vld [vmem:[%s7732_s2 + $0x40] ss:$8 sps:$4 sm:$0xff]  }
 0xae0   : > { %3264 = vmatprep.subr.bf16.mxu1 %v4982_v44  ;;  %3305 = vmatprep.subr.bf16.mxu0 %v4984_v45  ;;  %v5584_v44 = vld [vmem:[%s7732_s2 + $0x140] ss:$8 sps:$4 sm:$0xff]   ;;  %v5589_v45 = vld [vmem:[%s7732_s2 + $0x54] ss:$8 sps:$4 sm:$0xff]  }
 0xae3   : > { %3265 = vmatpush1.bf16.msra.mxu1 %v4981_v50  ;;  %3306 = vmatpush1.bf16.msra.mxu0 %v4983_v51  ;;  %v5598_v50 = vld [vmem:[%s7732_s2 + $0x164] ss:$8 sps:$4 sm:$0xff]   ;;  %v5593_v51 = vld [vmem:[%s7732_s2 + $0x60] ss:$8 sps:$4 sm:$0xff]  }
 0xae4   : > { %3266 = vmatprep.subr.bf16.mxu1 %v4990_v52  ;;  %3307 = vmatprep.subr.bf16.mxu0 %v4992_v53  ;;  %v5596_v52 = vld [vmem:[%s7732_s2 + $0x160] ss:$8 sps:$4 sm:$0xff]   ;;  %v5601_v53 = vld [vmem:[%s7732_s2 + $0x74] ss:$8 sps:$4 sm:$0xff]  }
 0xae7   : > { %3267 = vmatpush1.bf16.msra.mxu1 %v4989_v60  ;;  %3308 = vmatpush1.bf16.msra.mxu0 %v4991_v61  ;;  %v5610_v60 = vld [vmem:[%s7732_s2 + $0x184] ss:$8 sps:$4 sm:$0xff]   ;;  %v5605_v61 = vld [vmem:[%s7732_s2 + $0x80] ss:$8 sps:$4 sm:$0xff]  }
 0xae8   : > { %3268 = vmatprep.subr.bf16.mxu1 %v4998_v62  ;;  %3309 = vmatprep.subr.bf16.mxu0 %v5000_v63  ;;  %v5608_v62 = vld [vmem:[%s7732_s2 + $0x180] ss:$8 sps:$4 sm:$0xff]   ;;  %v5613_v63 = vld [vmem:[%s7732_s2 + $0x94] ss:$8 sps:$4 sm:$0xff]  }
 0xaeb   : > { %3269 = vmatpush1.bf16.msra.mxu1 %v4997_v14  ;;  %3310 = vmatpush1.bf16.msra.mxu0 %v4999_v8  ;;  %v5622_v14 = vld [vmem:[%s7732_s2 + $0x1a4] ss:$8 sps:$4 sm:$0xff]   ;;  %v5617_v8 = vld [vmem:[%s7732_s2 + $0xa0] ss:$8 sps:$4 sm:$0xff]  }
 0xaec   : > { %3270 = vmatprep.subr.bf16.mxu1 %v5006_v9  ;;  %3311 = vmatprep.subr.bf16.mxu0 %v5008_v10  ;;  %v5620_v9 = vld [vmem:[%s7732_s2 + $0x1a0] ss:$8 sps:$4 sm:$0xff]   ;;  %v5625_v10 = vld [vmem:[%s7732_s2 + $0xb4] ss:$8 sps:$4 sm:$0xff]  }
 0xaef   : > { %3271 = vmatpush1.bf16.msra.mxu1 %v5005_v30  ;;  %3312 = vmatpush1.bf16.msra.mxu0 %v5007_v15  ;;  %v5634_v30 = vld [vmem:[%s7732_s2 + $0x1c4] ss:$8 sps:$4 sm:$0xff]   ;;  %v5629_v15 = vld [vmem:[%s7732_s2 + $0xc0] ss:$8 sps:$4 sm:$0xff]  }
 0xaf0   : > { %3272 = vmatprep.subr.bf16.mxu1 %v5014_v16  ;;  %3313 = vmatprep.subr.bf16.mxu0 %v5016_v17  ;;  %v5632_v16 = vld [vmem:[%s7732_s2 + $0x1c0] ss:$8 sps:$4 sm:$0xff]   ;;  %v5637_v17 = vld [vmem:[%s7732_s2 + $0xd4] ss:$8 sps:$4 sm:$0xff]  }
 0xaf3   : > { %3273 = vmatpush1.bf16.msra.mxu1 %v5013_v18  ;;  %3314 = vmatpush1.bf16.msra.mxu0 %v5015_v42  ;;  %v5640_v18 = vld [vmem:[%s7732_s2 + $0x1d4] ss:$8 sps:$4 sm:$0xff]   ;;  %v5635_v42 = vld [vmem:[%s7732_s2 + $0xd0] ss:$8 sps:$4 sm:$0xff]  }
 0xaf4   : > { %4120 = vmatprep.subr.bf16.mxu1 %v5559_v19  ;;  %4161 = vmatprep.subr.bf16.mxu0 %v5562_v20  ;;  %v5638_v19 = vld [vmem:[%s7732_s2 + $0x1d0] ss:$8 sps:$4 sm:$0xff]   ;;  %v5643_v20 = vld [vmem:[%s7732_s2 + $0xe4] ss:$8 sps:$4 sm:$0xff]  }
 0xaf6   : > { %3275 = vmatmul.mubr.bf16.vlgmr.msra.gmra.mrb[28].mxu1 %v7260_v58  ;;  %3316 = vmatmul.mubr.bf16.vlgmr.msra.gmra.mrb[16].mxu0 %v7260_v58  ;;  %v5577_v58 = vld [vmem:[%s7732_s2 + $0x34] ss:$8 sps:$4 sm:$0xff]  }
 0xaf7   : > { %4121 = vmatpush1.bf16.msra.mxu1 %v5557_v22  ;;  %4162 = vmatpush1.bf16.msra.mxu0 %v5560_v21  ;;  %v5646_v22 = vld [vmem:[%s7732_s2 + $0x1e4] ss:$8 sps:$4 sm:$0xff]   ;;  %v5641_v21 = vld [vmem:[%s7732_s2 + $0xe0] ss:$8 sps:$4 sm:$0xff]  }
 0xaf8   : > { %4122 = vmatprep.subr.bf16.mxu1 %v5565_v23  ;;  %4163 = vmatprep.subr.bf16.mxu0 %v5568_v32  ;;  %v5644_v23 = vld [vmem:[%s7732_s2 + $0x1e0] ss:$8 sps:$4 sm:$0xff]   ;;  %v5649_v32 = vld [vmem:[%s7732_s2 + $0xf4] ss:$8 sps:$4 sm:$0xff]  }
 0xafb   : > { %4123 = vmatpush1.bf16.msra.mxu1 %v5563_v3  ;;  %4164 = vmatpush1.bf16.msra.mxu0 %v5566_v26  ;;  %v5652_v3 = vld [vmem:[%s7732_s2 + $0x1f4] ss:$8 sps:$4 sm:$0xff]   ;;  %v5647_v26 = vld [vmem:[%s7732_s2 + $0xf0] ss:$8 sps:$4 sm:$0xff]  }
 0xafc   : > { %4124 = vmatprep.subr.bf16.mxu1 %v5571_v25  ;;  %4165 = vmatprep.subr.bf16.mxu0 %v5574_v33  ;;  %v5650_v25 = vld [vmem:[%s7732_s2 + $0x1f0] ss:$8 sps:$4 sm:$0xff]   ;;  %v5655_v33 = vld [vmem:[%s7732_s2 + $0x204] ss:$8 sps:$4 sm:$0xff]  }
 0xaff   : > { %4125 = vmatpush1.bf16.msra.mxu1 %v5569_v34  ;;  %4166 = vmatpush1.bf16.msra.mxu0 %v5572_v35  ;;  %v5658_v34 = vld [vmem:[%s7732_s2 + $0x304] ss:$8 sps:$4 sm:$0xff]  }
 0xb00   : > { %4126 = vmatprep.subr.bf16.mxu1 %v5577_v58  ;;  %4167 = vmatprep.subr.bf16.mxu0 %v5580_v37  ;;  %v7389_v35 = vld [vmem:[%s6929_s8] sm:$0xff] }
 0xb01   : > { %v2483_v58 = vrot.slane %v7389_v35, %v7037_v31  ;;  %v2491_v37 = vrot.slane %v7389_v35, %v1182_v29 }
 0xb03   : > { %4127 = vmatpush1.bf16.msra.mxu1 %v5575_v38  ;;  %4168 = vmatpush1.bf16.msra.mxu0 %v5578_v39  ;;  %v2487_v38 = vrot.slane %v7389_v35, %v7116_v4  ;;  %v2495_v39 = vrot.slane %v7389_v35, %v1186_v1 }
 0xb04   : > { %4128 = vmatprep.subr.bf16.mxu1 %v5583_v40  ;;  %4169 = vmatprep.subr.bf16.mxu0 %v5586_v41 }
 0xb07   : > { %4129 = vmatpush1.bf16.msra.mxu1 %v5581_v43  ;;  %4170 = vmatpush1.bf16.msra.mxu0 %v5584_v44 }
 0xb08   : > { %4130 = vmatprep.subr.bf16.mxu1 %v5589_v45  ;;  %4171 = vmatprep.subr.bf16.mxu0 %v5592_v46 }
 0xb0b   : > { %4131 = vmatpush1.bf16.msra.mxu1 %v5587_v47  ;;  %4172 = vmatpush1.bf16.msra.mxu0 %v5590_v48 }
 0xb0c   : > { %4132 = vmatprep.subr.bf16.mxu1 %v5595_v49  ;;  %4173 = vmatprep.subr.bf16.mxu0 %v5598_v50 }
 0xb0f   : > { %4133 = vmatpush1.bf16.msra.mxu1 %v5593_v51  ;;  %4174 = vmatpush1.bf16.msra.mxu0 %v5596_v52 }
 0xb10   : > { %4134 = vmatprep.subr.bf16.mxu1 %v5601_v53  ;;  %4175 = vmatprep.subr.bf16.mxu0 %v5604_v54 }
 0xb13   : > { %4135 = vmatpush1.bf16.msra.mxu1 %v5599_v55  ;;  %4176 = vmatpush1.bf16.msra.mxu0 %v5602_v56 }
 0xb14   : > { %4136 = vmatprep.subr.bf16.mxu1 %v5607_v59  ;;  %4177 = vmatprep.subr.bf16.mxu0 %v5610_v60  ;;  %v5653_v59 = vld [vmem:[%s7732_s2 + $0x200] ss:$8 sps:$4 sm:$0xff]  }
 0xb15   : > { %v5656_v60 = vld [vmem:[%s7732_s2 + $0x300] ss:$8 sps:$4 sm:$0xff]  }
 0xb17   : > { %4137 = vmatpush1.bf16.msra.mxu1 %v5605_v61  ;;  %4178 = vmatpush1.bf16.msra.mxu0 %v5608_v62 }
 0xb18   : > { %4138 = vmatprep.subr.bf16.mxu1 %v5613_v63  ;;  %4179 = vmatprep.subr.bf16.mxu0 %v5616_v0  ;;  %v5661_v63 = vld [vmem:[%s7732_s2 + $0x214] ss:$8 sps:$4 sm:$0xff]  }
 0xb19   : > { %v5664_v0 = vld [vmem:[%s7732_s2 + $0x314] ss:$8 sps:$4 sm:$0xff]  }
 0xb1b   : > { %4139 = vmatpush1.bf16.msra.mxu1 %v5611_v13  ;;  %4180 = vmatpush1.bf16.msra.mxu0 %v5614_v2  ;;  %v5659_v13 = vld [vmem:[%s7732_s2 + $0x210] ss:$8 sps:$4 sm:$0xff]  }
 0xb1c   : > { %4140 = vmatprep.subr.bf16.mxu1 %v5619_v5  ;;  %4181 = vmatprep.subr.bf16.mxu0 %v5622_v14  ;;  %v5662_v2 = vld [vmem:[%s7732_s2 + $0x310] ss:$8 sps:$4 sm:$0xff]   ;;  %v5667_v5 = vld [vmem:[%s7732_s2 + $0x224] ss:$8 sps:$4 sm:$0xff]  }
 0xb1d   : > { %v5670_v14 = vld [vmem:[%s7732_s2 + $0x324] ss:$8 sps:$4 sm:$0xff]  }
 0xb1f   : > { %4141 = vmatpush1.bf16.msra.mxu1 %v5617_v8  ;;  %4182 = vmatpush1.bf16.msra.mxu0 %v5620_v9  ;;  %v5665_v8 = vld [vmem:[%s7732_s2 + $0x220] ss:$8 sps:$4 sm:$0xff]  }
 0xb20   : > { %4142 = vmatprep.subr.bf16.mxu1 %v5625_v10  ;;  %4183 = vmatprep.subr.bf16.mxu0 %v5628_v11  ;;  %v5668_v9 = vld [vmem:[%s7732_s2 + $0x320] ss:$8 sps:$4 sm:$0xff]   ;;  %v5673_v10 = vld [vmem:[%s7732_s2 + $0x234] ss:$8 sps:$4 sm:$0xff]  }
 0xb21   : > { %v5676_v11 = vld [vmem:[%s7732_s2 + $0x334] ss:$8 sps:$4 sm:$0xff]  }
 0xb23   : > { %4143 = vmatpush1.bf16.msra.mxu1 %v5623_v57  ;;  %4184 = vmatpush1.bf16.msra.mxu0 %v5626_v12  ;;  %v5671_v57 = vld [vmem:[%s7732_s2 + $0x230] ss:$8 sps:$4 sm:$0xff]  }
 0xb24   : > { %4144 = vmatprep.subr.bf16.mxu1 %v5631_v36  ;;  %4185 = vmatprep.subr.bf16.mxu0 %v5634_v30  ;;  %v5674_v12 = vld [vmem:[%s7732_s2 + $0x330] ss:$8 sps:$4 sm:$0xff]   ;;  %v5679_v36 = vld [vmem:[%s7732_s2 + $0x244] ss:$8 sps:$4 sm:$0xff]  }
 0xb25   : > { %v5682_v30 = vld [vmem:[%s7732_s2 + $0x344] ss:$8 sps:$4 sm:$0xff]  }
 0xb27   : > { %4145 = vmatpush1.bf16.msra.mxu1 %v5629_v15  ;;  %4186 = vmatpush1.bf16.msra.mxu0 %v5632_v16  ;;  %v5677_v15 = vld [vmem:[%s7732_s2 + $0x240] ss:$8 sps:$4 sm:$0xff]  }
 0xb28   : > { %4146 = vmatprep.subr.bf16.mxu1 %v5637_v17  ;;  %4187 = vmatprep.subr.bf16.mxu0 %v5640_v18  ;;  %v5680_v16 = vld [vmem:[%s7732_s2 + $0x340] ss:$8 sps:$4 sm:$0xff]   ;;  %v5685_v17 = vld [vmem:[%s7732_s2 + $0x254] ss:$8 sps:$4 sm:$0xff]  }
 0xb29   : > { %v5688_v18 = vld [vmem:[%s7732_s2 + $0x354] ss:$8 sps:$4 sm:$0xff]  }
 0xb2b   : > { %4147 = vmatpush1.bf16.msra.mxu1 %v5635_v42  ;;  %4188 = vmatpush1.bf16.msra.mxu0 %v5638_v19  ;;  %v5683_v42 = vld [vmem:[%s7732_s2 + $0x250] ss:$8 sps:$4 sm:$0xff]  }
 0xb2c   : > { %4148 = vmatprep.subr.bf16.mxu1 %v5643_v20  ;;  %4189 = vmatprep.subr.bf16.mxu0 %v5646_v22  ;;  %v5686_v19 = vld [vmem:[%s7732_s2 + $0x350] ss:$8 sps:$4 sm:$0xff]   ;;  %v5691_v20 = vld [vmem:[%s7732_s2 + $0x264] ss:$8 sps:$4 sm:$0xff]  }
 0xb2d   : > { %v5694_v22 = vld [vmem:[%s7732_s2 + $0x364] ss:$8 sps:$4 sm:$0xff]  }
 0xb2f   : > { %4149 = vmatpush1.bf16.msra.mxu1 %v5641_v21  ;;  %4190 = vmatpush1.bf16.msra.mxu0 %v5644_v23  ;;  %v5689_v21 = vld [vmem:[%s7732_s2 + $0x260] ss:$8 sps:$4 sm:$0xff]  }
 0xb30   : > { %4150 = vmatprep.subr.bf16.mxu1 %v5649_v32  ;;  %4191 = vmatprep.subr.bf16.mxu0 %v5652_v3  ;;  %v5692_v23 = vld [vmem:[%s7732_s2 + $0x360] ss:$8 sps:$4 sm:$0xff]   ;;  %v5697_v32 = vld [vmem:[%s7732_s2 + $0x274] ss:$8 sps:$4 sm:$0xff]  }
 0xb31   : > { %v5700_v3 = vld [vmem:[%s7732_s2 + $0x374] ss:$8 sps:$4 sm:$0xff]  }
 0xb33   : > { %4151 = vmatpush1.bf16.msra.mxu1 %v5647_v26  ;;  %4192 = vmatpush1.bf16.msra.mxu0 %v5650_v25  ;;  %v5695_v26 = vld [vmem:[%s7732_s2 + $0x270] ss:$8 sps:$4 sm:$0xff]  }
 0xb34   : > { %4202 = vmatprep.subr.bf16.mxu1 %v5655_v33  ;;  %4243 = vmatprep.subr.bf16.mxu0 %v5658_v34  ;;  %v5698_v25 = vld [vmem:[%s7732_s2 + $0x370] ss:$8 sps:$4 sm:$0xff]   ;;  %v5703_v33 = vld [vmem:[%s7732_s2 + $0x284] ss:$8 sps:$4 sm:$0xff]  }
 0xb35   : > { %v5706_v34 = vld [vmem:[%s7732_s2 + $0x384] ss:$8 sps:$4 sm:$0xff]  }
 0xb89   : > { %v3194_v40 = vpop.f32.mrb[24].mxu1  ;;  %v3235_v41 = vpop.f32.mrb[12].mxu0 }
 0xb8a   : > { %v3195_v43 = vadd.f32 %v3194_v40, %v2483_v58  ;;  %v3236_v44 = vadd.f32 %v3235_v41, %v2491_v37  ;;  %v3196_v45 = vpop.f32.mrb[25].mxu1  ;;  %v3237_v46 = vpop.f32.mrb[13].mxu0  ;;  %v5701_v58 = vld [vmem:[%s7732_s2 + $0x280] ss:$8 sps:$4 sm:$0xff]   ;;  %v5707_v40 = vld [vmem:[%s7732_s2 + $0x290] ss:$8 sps:$4 sm:$0xff]  }
 0xb8b   : > { %v3197_v47 = vadd.f32 %v3196_v45, %v2487_v38  ;;  %v3238_v48 = vadd.f32 %v3237_v46, %v2495_v39  ;;  %v3198_v29 = vpop.f32.mrb[26].mxu1  ;;  %v3239_v49 = vpop.f32.mrb[14].mxu0  ;;  %v5704_v37 = vld [vmem:[%s7732_s2 + $0x380] ss:$8 sps:$4 sm:$0xff]   ;;  %v5709_v38 = vld [vmem:[%s7732_s2 + $0x294] ss:$8 sps:$4 sm:$0xff]  }
 0xb8c   : > { %v3324_v50 = vmax.f32 %v3195_v43, 0.0  ;;  %v3326_v51 = vmax.f32 %v3236_v44, 0.0  ;;  %v3199_v52 = vpop.f32.mrb[27].mxu1  ;;  %v3240_v53 = vpop.f32.mrb[15].mxu0  ;;  %v5712_v39 = vld [vmem:[%s7732_s2 + $0x394] ss:$8 sps:$4 sm:$0xff]  }
 0xb8d   : > { %v3325_v54 = vmax.f32 %v3197_v47, 0.0  ;;  %v3327_v1 = vmax.f32 %v3238_v48, 0.0  ;;  %v5710_v41 = vld [vmem:[%s7732_s2 + $0x390] ss:$8 sps:$4 sm:$0xff]   ;;  %v5715_v43 = vld [vmem:[%s7732_s2 + $0x2a4] ss:$8 sps:$4 sm:$0xff]  }
 0xb8e   : > { %v3332_v61 = vpack.c.bf16 %v3324_v50, %v3324_v50  ;;  %v3334_v62 = vpack.c.bf16 %v3326_v51, %v3326_v51  ;;  %v5718_v44 = vld [vmem:[%s7732_s2 + $0x3a4] ss:$8 sps:$4 sm:$0xff]   ;;  %v5713_v45 = vld [vmem:[%s7732_s2 + $0x2a0] ss:$8 sps:$4 sm:$0xff]   ;;  %v5721_v47 = vld [vmem:[%s7732_s2 + $0x2b4] ss:$8 sps:$4 sm:$0xff]  }
 0xb8f   : > { %v3333_v55 = vpack.c.bf16 %v3325_v54, %v3325_v54  ;;  %v3335_v56 = vpack.c.bf16 %v3327_v1, %v3327_v1  ;;  %v5716_v46 = vld [vmem:[%s7732_s2 + $0x3a0] ss:$8 sps:$4 sm:$0xff]   ;;  %v5724_v48 = vld [vmem:[%s7732_s2 + $0x3b4] ss:$8 sps:$4 sm:$0xff]   ;;  %v5719_v29 = vld [vmem:[%s7732_s2 + $0x2b0] ss:$8 sps:$4 sm:$0xff]  }
 0xb90   : > { %v5722_v49 = vld [vmem:[%s7732_s2 + $0x3b0] ss:$8 sps:$4 sm:$0xff]   ;;  %v5727_v50 = vld [vmem:[%s7732_s2 + $0x2c4] ss:$8 sps:$4 sm:$0xff]   ;;  %v5725_v52 = vld [vmem:[%s7732_s2 + $0x2c0] ss:$8 sps:$4 sm:$0xff]  }
 0xb91   : > { %4152 = vmatprep.mubr.bf16.mxu1 %v3333_v55  ;;  %4193 = vmatprep.mubr.bf16.mxu0 %v3335_v56  ;;  %v5730_v51 = vld [vmem:[%s7732_s2 + $0x3c4] ss:$8 sps:$4 sm:$0xff]   ;;  %v5728_v53 = vld [vmem:[%s7732_s2 + $0x3c0] ss:$8 sps:$4 sm:$0xff]   ;;  %v5733_v54 = vld [vmem:[%s7732_s2 + $0x2d4] ss:$8 sps:$4 sm:$0xff]  }
 0xb92   : > { %4153 = vmatmul.mubr.bf16.vlgmr.msra.gmra.mrb[32].mxu1 %v3332_v61  ;;  %4194 = vmatmul.mubr.bf16.vlgmr.msra.gmra.mrb[20].mxu0 %v3334_v62  ;;  %v5736_v1 = vld [vmem:[%s7732_s2 + $0x3d4] ss:$8 sps:$4 sm:$0xff]   ;;  %v2506_v55 = vsub.s32 6, %v7030_v28  ;;  %v5731_v56 = vld [vmem:[%s7732_s2 + $0x2d0] ss:$8 sps:$4 sm:$0xff]  }
 0xb93   : > { %4203 = vmatpush1.bf16.msra.mxu1 %v5653_v59  ;;  %4244 = vmatpush1.bf16.msra.mxu0 %v5656_v60  ;;  %v5734_v59 = vld [vmem:[%s7732_s2 + $0x3d0] ss:$8 sps:$4 sm:$0xff]   ;;  %v2510_v60 = vsub.s32 7, %v7030_v28  ;;  %v5739_v61 = vld [vmem:[%s7732_s2 + $0x2e4] ss:$8 sps:$4 sm:$0xff]  }
 0xb94   : > { %4204 = vmatprep.subr.bf16.mxu1 %v5661_v63  ;;  %4245 = vmatprep.subr.bf16.mxu0 %v5664_v0  ;;  %v5742_v62 = vld [vmem:[%s7732_s2 + $0x3e4] ss:$8 sps:$4 sm:$0xff]   ;;  %v2499_v63 = vrot.slane %v7389_v35, %v1190_v24  ;;  %v2507_v0 = vrot.slane %v7389_v35, %v2506_v55 }
 0xb97   : > { %4205 = vmatpush1.bf16.msra.mxu1 %v5659_v13  ;;  %4246 = vmatpush1.bf16.msra.mxu0 %v5662_v2  ;;  %v2503_v13 = vrot.slane %v7389_v35, %v1194_v27  ;;  %v2511_v2 = vrot.slane %v7389_v35, %v2510_v60  ;;  %v5743_v35 = vld [vmem:[%s7732_s2 + $0x2f0] ss:$8 sps:$4 sm:$0xff]  }
 0xb98   : > { %4206 = vmatprep.subr.bf16.mxu1 %v5667_v5  ;;  %4247 = vmatprep.subr.bf16.mxu0 %v5670_v14  ;;  %v5737_v5 = vld [vmem:[%s7732_s2 + $0x2e0] ss:$8 sps:$4 sm:$0xff]  }
 0xb99   : > { %v5740_v14 = vld [vmem:[%s7732_s2 + $0x3e0] ss:$8 sps:$4 sm:$0xff]  }
 0xb9b   : > { %4207 = vmatpush1.bf16.msra.mxu1 %v5665_v8  ;;  %4248 = vmatpush1.bf16.msra.mxu0 %v5668_v9  ;;  %v5745_v8 = vld [vmem:[%s7732_s2 + $0x2f4] ss:$8 sps:$4 sm:$0xff]  }
 0xb9c   : > { %4208 = vmatprep.subr.bf16.mxu1 %v5673_v10  ;;  %4249 = vmatprep.subr.bf16.mxu0 %v5676_v11  ;;  %v5748_v9 = vld [vmem:[%s7732_s2 + $0x3f4] ss:$8 sps:$4 sm:$0xff]  }
 0xb9f   : > { %4209 = vmatpush1.bf16.msra.mxu1 %v5671_v57  ;;  %4250 = vmatpush1.bf16.msra.mxu0 %v5674_v12 }
 0xba0   : > { %4210 = vmatprep.subr.bf16.mxu1 %v5679_v36  ;;  %4251 = vmatprep.subr.bf16.mxu0 %v5682_v30 }
 0xba3   : > { %4211 = vmatpush1.bf16.msra.mxu1 %v5677_v15  ;;  %4252 = vmatpush1.bf16.msra.mxu0 %v5680_v16  ;;  %v5746_v16 = vld [vmem:[%s7732_s2 + $0x3f0] ss:$8 sps:$4 sm:$0xff]  }
 0xba4   : > { %4212 = vmatprep.subr.bf16.mxu1 %v5685_v17  ;;  %4253 = vmatprep.subr.bf16.mxu0 %v5688_v18 }
 0xba7   : > { %4213 = vmatpush1.bf16.msra.mxu1 %v5683_v42  ;;  %4254 = vmatpush1.bf16.msra.mxu0 %v5686_v19 }
 0xba8   : > { %4214 = vmatprep.subr.bf16.mxu1 %v5691_v20  ;;  %4255 = vmatprep.subr.bf16.mxu0 %v5694_v22 }
 0xbab   : > { %4215 = vmatpush1.bf16.msra.mxu1 %v5689_v21  ;;  %4256 = vmatpush1.bf16.msra.mxu0 %v5692_v23 }
 0xbac   : > { %4216 = vmatprep.subr.bf16.mxu1 %v5697_v32  ;;  %4257 = vmatprep.subr.bf16.mxu0 %v5700_v3 }
 0xbaf   : > { %4217 = vmatpush1.bf16.msra.mxu1 %v5695_v26  ;;  %4258 = vmatpush1.bf16.msra.mxu0 %v5698_v25  ;;  %v3468_v26 = vld [vmem:[%s979_s0] sm:$0x3] }
 0xbb0   : > { %4218 = vmatprep.subr.bf16.mxu1 %v5703_v33  ;;  %4259 = vmatprep.subr.bf16.mxu0 %v5706_v34  ;;  %v3473_v25 = vrot.slane %v3468_v26, %v7037_v31  ;;  %v3477_v33 = vrot.slane %v3468_v26, %v7116_v4 }
 0xbb3   : > { %4219 = vmatpush1.bf16.msra.mxu1 %v5701_v58  ;;  %4260 = vmatpush1.bf16.msra.mxu0 %v5704_v37 }
 0xbb4   : > { %4220 = vmatprep.subr.bf16.mxu1 %v5709_v38  ;;  %4261 = vmatprep.subr.bf16.mxu0 %v5712_v39 }
 0xbb7   : > { %4221 = vmatpush1.bf16.msra.mxu1 %v5707_v40  ;;  %4262 = vmatpush1.bf16.msra.mxu0 %v5710_v41 }
 0xbb8   : > { %4222 = vmatprep.subr.bf16.mxu1 %v5715_v43  ;;  %4263 = vmatprep.subr.bf16.mxu0 %v5718_v44 }
 0xbbb   : > { %4223 = vmatpush1.bf16.msra.mxu1 %v5713_v45  ;;  %4264 = vmatpush1.bf16.msra.mxu0 %v5716_v46 }
 0xbbc   : > { %4224 = vmatprep.subr.bf16.mxu1 %v5721_v47  ;;  %4265 = vmatprep.subr.bf16.mxu0 %v5724_v48 }
 0xbbf   : > { %4225 = vmatpush1.bf16.msra.mxu1 %v5719_v29  ;;  %4266 = vmatpush1.bf16.msra.mxu0 %v5722_v49 }
 0xbc0   : > { %4226 = vmatprep.subr.bf16.mxu1 %v5727_v50  ;;  %4267 = vmatprep.subr.bf16.mxu0 %v5730_v51 }
 0xbc3   : > { %4227 = vmatpush1.bf16.msra.mxu1 %v5725_v52  ;;  %4268 = vmatpush1.bf16.msra.mxu0 %v5728_v53 }
 0xbc4   : > { %4228 = vmatprep.subr.bf16.mxu1 %v5733_v54  ;;  %4269 = vmatprep.subr.bf16.mxu0 %v5736_v1 }
 0xbc7   : > { %4229 = vmatpush1.bf16.msra.mxu1 %v5731_v56  ;;  %4270 = vmatpush1.bf16.msra.mxu0 %v5734_v59 }
 0xbc8   : > { %4230 = vmatprep.subr.bf16.mxu1 %v5739_v61  ;;  %4271 = vmatprep.subr.bf16.mxu0 %v5742_v62 }
 0xbc9   : > { %v3276_v10 = vpop.f32.mrb[28].mxu1  ;;  %v3317_v24 = vpop.f32.mrb[16].mxu0 }
 0xbca   : > { %v3277_v11 = vadd.f32 %v3276_v10, %v2499_v63  ;;  %v3318_v57 = vadd.f32 %v3317_v24, %v2507_v0  ;;  %v3278_v12 = vpop.f32.mrb[29].mxu1  ;;  %v3319_v36 = vpop.f32.mrb[17].mxu0 }
 0xbcb   : > { %v3279_v30 = vadd.f32 %v3278_v12, %v2503_v13  ;;  %v3320_v28 = vadd.f32 %v3319_v36, %v2511_v2  ;;  %v3280_v15 = vpop.f32.mrb[30].mxu1  ;;  %v3321_v27 = vpop.f32.mrb[18].mxu0  ;;  %4231 = vmatpush1.bf16.msra.mxu1 %v5737_v5  ;;  %4272 = vmatpush1.bf16.msra.mxu0 %v5740_v14 }
 0xbcc   : > { %v3328_v17 = vmax.f32 %v3277_v11, 0.0  ;;  %v3330_v18 = vmax.f32 %v3318_v57, 0.0  ;;  %v3281_v42 = vpop.f32.mrb[31].mxu1  ;;  %v3322_v19 = vpop.f32.mrb[19].mxu0  ;;  %4232 = vmatprep.subr.bf16.mxu1 %v5745_v8  ;;  %4273 = vmatprep.subr.bf16.mxu0 %v5748_v9 }
 0xbcd   : > { %v3329_v20 = vmax.f32 %v3279_v30, 0.0  ;;  %v3331_v22 = vmax.f32 %v3320_v28, 0.0 }
 0xbce   : > { %v3336_v32 = vpack.c.bf16 %v3328_v17, %v3328_v17  ;;  %v3338_v3 = vpack.c.bf16 %v3330_v18, %v3330_v18 }
 0xbcf   : > { %v3337_v21 = vpack.c.bf16 %v3329_v20, %v3329_v20  ;;  %v3339_v23 = vpack.c.bf16 %v3331_v22, %v3331_v22  ;;  %4233 = vmatpush1.bf16.msra.mxu1 %v5743_v35  ;;  %4274 = vmatpush1.bf16.msra.mxu0 %v5746_v16 }
 0xbd1   : > { %4234 = vmatprep.mubr.bf16.mxu1 %v3337_v21  ;;  %4275 = vmatprep.mubr.bf16.mxu0 %v3339_v23 }
 0xbd2   : > { %4235 = vmatmul.mubr.bf16.vlgmr.msra.gmra.mrb[36].mxu1 %v3336_v32  ;;  %4276 = vmatmul.mubr.bf16.vlgmr.msra.gmra.mrb[24].mxu0 %v3338_v3 }
 0xc65   : > { %v4154_v34 = vpop.f32.mrb[32].mxu1  ;;  %v4195_v58 = vpop.f32.mrb[20].mxu0 }
 0xc66   : > { %v4155_v37 = vadd.f32 %v4154_v34, %v3473_v25  ;;  %v4156_v38 = vpop.f32.mrb[33].mxu1  ;;  %v4197_v39 = vpop.f32.mrb[21].mxu0 }
 0xc67   : > { %v4157_v40 = vadd.f32 %v4156_v38, %v3477_v33  ;;  %v4158_v41 = vpop.f32.mrb[34].mxu1  ;;  %v4199_v43 = vpop.f32.mrb[22].mxu0 }
 0xc68   : > { %v4196_v44 = vadd.f32 %v4195_v58, %v4155_v37  ;;  %v4159_v45 = vpop.f32.mrb[35].mxu1  ;;  %v4200_v46 = vpop.f32.mrb[23].mxu0 }
 0xc69   : > { %v4198_v47 = vadd.f32 %v4197_v39, %v4157_v40 }
 0xca5   : > { %v4236_v48 = vpop.f32.mrb[36].mxu1  ;;  %v4277_v29 = vpop.f32.mrb[24].mxu0 }
 0xca6   : > { %v4237_v49 = vadd.f32 %v4236_v48, %v4196_v44  ;;  %v4238_v50 = vpop.f32.mrb[37].mxu1  ;;  %v4279_v51 = vpop.f32.mrb[25].mxu0 }
 0xca7   : > { %v4239_v52 = vadd.f32 %v4238_v50, %v4198_v47  ;;  %v4240_v53 = vpop.f32.mrb[38].mxu1  ;;  %v4281_v54 = vpop.f32.mrb[26].mxu0 }
 0xca8   : > { %v4278_v1 = vadd.f32 %v4277_v29, %v4237_v49  ;;  %v4241_v55 = vpop.f32.mrb[39].mxu1  ;;  %v4282_v56 = vpop.f32.mrb[27].mxu0 }
 0xca9   : > { %v4280_v59 = vadd.f32 %v4279_v51, %v4239_v52 }
 0xcaa   : > { %v4284_v60 = vadd.f32 %v4278_v1, %v7250_v7  ;;  %v4287_v7 = vld [vmem:[%s987_s6] sm:$0x3] }
 0xcab   : > { %v4285_v61 = vadd.f32 %v4280_v59, %v7248_v6  ;;  %v4286_v6 = vld [vmem:[%s983_s4] sm:$0x3]  ;;  %v4321_v36 = vrot.slane %v4287_v7, %v7037_v31  ;;  %v4325_v30 = vrot.slane %v4287_v7, %v7116_v4  ;;  %s7736_s4 = sld [smem:[#allocation34_spill]] }
 0xcac   : > { %v4308_v11 = vrot.slane %v4286_v6, %v7037_v31  ;;  %v4312_v57 = vrot.slane %v4286_v6, %v7116_v4 }
 0xcad   : > { %v4288_v62 = vadd.f32 %v4285_v61, %v4284_v60 }
 0xcaf   : > { %4289 = vadd.xlane.f32.xlu0 %v4288_v62 }
 0xcb1   : > { %p5145_p6 = scmp.ne.s32.totalorder %s7736_s4, 1 }
 0xcb2   : > { %s7737_s14 = sld [smem:[#allocation64_spill]] (!%p5145_p6)  ;;  %s7738_s23 = sld [smem:[#allocation65_spill]] (!%p5145_p6) }
 0xcb8   : > { %v4336_v33 = vld [vmem:[%s7737_s14] sm:$0x3] (!%p5145_p6) }
 0xcb9   : > { %v4337_v34 = vld [vmem:[%s7738_s23] sm:$0x3] (!%p5145_p6)  ;;  %v4358_v58 = vrot.slane (!%p5145_p6), %v4336_v33, %v7037_v31  ;;  %v4362_v37 = vrot.slane (!%p5145_p6), %v4336_v33, %v7116_v4 }
 0xcba   : > { %v4371_v41 = vrot.slane (!%p5145_p6), %v4337_v34, %v7037_v31  ;;  %v4375_v43 = vrot.slane (!%p5145_p6), %v4337_v34, %v7116_v4 }
 0xd3c   : > { %v4290_v63 = vpop.xlane.xlu0 %4289 }
 0xd3d   : > { %v4291_v0 = vmul.f32 0.00390625, %v4290_v63 }
 0xd3f   : > { %v4292_v13 = vsub.f32 %v4284_v60, %v4291_v0  ;;  %v4293_v2 = vsub.f32 %v4285_v61, %v4291_v0 }
 0xd41   : > { %v4294_v5 = vmul.f32 %v4292_v13, %v4292_v13  ;;  %v4295_v14 = vmul.f32 %v4293_v2, %v4293_v2 }
 0xd43   : > { %v4296_v8 = vadd.f32 %v4295_v14, %v4294_v5 }
 0xd45   : > { %4297 = vadd.xlane.f32.xlu1 %v4296_v8 }
 0xdd2   : > { %v4298_v9 = vpop.xlane.xlu1 %4297 }
 0xdd3   : > { %v4299_v10 = vmul.f32 0.00390625, %v4298_v9 }
 0xdd5   : > { %v4300_v24 = vadd.f32 1e-05, %v4299_v10 }
 0xdd7   : > { %5759 = vrsqrt.f32 %v4300_v24 }
 0xde1   : > { %v5760_v12 = vpop.eup %5759 }
 0xde2   : > { %v4302_v28 = vmul.f32 %v5760_v12, %v4292_v13  ;;  %v4303_v15 = vmul.f32 %v5760_v12, %v4293_v2  ;;  %4335 = sbr.rel (%p5145_p6) target bundleno = 3876 (0xf24), region = 140 }
 0xde4   : > { %v4315_v27 = vmul.f32 %v4308_v11, %v4302_v28  ;;  %v4316_v35 = vmul.f32 %v4312_v57, %v4303_v15 }
 0xde6   : > { %v4328_v16 = vadd.f32 %v4321_v36, %v4315_v27  ;;  %v4329_v17 = vadd.f32 %v4325_v30, %v4316_v35 }
 0xde8   : > { %4330 = vst [vmem:[#allocation2] sm:$0xff] %v4328_v16  ;;  %4331 = vst [vmem:[#allocation2 + $0x8] sm:$0xff] %v4329_v17  ;;  %v4338_v18 = vadd.f32 (!%p5145_p6), %v4329_v17, %v4328_v16 }
 0xdea   : > { %4339 = vadd.xlane.f32.xlu0 %v4338_v18 }
 0xe77   : > { %v4340_v42 = vpop.xlane.xlu0 %4339 }
 0xe78   : > { %v4341_v19 = vmul.f32 0.00390625, %v4340_v42 }
 0xe7a   : > { %v4342_v20 = vsub.f32 %v4328_v16, %v4341_v19  ;;  %v4343_v22 = vsub.f32 %v4329_v17, %v4341_v19 }
 0xe7c   : > { %v4344_v21 = vmul.f32 %v4342_v20, %v4342_v20  ;;  %v4345_v23 = vmul.f32 %v4343_v22, %v4343_v22 }
 0xe7e   : > { %v4346_v32 = vadd.f32 %v4345_v23, %v4344_v21 }
 0xe80   : > { %4347 = vadd.xlane.f32.xlu0 %v4346_v32 }
 0xf0d   : > { %v4348_v3 = vpop.xlane.xlu0 %4347 }
 0xf0e   : > { %v4349_v26 = vmul.f32 0.00390625, %v4348_v3 }
 0xf10   : > { %v4350_v25 = vadd.f32 1e-05, %v4349_v26 }
 0xf12   : > { %5761 = vrsqrt.f32 %v4350_v25 }
 0xf1c   : > { %v5762_v38 = vpop.eup %5761 }
 0xf1d   : > { %v4352_v39 = vmul.f32 %v5762_v38, %v4342_v20  ;;  %v4353_v40 = vmul.f32 %v5762_v38, %v4343_v22 }
 0xf1f   : > { %v4365_v44 = vmul.f32 %v4358_v58, %v4352_v39  ;;  %v4366_v45 = vmul.f32 %v4362_v37, %v4353_v40 }
 0xf21   : > { %v4378_v46 = vadd.f32 %v4371_v41, %v4365_v44  ;;  %v4379_v47 = vadd.f32 %v4375_v43, %v4366_v45 }
 0xf23   : > { %4380 = vst [vmem:[%s6945_s9] sm:$0xff] %v4378_v46  ;;  %4381 = vst [vmem:[%s6945_s9 + $0x8] sm:$0xff] %v4379_v47 }
 0xf24 PF: > { %s7739_s25 = sld [smem:[#allocation35_spill]]  ;;  %s7740_s28 = sld [smem:[#allocation44_spill]] }
 0xf25   : > { %s7741_s22 = sld [smem:[#allocation66_spill]]  ;;  %s4397_s7 = sshll.u32 %s6945_s9, 4  ;;  %s4398_s7 = int_to_ptr.vmem [resolvable:$true] %s4397_s7 }
 0xf26   : > { %s4383_s10 = scalar_lea.sflag [#allocation5], %s6830_s18  ;;  %s6059_s12 = scalar_lea.vmem %s4398_s7, 256 }
 0xf27   : > { %p6060_p13 = scmp.ne.s32.totalorder %s4398_s7, %s6059_s12  ;;  %s6239_s21 = smov [#allocation17]  }
 0xf28   : > { %s6063_s2 = sshll.u32 %s6239_s21, 4  ;;  %s6064_s2 = int_to_ptr.vmem [resolvable:$false] %s6063_s2 }
 0xf29   : > { %s6065_s8 = scalar_lea.vmem %s6064_s2, 512  ;;  %p6066_p3 = scmp.lt.s32.totalorder %s4398_s7, %s6064_s2 }
 0xf2a   : > { %s5157_s1 = sshll.u32 %s7739_s25, 8  ;;  %p7743_p1 = scmp.ne.s32.totalorder %s7740_s28, 0 }
 0xf2b   : > { %s7742_s13 = smov %s7741_s22  ;;  %s7513_s3 = scalar_lea.hbm %s7741_s22, %s5157_s1 }
 0xf2c   : > { %p6061_p8 = pnand %p6060_p13, %p7743_p1  ;;  %p6067_p9 = scmp.lt.s32.totalorder %s6065_s8, %s6059_s12 }
 0xf2e   : > { %p6062_p5 = pneg %p6061_p8  ;;  %p6068_p11 = por %p6067_p9, %p6066_p3 }
 0xf30   : > { %p6069_p7 = pnand %p6068_p11, %p6062_p5 }
 0xf32   : > { %6072 = shalt.err (!%p6069_p7)
}
 0xf33   : > { %s6073_s18 = scalar_lea.hbm %s7513_s3, 256  ;;  %s6077_s19 = scalar_lea.hbm %s7742_s13, 512 }
 0xf34   : > { %p6074_p12 = scmp.ne.s32.totalorder %s7513_s3, %s6073_s18  ;;  %p6078_p4 = scmp.lt.u32.totalorder %s7513_s3, %s7742_s13 }
 0xf35   : > { %p6079_p10 = scmp.lt.u32.totalorder %s6077_s19, %s6073_s18  ;;  %p6081_p13 = scmp.lt.u32.totalorder %s6073_s18, %s7513_s3 }
 0xf36   : > { %p6075_p2 = pnand %p6074_p12, %p7743_p1 }
 0xf37   : > { %p6080_p6 = por %p6079_p10, %p6078_p4 }
 0xf38   : > { %p6076_p0 = pneg %p6075_p2 }
 0xf39   : > { %p6082_p8 = por %p6081_p13, %p6080_p6 }
 0xf3b   : > { %p6083_p5 = pnand %p6082_p8, %p6076_p0 }
 0xf3d   : > { %6086 = shalt.err (!%p6083_p5)
}
 0xf3e   : > { %5218 = dma.vmem_to_hbm [thread:$0]  (%p7743_p1), %s4398_s7, 256, %s7513_s3, %s4383_s10  }
 0xf3f PF: > { %s7744_s15 = sld [smem:[#allocation38_spill]]  ;;  %s7745_s16 = sld [smem:[#allocation31_spill]] }
 0xf40   : > { %s7746_s24 = sld [smem:[#allocation45_spill]] }
 0xf45   : > { %p5261_p3 = scmp.ge.s32.totalorder %s7744_s15, 2  ;;  %s4409_s11 = sand.u32 1, %s7745_s16  }
 0xf46   : > { %p7747_p9 = scmp.ne.s32.totalorder %s7746_s24, 0  ;;  %s4410_s4 = scalar_lea.sflag [#allocation5], %s4409_s11 }
 0xf48   : > { %p5253_p11 = pnand %p5261_p3, %p7747_p9 }
 0xf4a   : > { %6172 = dma.done.wait (!%p5253_p11), %s4410_s4, 256  }
 0xf4b   : > { %6174 = vsyncadd (!%p5253_p11), %s4410_s4, 4294967040  ;;  %s38_s2 = sadd.s32 1, %s7744_s15   ;;  %s7748_s27 = sld [smem:[#allocation29_spill]] }
 0xf4c   : > { %p35_p7 = scmp.ge.s32.totalorder %s38_s2, 6   ;;  %s7749_s28 = sld [smem:[#allocation30_spill]] }
 0xf4d   : > { %s7750_s29 = sld [smem:[#allocation42_spill]]  ;;  %s7751_s30 = sld [smem:[#allocation32_spill]] }
 0xf4e   : > { %s7752_s0 = sld [smem:[#allocation33_spill]]  ;;  %s7753_s19 = sld [smem:[#allocation43_spill]] }
 0xf4f   : > { %s7754_s1 = sld [smem:[#allocation36_spill]]  ;;  %s7755_s20 = sld [smem:[#allocation37_spill]] }
 0xf50   : > { %s7756_s21 = sld [smem:[#allocation40_spill]]  ;;  %s7757_s22 = sld [smem:[#allocation41_spill]] }
 0xf51   :  { %37 = sbr.rel (!%p35_p7) target bundleno = 32 (0x20), region = 250 }
 0xf58   :  { %4415 = vsyncpa [#allocation4], 1 }
 0xf59   :  { %4417 = vsyncpa [#allocation4 + $0x1], 1 }
 0xf5a   :  { %4418 = vsyncpa [#allocation7], 1 }
 0xf5b   :  { %4420 = vsyncpa [#allocation7 + $0x1], 1 }
 0xf5c   :  { %4421 = vsyncpa [#allocation10], 1 }
 0xf5d   :  { %4422 = vsyncpa [#allocation5], 1 }
 0xf5e   :  { %4424 = vsyncpa [#allocation5 + $0x1], 1 }

</bundles_post_ra>
